<compile_context>
chip_gen: v6e
topology: v6e:2x2x1
jax: 0.10.0
libtpu: 0.0.40
codegen_flags: <defaults>
</compile_context>

<pallas_src>
import numpy as np
import jax
import jax.numpy as jnp
from jax.experimental import pallas as pl
from jax.experimental.pallas import tpu as pltpu

# ----------------------------- config (small) -------------------------------
T = 8          # seq_len (utterances per dialogue)
B = 2          # batch (dialogues)  -- pad to >=8 for sublane fill if batched
PARTY = 2      # parties per dialogue
D_M = 32       # utterance feature dim
D_G = 32       # global state dim
D_P = 32       # party state dim
D_E = 32       # emotion state dim
OUT_PAD = 128  # lane-dense packed output width: [ e | alpha | zero pad ]

F32 = jnp.float32


def _vmem():
    return pl.BlockSpec(memory_space=pltpu.MemorySpace.VMEM)


# ------------------------- fused DialogueRNN kernel -------------------------
def dialogue_rnn_kernel(u_ref, qmask_ref,
                        wg_ref, bg_ref,
                        wp_ref, bp_ref,
                        we_ref, be_ref,
                        walpha_ref,
                        out_ref):
    Tn, Bn, _ = u_ref.shape
    P = qmask_ref.shape[2]
    Dg = wg_ref.shape[1] // 4
    Dp = wp_ref.shape[1] // 4
    De = we_ref.shape[1] // 4
    out_pad = out_ref.shape[2]
    pad_w = out_pad - De - Tn

    # loop-invariant small parameters (a handful of vregs -- safe to hoist)
    bg = bg_ref[...]
    bp = bp_ref[...]
    be = be_ref[...]
    w_row = walpha_ref[...]                       # (1, Dg)
    zero_pad = jnp.zeros((Bn, pad_w), F32) if pad_w > 0 else None

    def fused_gru(xh, h, w, b, H):
        """PyTorch GRUCell with the input+hidden matmuls fused into one.

        w: (In+H, 4H) with column blocks [r | z | n_i | n_h]; xh is
        concat([x, h], axis=1).  b: (1, 4H) with pre-summed r/z biases.
        """
        g = jnp.dot(xh, w, preferred_element_type=F32) + b     # (M, 4H)
        r = jax.nn.sigmoid(g[:, 0:H])
        z = jax.nn.sigmoid(g[:, H:2 * H])
        n = jnp.tanh(g[:, 2 * H:3 * H] + r * g[:, 3 * H:4 * H])
        return (1.0 - z) * n + z * h

    g_prev = jnp.zeros((Bn, Dg), F32)
    e_prev = jnp.zeros((Bn, De), F32)
    q_stack = jnp.zeros((P * Bn, Dp), F32)        # party-major stacked q

    g_hist = []     # g_0 .. g_{t-1}  (vreg-resident; loop is unrolled)
    s_cols = []     # cached attention logits <g_j, w_alpha>, (B, 1) each
    rows = []       # packed per-step output rows

    for t in range(Tn):                            # static -> fully unrolled
        u_t = u_ref[t]                             # (B, D_m)
        qm_t = qmask_ref[t]                        # (B, P)

        # ---- speaker party-state selection (_select_parties, one-hot qmask)
        q0_sel = jnp.zeros((Bn, Dp), F32)
        for p in range(P):
            q0_sel = q0_sel + qm_t[:, p:p + 1] * q_stack[p * Bn:(p + 1) * Bn]

        # ---- global GRU: g_t = GRU([U_t, q0_sel], g_{t-1})   (one matmul)
        xh_g = jnp.concatenate([u_t, q0_sel, g_prev], axis=1)
        g_t = fused_gru(xh_g, g_prev, wg_ref[...], bg, Dg)

        # ---- SimpleAttention over g_hist[0:t] using cached logits
        if t == 0:
            c_t = jnp.zeros((Bn, Dg), F32)
            alpha_full = jnp.zeros((Bn, Tn), F32)
        else:
            scales = jnp.concatenate(s_cols, axis=1)           # (B, t)
            mx = jnp.max(scales, axis=-1, keepdims=True)
            pexp = jnp.exp(scales - mx)
            denom = jnp.sum(pexp, axis=-1, keepdims=True)
            alpha = pexp * pl.reciprocal(denom, approx=False)  # exact softmax
            c_t = jnp.zeros((Bn, Dg), F32)
            for j in range(t):
                c_t = c_t + alpha[:, j:j + 1] * g_hist[j]
            alpha_full = jnp.concatenate(
                [alpha, jnp.zeros((Bn, Tn - t), F32)], axis=1)

        # cache this step's logit + state for later steps' attention
        s_cols.append(jnp.sum(g_t * w_row, axis=-1, keepdims=True))
        g_hist.append(g_t)

        # ---- party GRU: both parties in ONE stacked matmul
        x_p = jnp.concatenate([u_t, c_t], axis=1)              # (B, Dm+Dg)
        x_p_stack = jnp.concatenate([x_p] * P, axis=0)         # (P*B, Dm+Dg)
        xh_p = jnp.concatenate([x_p_stack, q_stack], axis=1)   # (P*B, Dm+Dg+Dp)
        qs_stack = fused_gru(xh_p, q_stack, wp_ref[...], bp, Dp)
        sel = jnp.concatenate([qm_t[:, p:p + 1] for p in range(P)], axis=0)
        q_stack = q_stack * (1.0 - sel) + qs_stack * sel   # listener_state=False

        # updated speaker state feeds the emotion cell
        q_sel = jnp.zeros((Bn, Dp), F32)
        for p in range(P):
            q_sel = q_sel + qm_t[:, p:p + 1] * q_stack[p * Bn:(p + 1) * Bn]

        # ---- emotion GRU cell (one matmul)
        xh_e = jnp.concatenate([q_sel, e_prev], axis=1)
        e_t = fused_gru(xh_e, e_prev, we_ref[...], be, De)

        # ---- packed output row: [ e_t | alpha(0:T) | zero pad ]
        pieces = [e_t, alpha_full] + ([zero_pad] if zero_pad is not None else [])
        rows.append(jnp.concatenate(pieces, axis=1))

        g_prev, e_prev = g_t, e_t

    # single lane-dense store of all T rows
    out_ref[...] = jnp.stack(rows, axis=0)


# ------------------------ weight packing (wrapper side) ---------------------
def _pack_gru(wi, wh, bi, bh, H):
    """Pack separate (In,3H)/(H,3H) GRU weights into one (In+H, 4H) matrix.

    Column blocks [r | z | n_i | n_h]; r/z biases pre-summed.
    """
    In = wi.shape[0]
    zi = jnp.zeros((In, H), F32)
    zh = jnp.zeros((H, H), F32)
    top = jnp.concatenate(
        [wi[:, 0:H], wi[:, H:2 * H], wi[:, 2 * H:3 * H], zi], axis=1)
    bot = jnp.concatenate(
        [wh[:, 0:H], wh[:, H:2 * H], zh, wh[:, 2 * H:3 * H]], axis=1)
    w = jnp.concatenate([top, bot], axis=0)
    b = jnp.concatenate(
        [bi[:, 0:H] + bh[:, 0:H], bi[:, H:2 * H] + bh[:, H:2 * H],
         bi[:, 2 * H:3 * H], bh[:, 2 * H:3 * H]], axis=1)
    return w, b


def dialogue_rnn_forward(U, qmask, p):
    Tn, Bn, _ = U.shape
    assert D_E + Tn <= OUT_PAD
    wg, bg = _pack_gru(p["wi_g"], p["wh_g"], p["bi_g"], p["bh_g"], D_G)
    wp, bp = _pack_gru(p["wi_p"], p["wh_p"], p["bi_p"], p["bh_p"], D_P)
    we, be = _pack_gru(p["wi_e"], p["wh_e"], p["bi_e"], p["bh_e"], D_E)

    packed = pl.pallas_call(
        dialogue_rnn_kernel,
        out_shape=jax.ShapeDtypeStruct((Tn, Bn, OUT_PAD), F32),
        in_specs=[_vmem()] * 9,
        out_specs=_vmem(),
    )(U, qmask, wg, bg, wp, bp, we, be, p["w_alpha"])

    e = packed[..., :D_E]                  # (T, B, D_e)
    alpha = packed[..., D_E:D_E + Tn]      # (T, B, T) prefix-softmax weights
    return e, alpha


# ----------------------- pure-JAX reference (for checking) ------------------
def _gru_ref(x, h, wi, wh, bi, bh, H):
    gi = jnp.dot(x, wi) + bi
    gh = jnp.dot(h, wh) + bh
    r = jax.nn.sigmoid(gi[:, 0:H] + gh[:, 0:H])
    z = jax.nn.sigmoid(gi[:, H:2 * H] + gh[:, H:2 * H])
    n = jnp.tanh(gi[:, 2 * H:3 * H] + r * gh[:, 2 * H:3 * H])
    return (1.0 - z) * n + z * h


def dialogue_rnn_reference(U, qmask, p):
    Tn, Bn, _ = U.shape
    P = qmask.shape[-1]
    Dg, Dp, De = p["wh_g"].shape[0], p["wh_p"].shape[0], p["wh_e"].shape[0]

    g_hist = []
    q = [jnp.zeros((Bn, Dp), F32) for _ in range(P)]
    g_prev = jnp.zeros((Bn, Dg), F32)
    e_prev = jnp.zeros((Bn, De), F32)
    es, alphas = [], []
    for t in range(Tn):
        u_t, qm = U[t], qmask[t]
        q0_sel = sum(qm[:, i:i + 1] * q[i] for i in range(P))
        g_t = _gru_ref(jnp.concatenate([u_t, q0_sel], 1), g_prev,
                       p["wi_g"], p["wh_g"], p["bi_g"], p["bh_g"], Dg)
        if t == 0:
            c_t = jnp.zeros((Bn, Dg), F32)
            alpha_t = jnp.zeros((Bn, Tn), F32)
        else:
            M = jnp.stack(g_hist, 0)                          # (t, B, Dg)
            scale = jnp.einsum('tbd,d->tb', M, p["w_alpha"][0])
            a = jax.nn.softmax(scale, axis=0)                 # (t, B)
            c_t = jnp.einsum('tb,tbd->bd', a, M)
            alpha_t = jnp.concatenate(
                [a.T, jnp.zeros((Bn, Tn - t), F32)], axis=1)
        g_hist.append(g_t)
        x_p = jnp.concatenate([u_t, c_t], 1)
        gi_p = x_p @ p["wi_p"] + p["bi_p"]
        q_next, q_sel_new = [], jnp.zeros((Bn, Dp), F32)
        for i in range(P):
            gh_p = q[i] @ p["wh_p"] + p["bh_p"]
            r = jax.nn.sigmoid(gi_p[:, 0:Dp] + gh_p[:, 0:Dp])
            z = jax.nn.sigmoid(gi_p[:, Dp:2 * Dp] + gh_p[:, Dp:2 * Dp])
            n = jnp.tanh(gi_p[:, 2 * Dp:3 * Dp] + r * gh_p[:, 2 * Dp:3 * Dp])
            qs = (1.0 - z) * n + z * q[i]
            sel = qm[:, i:i + 1]
            qn = q[i] * (1.0 - sel) + qs * sel
            q_next.append(qn)
            q_sel_new = q_sel_new + sel * qn
        q = q_next
        e_t = _gru_ref(q_sel_new, e_prev, p["wi_e"], p["wh_e"],
                       p["bi_e"], p["bh_e"], De)
        es.append(e_t)
        alphas.append(alpha_t)
        g_prev, e_prev = g_t, e_t
    return jnp.stack(es, 0), jnp.stack(alphas, 0)


# ----------------------------- parameter init -------------------------------
def init_params(key):
    ks = iter(jax.random.split(key, 16))

    def rnd(shape, scale=0.1):
        return (scale * jax.random.normal(next(ks), shape)).astype(F32)

    p = {}
    # GRUCell weights stored pre-transposed as (In, 3H); gate order [r | z | n].
    p["wi_g"] = rnd((D_M + D_P, 3 * D_G)); p["wh_g"] = rnd((D_G, 3 * D_G))
    p["bi_g"] = rnd((1, 3 * D_G));          p["bh_g"] = rnd((1, 3 * D_G))
    p["wi_p"] = rnd((D_M + D_G, 3 * D_P)); p["wh_p"] = rnd((D_P, 3 * D_P))
    p["bi_p"] = rnd((1, 3 * D_P));          p["bh_p"] = rnd((1, 3 * D_P))
    p["wi_e"] = rnd((D_P, 3 * D_E));       p["wh_e"] = rnd((D_E, 3 * D_E))
    p["bi_e"] = rnd((1, 3 * D_E));          p["bh_e"] = rnd((1, 3 * D_E))
    p["w_alpha"] = rnd((1, D_G))           # SimpleAttention scalar (no bias)
    return p


if __name__ == "__main__":
    key = jax.random.PRNGKey(0)
    k_param, k_u = jax.random.split(key)
    params = init_params(k_param)

    # utterance features U: (seq_len, batch, D_m)
    U = jax.random.normal(k_u, (T, B, D_M), dtype=F32)

    # one-hot speaker mask: parties alternate over time, offset per dialogue
    qmask_np = np.zeros((T, B, PARTY), np.float32)
    for t in range(T):
        for b in range(B):
            qmask_np[t, b, (t + b) % PARTY] = 1.0
    qmask = jnp.asarray(qmask_np)

    e, alpha = dialogue_rnn_forward(U, qmask, params)
    jax.block_until_ready((e, alpha))
    assert e.shape == (T, B, D_E) and alpha.shape == (T, B, T)
    assert bool(jnp.all(jnp.isfinite(e)))

    e_ref, alpha_ref = dialogue_rnn_reference(U, qmask, params)
    assert float(jnp.max(jnp.abs(e - e_ref))) < 5e-2
    assert float(jnp.max(jnp.abs(alpha - alpha_ref))) < 5e-2

    print("KERNEL_OK")
</pallas_src>

<mosaic_0001>
module attributes {stable_mosaic.version = 11 : i64} {
  func.func @dialogue_rnn_kernel(%arg0: memref<8x2x32xf32, #tpu.memory_space<vmem>>, %arg1: memref<8x2x2xf32, #tpu.memory_space<vmem>>, %arg2: memref<96x128xf32, #tpu.memory_space<vmem>>, %arg3: memref<1x128xf32, #tpu.memory_space<vmem>>, %arg4: memref<96x128xf32, #tpu.memory_space<vmem>>, %arg5: memref<1x128xf32, #tpu.memory_space<vmem>>, %arg6: memref<64x128xf32, #tpu.memory_space<vmem>>, %arg7: memref<1x128xf32, #tpu.memory_space<vmem>>, %arg8: memref<1x32xf32, #tpu.memory_space<vmem>>, %arg9: memref<8x2x128xf32, #tpu.memory_space<vmem>>) attributes {dimension_semantics = [], scalar_prefetch = 0 : i64, scratch_operands = 0 : i64, tpu.core_type = #tpu.core_type<tc>} {
    %c0 = arith.constant 0 : index
    %c0_0 = arith.constant 0 : index
    %0 = vector.load %arg3[%c0, %c0_0] : memref<1x128xf32, #tpu.memory_space<vmem>>, vector<1x128xf32>
    %c0_1 = arith.constant 0 : index
    %c0_2 = arith.constant 0 : index
    %1 = vector.load %arg5[%c0_1, %c0_2] : memref<1x128xf32, #tpu.memory_space<vmem>>, vector<1x128xf32>
    %c0_3 = arith.constant 0 : index
    %c0_4 = arith.constant 0 : index
    %2 = vector.load %arg7[%c0_3, %c0_4] : memref<1x128xf32, #tpu.memory_space<vmem>>, vector<1x128xf32>
    %c0_5 = arith.constant 0 : index
    %c0_6 = arith.constant 0 : index
    %3 = vector.load %arg8[%c0_5, %c0_6] : memref<1x32xf32, #tpu.memory_space<vmem>>, vector<1x32xf32>
    %cst = arith.constant 0.000000e+00 : f32
    %4 = vector.broadcast %cst : f32 to vector<2x88xf32>
    %cst_7 = arith.constant 0.000000e+00 : f32
    %5 = vector.broadcast %cst_7 : f32 to vector<2x32xf32>
    %cst_8 = arith.constant 0.000000e+00 : f32
    %6 = vector.broadcast %cst_8 : f32 to vector<2x32xf32>
    %cst_9 = arith.constant 0.000000e+00 : f32
    %7 = vector.broadcast %cst_9 : f32 to vector<4x32xf32>
    %c0_10 = arith.constant 0 : index
    %c0_11 = arith.constant 0 : index
    %c0_12 = arith.constant 0 : index
    %8 = vector.load %arg0[%c0_10, %c0_11, %c0_12] : memref<8x2x32xf32, #tpu.memory_space<vmem>>, vector<1x2x32xf32>
    %9 = vector.shape_cast %8 : vector<1x2x32xf32> to vector<2x32xf32>
    %c0_13 = arith.constant 0 : index
    %c0_14 = arith.constant 0 : index
    %c0_15 = arith.constant 0 : index
    %10 = vector.load %arg1[%c0_13, %c0_14, %c0_15] : memref<8x2x2xf32, #tpu.memory_space<vmem>>, vector<1x2x2xf32>
    %11 = vector.shape_cast %10 : vector<1x2x2xf32> to vector<2x2xf32>
    %cst_16 = arith.constant 0.000000e+00 : f32
    %12 = vector.broadcast %cst_16 : f32 to vector<2x32xf32>
    %13 = vector.extract_strided_slice %11 {offsets = [0, 0], sizes = [2, 1], strides = [1, 1]} : vector<2x2xf32> to vector<2x1xf32>
    %14 = vector.extract_strided_slice %7 {offsets = [0, 0], sizes = [2, 32], strides = [1, 1]} : vector<4x32xf32> to vector<2x32xf32>
    %15 = vector.broadcast %13 : vector<2x1xf32> to vector<2x32xf32>
    %16 = arith.mulf %15, %14 : vector<2x32xf32>
    %17 = arith.addf %12, %16 : vector<2x32xf32>
    %18 = vector.extract_strided_slice %11 {offsets = [0, 1], sizes = [2, 1], strides = [1, 1]} : vector<2x2xf32> to vector<2x1xf32>
    %19 = vector.extract_strided_slice %7 {offsets = [2, 0], sizes = [2, 32], strides = [1, 1]} : vector<4x32xf32> to vector<2x32xf32>
    %20 = vector.broadcast %18 : vector<2x1xf32> to vector<2x32xf32>
    %21 = arith.mulf %20, %19 : vector<2x32xf32>
    %22 = arith.addf %17, %21 : vector<2x32xf32>
    %23 = tpu.concatenate %9, %22, %5 in 1 : vector<2x32xf32>, vector<2x32xf32>, vector<2x32xf32> -> vector<2x96xf32>
    %c0_17 = arith.constant 0 : index
    %c0_18 = arith.constant 0 : index
    %24 = vector.load %arg2[%c0_17, %c0_18] : memref<96x128xf32, #tpu.memory_space<vmem>>, vector<96x128xf32>
    %cst_19 = arith.constant dense<0.000000e+00> : vector<2x128xf32>
    %25 = tpu.matmul %23, %24, %cst_19 {dimension_numbers = #tpu.dot_dimension_numbers<[1], [0], [0], [1], [0, 0, 1, 1], [], []>} : vector<2x96xf32>, vector<96x128xf32>, vector<2x128xf32> -> vector<2x128xf32>
    %26 = vector.broadcast %0 : vector<1x128xf32> to vector<2x128xf32>
    %27 = arith.addf %25, %26 : vector<2x128xf32>
    %28 = vector.extract_strided_slice %27 {offsets = [0, 0], sizes = [2, 32], strides = [1, 1]} : vector<2x128xf32> to vector<2x32xf32>
    %29 = arith.negf %28 : vector<2x32xf32>
    %30 = math.exp %29 : vector<2x32xf32>
    %cst_20 = arith.constant 1.000000e+00 : f32
    %31 = vector.broadcast %cst_20 : f32 to vector<2x32xf32>
    %32 = arith.addf %31, %30 : vector<2x32xf32>
    %33 = arith.divf %31, %32 : vector<2x32xf32>
    %34 = vector.extract_strided_slice %27 {offsets = [0, 32], sizes = [2, 32], strides = [1, 1]} : vector<2x128xf32> to vector<2x32xf32>
    %35 = arith.negf %34 : vector<2x32xf32>
    %36 = math.exp %35 : vector<2x32xf32>
    %cst_21 = arith.constant 1.000000e+00 : f32
    %37 = vector.broadcast %cst_21 : f32 to vector<2x32xf32>
    %38 = arith.addf %37, %36 : vector<2x32xf32>
    %39 = arith.divf %37, %38 : vector<2x32xf32>
    %40 = vector.extract_strided_slice %27 {offsets = [0, 64], sizes = [2, 32], strides = [1, 1]} : vector<2x128xf32> to vector<2x32xf32>
    %41 = vector.extract_strided_slice %27 {offsets = [0, 96], sizes = [2, 32], strides = [1, 1]} : vector<2x128xf32> to vector<2x32xf32>
    %42 = arith.mulf %33, %41 : vector<2x32xf32>
    %43 = arith.addf %40, %42 : vector<2x32xf32>
    %44 = math.tanh %43 : vector<2x32xf32>
    %cst_22 = arith.constant 1.000000e+00 : f32
    %45 = vector.broadcast %cst_22 : f32 to vector<2x32xf32>
    %46 = arith.subf %45, %39 : vector<2x32xf32>
    %47 = arith.mulf %46, %44 : vector<2x32xf32>
    %48 = arith.mulf %39, %5 : vector<2x32xf32>
    %49 = arith.addf %47, %48 : vector<2x32xf32>
    %cst_23 = arith.constant 0.000000e+00 : f32
    %50 = vector.broadcast %cst_23 : f32 to vector<2x32xf32>
    %cst_24 = arith.constant 0.000000e+00 : f32
    %51 = vector.broadcast %cst_24 : f32 to vector<2x8xf32>
    %52 = vector.broadcast %3 : vector<1x32xf32> to vector<2x32xf32>
    %53 = arith.mulf %49, %52 : vector<2x32xf32>
    %cst_25 = arith.constant dense<0.000000e+00> : vector<2xf32>
    %54 = vector.multi_reduction <add>, %53, %cst_25 [1] : vector<2x32xf32> to vector<2xf32>
    %55 = vector.shape_cast %54 : vector<2xf32> to vector<2x1xf32>
    %56 = tpu.concatenate %9, %50 in 1 : vector<2x32xf32>, vector<2x32xf32> -> vector<2x64xf32>
    %57 = tpu.concatenate %56, %56 in 0 : vector<2x64xf32>, vector<2x64xf32> -> vector<4x64xf32>
    %58 = tpu.concatenate %57, %7 in 1 : vector<4x64xf32>, vector<4x32xf32> -> vector<4x96xf32>
    %c0_26 = arith.constant 0 : index
    %c0_27 = arith.constant 0 : index
    %59 = vector.load %arg4[%c0_26, %c0_27] : memref<96x128xf32, #tpu.memory_space<vmem>>, vector<96x128xf32>
    %cst_28 = arith.constant dense<0.000000e+00> : vector<4x128xf32>
    %60 = tpu.matmul %58, %59, %cst_28 {dimension_numbers = #tpu.dot_dimension_numbers<[1], [0], [0], [1], [0, 0, 1, 1], [], []>} : vector<4x96xf32>, vector<96x128xf32>, vector<4x128xf32> -> vector<4x128xf32>
    %61 = vector.broadcast %1 : vector<1x128xf32> to vector<4x128xf32>
    %62 = arith.addf %60, %61 : vector<4x128xf32>
    %63 = vector.extract_strided_slice %62 {offsets = [0, 0], sizes = [4, 32], strides = [1, 1]} : vector<4x128xf32> to vector<4x32xf32>
    %64 = arith.negf %63 : vector<4x32xf32>
    %65 = math.exp %64 : vector<4x32xf32>
    %cst_29 = arith.constant 1.000000e+00 : f32
    %66 = vector.broadcast %cst_29 : f32 to vector<4x32xf32>
    %67 = arith.addf %66, %65 : vector<4x32xf32>
    %68 = arith.divf %66, %67 : vector<4x32xf32>
    %69 = vector.extract_strided_slice %62 {offsets = [0, 32], sizes = [4, 32], strides = [1, 1]} : vector<4x128xf32> to vector<4x32xf32>
    %70 = arith.negf %69 : vector<4x32xf32>
    %71 = math.exp %70 : vector<4x32xf32>
    %cst_30 = arith.constant 1.000000e+00 : f32
    %72 = vector.broadcast %cst_30 : f32 to vector<4x32xf32>
    %73 = arith.addf %72, %71 : vector<4x32xf32>
    %74 = arith.divf %72, %73 : vector<4x32xf32>
    %75 = vector.extract_strided_slice %62 {offsets = [0, 64], sizes = [4, 32], strides = [1, 1]} : vector<4x128xf32> to vector<4x32xf32>
    %76 = vector.extract_strided_slice %62 {offsets = [0, 96], sizes = [4, 32], strides = [1, 1]} : vector<4x128xf32> to vector<4x32xf32>
    %77 = arith.mulf %68, %76 : vector<4x32xf32>
    %78 = arith.addf %75, %77 : vector<4x32xf32>
    %79 = math.tanh %78 : vector<4x32xf32>
    %cst_31 = arith.constant 1.000000e+00 : f32
    %80 = vector.broadcast %cst_31 : f32 to vector<4x32xf32>
    %81 = arith.subf %80, %74 : vector<4x32xf32>
    %82 = arith.mulf %81, %79 : vector<4x32xf32>
    %83 = arith.mulf %74, %7 : vector<4x32xf32>
    %84 = arith.addf %82, %83 : vector<4x32xf32>
    %85 = vector.extract_strided_slice %11 {offsets = [0, 0], sizes = [2, 1], strides = [1, 1]} : vector<2x2xf32> to vector<2x1xf32>
    %86 = vector.extract_strided_slice %11 {offsets = [0, 1], sizes = [2, 1], strides = [1, 1]} : vector<2x2xf32> to vector<2x1xf32>
    %87 = tpu.concatenate %85, %86 in 0 : vector<2x1xf32>, vector<2x1xf32> -> vector<4x1xf32>
    %cst_32 = arith.constant 1.000000e+00 : f32
    %88 = vector.broadcast %cst_32 : f32 to vector<4x1xf32>
    %89 = arith.subf %88, %87 : vector<4x1xf32>
    %90 = vector.broadcast %89 : vector<4x1xf32> to vector<4x32xf32>
    %91 = arith.mulf %7, %90 : vector<4x32xf32>
    %92 = vector.broadcast %87 : vector<4x1xf32> to vector<4x32xf32>
    %93 = arith.mulf %84, %92 : vector<4x32xf32>
    %94 = arith.addf %91, %93 : vector<4x32xf32>
    %cst_33 = arith.constant 0.000000e+00 : f32
    %95 = vector.broadcast %cst_33 : f32 to vector<2x32xf32>
    %96 = vector.extract_strided_slice %11 {offsets = [0, 0], sizes = [2, 1], strides = [1, 1]} : vector<2x2xf32> to vector<2x1xf32>
    %97 = vector.extract_strided_slice %94 {offsets = [0, 0], sizes = [2, 32], strides = [1, 1]} : vector<4x32xf32> to vector<2x32xf32>
    %98 = vector.broadcast %96 : vector<2x1xf32> to vector<2x32xf32>
    %99 = arith.mulf %98, %97 : vector<2x32xf32>
    %100 = arith.addf %95, %99 : vector<2x32xf32>
    %101 = vector.extract_strided_slice %11 {offsets = [0, 1], sizes = [2, 1], strides = [1, 1]} : vector<2x2xf32> to vector<2x1xf32>
    %102 = vector.extract_strided_slice %94 {offsets = [2, 0], sizes = [2, 32], strides = [1, 1]} : vector<4x32xf32> to vector<2x32xf32>
    %103 = vector.broadcast %101 : vector<2x1xf32> to vector<2x32xf32>
    %104 = arith.mulf %103, %102 : vector<2x32xf32>
    %105 = arith.addf %100, %104 : vector<2x32xf32>
    %106 = tpu.concatenate %105, %6 in 1 : vector<2x32xf32>, vector<2x32xf32> -> vector<2x64xf32>
    %c0_34 = arith.constant 0 : index
    %c0_35 = arith.constant 0 : index
    %107 = vector.load %arg6[%c0_34, %c0_35] : memref<64x128xf32, #tpu.memory_space<vmem>>, vector<64x128xf32>
    %cst_36 = arith.constant dense<0.000000e+00> : vector<2x128xf32>
    %108 = tpu.matmul %106, %107, %cst_36 {dimension_numbers = #tpu.dot_dimension_numbers<[1], [0], [0], [1], [0, 0, 1, 1], [], []>} : vector<2x64xf32>, vector<64x128xf32>, vector<2x128xf32> -> vector<2x128xf32>
    %109 = vector.broadcast %2 : vector<1x128xf32> to vector<2x128xf32>
    %110 = arith.addf %108, %109 : vector<2x128xf32>
    %111 = vector.extract_strided_slice %110 {offsets = [0, 0], sizes = [2, 32], strides = [1, 1]} : vector<2x128xf32> to vector<2x32xf32>
    %112 = arith.negf %111 : vector<2x32xf32>
    %113 = math.exp %112 : vector<2x32xf32>
    %cst_37 = arith.constant 1.000000e+00 : f32
    %114 = vector.broadcast %cst_37 : f32 to vector<2x32xf32>
    %115 = arith.addf %114, %113 : vector<2x32xf32>
    %116 = arith.divf %114, %115 : vector<2x32xf32>
    %117 = vector.extract_strided_slice %110 {offsets = [0, 32], sizes = [2, 32], strides = [1, 1]} : vector<2x128xf32> to vector<2x32xf32>
    %118 = arith.negf %117 : vector<2x32xf32>
    %119 = math.exp %118 : vector<2x32xf32>
    %cst_38 = arith.constant 1.000000e+00 : f32
    %120 = vector.broadcast %cst_38 : f32 to vector<2x32xf32>
    %121 = arith.addf %120, %119 : vector<2x32xf32>
    %122 = arith.divf %120, %121 : vector<2x32xf32>
    %123 = vector.extract_strided_slice %110 {offsets = [0, 64], sizes = [2, 32], strides = [1, 1]} : vector<2x128xf32> to vector<2x32xf32>
    %124 = vector.extract_strided_slice %110 {offsets = [0, 96], sizes = [2, 32], strides = [1, 1]} : vector<2x128xf32> to vector<2x32xf32>
    %125 = arith.mulf %116, %124 : vector<2x32xf32>
    %126 = arith.addf %123, %125 : vector<2x32xf32>
    %127 = math.tanh %126 : vector<2x32xf32>
    %cst_39 = arith.constant 1.000000e+00 : f32
    %128 = vector.broadcast %cst_39 : f32 to vector<2x32xf32>
    %129 = arith.subf %128, %122 : vector<2x32xf32>
    %130 = arith.mulf %129, %127 : vector<2x32xf32>
    %131 = arith.mulf %122, %6 : vector<2x32xf32>
    %132 = arith.addf %130, %131 : vector<2x32xf32>
    %133 = tpu.concatenate %132, %51, %4 in 1 : vector<2x32xf32>, vector<2x8xf32>, vector<2x88xf32> -> vector<2x128xf32>
    %c1 = arith.constant 1 : index
    %c0_40 = arith.constant 0 : index
    %c0_41 = arith.constant 0 : index
    %134 = vector.load %arg0[%c1, %c0_40, %c0_41] : memref<8x2x32xf32, #tpu.memory_space<vmem>>, vector<1x2x32xf32>
    %135 = vector.shape_cast %134 : vector<1x2x32xf32> to vector<2x32xf32>
    %c1_42 = arith.constant 1 : index
    %c0_43 = arith.constant 0 : index
    %c0_44 = arith.constant 0 : index
    %136 = vector.load %arg1[%c1_42, %c0_43, %c0_44] : memref<8x2x2xf32, #tpu.memory_space<vmem>>, vector<1x2x2xf32>
    %137 = vector.shape_cast %136 : vector<1x2x2xf32> to vector<2x2xf32>
    %cst_45 = arith.constant 0.000000e+00 : f32
    %138 = vector.broadcast %cst_45 : f32 to vector<2x32xf32>
    %139 = vector.extract_strided_slice %137 {offsets = [0, 0], sizes = [2, 1], strides = [1, 1]} : vector<2x2xf32> to vector<2x1xf32>
    %140 = vector.extract_strided_slice %94 {offsets = [0, 0], sizes = [2, 32], strides = [1, 1]} : vector<4x32xf32> to vector<2x32xf32>
    %141 = vector.broadcast %139 : vector<2x1xf32> to vector<2x32xf32>
    %142 = arith.mulf %141, %140 : vector<2x32xf32>
    %143 = arith.addf %138, %142 : vector<2x32xf32>
    %144 = vector.extract_strided_slice %137 {offsets = [0, 1], sizes = [2, 1], strides = [1, 1]} : vector<2x2xf32> to vector<2x1xf32>
    %145 = vector.extract_strided_slice %94 {offsets = [2, 0], sizes = [2, 32], strides = [1, 1]} : vector<4x32xf32> to vector<2x32xf32>
    %146 = vector.broadcast %144 : vector<2x1xf32> to vector<2x32xf32>
    %147 = arith.mulf %146, %145 : vector<2x32xf32>
    %148 = arith.addf %143, %147 : vector<2x32xf32>
    %149 = tpu.concatenate %135, %148, %49 in 1 : vector<2x32xf32>, vector<2x32xf32>, vector<2x32xf32> -> vector<2x96xf32>
    %c0_46 = arith.constant 0 : index
    %c0_47 = arith.constant 0 : index
    %150 = vector.load %arg2[%c0_46, %c0_47] : memref<96x128xf32, #tpu.memory_space<vmem>>, vector<96x128xf32>
    %cst_48 = arith.constant dense<0.000000e+00> : vector<2x128xf32>
    %151 = tpu.matmul %149, %150, %cst_48 {dimension_numbers = #tpu.dot_dimension_numbers<[1], [0], [0], [1], [0, 0, 1, 1], [], []>} : vector<2x96xf32>, vector<96x128xf32>, vector<2x128xf32> -> vector<2x128xf32>
    %152 = vector.broadcast %0 : vector<1x128xf32> to vector<2x128xf32>
    %153 = arith.addf %151, %152 : vector<2x128xf32>
    %154 = vector.extract_strided_slice %153 {offsets = [0, 0], sizes = [2, 32], strides = [1, 1]} : vector<2x128xf32> to vector<2x32xf32>
    %155 = arith.negf %154 : vector<2x32xf32>
    %156 = math.exp %155 : vector<2x32xf32>
    %cst_49 = arith.constant 1.000000e+00 : f32
    %157 = vector.broadcast %cst_49 : f32 to vector<2x32xf32>
    %158 = arith.addf %157, %156 : vector<2x32xf32>
    %159 = arith.divf %157, %158 : vector<2x32xf32>
    %160 = vector.extract_strided_slice %153 {offsets = [0, 32], sizes = [2, 32], strides = [1, 1]} : vector<2x128xf32> to vector<2x32xf32>
    %161 = arith.negf %160 : vector<2x32xf32>
    %162 = math.exp %161 : vector<2x32xf32>
    %cst_50 = arith.constant 1.000000e+00 : f32
    %163 = vector.broadcast %cst_50 : f32 to vector<2x32xf32>
    %164 = arith.addf %163, %162 : vector<2x32xf32>
    %165 = arith.divf %163, %164 : vector<2x32xf32>
    %166 = vector.extract_strided_slice %153 {offsets = [0, 64], sizes = [2, 32], strides = [1, 1]} : vector<2x128xf32> to vector<2x32xf32>
    %167 = vector.extract_strided_slice %153 {offsets = [0, 96], sizes = [2, 32], strides = [1, 1]} : vector<2x128xf32> to vector<2x32xf32>
    %168 = arith.mulf %159, %167 : vector<2x32xf32>
    %169 = arith.addf %166, %168 : vector<2x32xf32>
    %170 = math.tanh %169 : vector<2x32xf32>
    %cst_51 = arith.constant 1.000000e+00 : f32
    %171 = vector.broadcast %cst_51 : f32 to vector<2x32xf32>
    %172 = arith.subf %171, %165 : vector<2x32xf32>
    %173 = arith.mulf %172, %170 : vector<2x32xf32>
    %174 = arith.mulf %165, %49 : vector<2x32xf32>
    %175 = arith.addf %173, %174 : vector<2x32xf32>
    %cst_52 = arith.constant dense<0xFF800000> : vector<2xf32>
    %176 = vector.multi_reduction <maximumf>, %55, %cst_52 [1] : vector<2x1xf32> to vector<2xf32>
    %177 = vector.shape_cast %176 : vector<2xf32> to vector<2x1xf32>
    %178 = arith.subf %55, %177 : vector<2x1xf32>
    %179 = math.exp %178 : vector<2x1xf32>
    %cst_53 = arith.constant dense<0.000000e+00> : vector<2xf32>
    %180 = vector.multi_reduction <add>, %179, %cst_53 [1] : vector<2x1xf32> to vector<2xf32>
    %181 = vector.shape_cast %180 : vector<2xf32> to vector<2x1xf32>
    %182 = tpu.reciprocal %181 : vector<2x1xf32> -> vector<2x1xf32>
    %183 = arith.mulf %179, %182 : vector<2x1xf32>
    %cst_54 = arith.constant 0.000000e+00 : f32
    %184 = vector.broadcast %cst_54 : f32 to vector<2x32xf32>
    %185 = vector.broadcast %183 : vector<2x1xf32> to vector<2x32xf32>
    %186 = arith.mulf %185, %49 : vector<2x32xf32>
    %187 = arith.addf %184, %186 : vector<2x32xf32>
    %cst_55 = arith.constant 0.000000e+00 : f32
    %188 = vector.broadcast %cst_55 : f32 to vector<2x7xf32>
    %189 = tpu.concatenate %183, %188 in 1 : vector<2x1xf32>, vector<2x7xf32> -> vector<2x8xf32>
    %190 = vector.broadcast %3 : vector<1x32xf32> to vector<2x32xf32>
    %191 = arith.mulf %175, %190 : vector<2x32xf32>
    %cst_56 = arith.constant dense<0.000000e+00> : vector<2xf32>
    %192 = vector.multi_reduction <add>, %191, %cst_56 [1] : vector<2x32xf32> to vector<2xf32>
    %193 = vector.shape_cast %192 : vector<2xf32> to vector<2x1xf32>
    %194 = tpu.concatenate %135, %187 in 1 : vector<2x32xf32>, vector<2x32xf32> -> vector<2x64xf32>
    %195 = tpu.concatenate %194, %194 in 0 : vector<2x64xf32>, vector<2x64xf32> -> vector<4x64xf32>
    %196 = tpu.concatenate %195, %94 in 1 : vector<4x64xf32>, vector<4x32xf32> -> vector<4x96xf32>
    %c0_57 = arith.constant 0 : index
    %c0_58 = arith.constant 0 : index
    %197 = vector.load %arg4[%c0_57, %c0_58] : memref<96x128xf32, #tpu.memory_space<vmem>>, vector<96x128xf32>
    %cst_59 = arith.constant dense<0.000000e+00> : vector<4x128xf32>
    %198 = tpu.matmul %196, %197, %cst_59 {dimension_numbers = #tpu.dot_dimension_numbers<[1], [0], [0], [1], [0, 0, 1, 1], [], []>} : vector<4x96xf32>, vector<96x128xf32>, vector<4x128xf32> -> vector<4x128xf32>
    %199 = vector.broadcast %1 : vector<1x128xf32> to vector<4x128xf32>
    %200 = arith.addf %198, %199 : vector<4x128xf32>
    %201 = vector.extract_strided_slice %200 {offsets = [0, 0], sizes = [4, 32], strides = [1, 1]} : vector<4x128xf32> to vector<4x32xf32>
    %202 = arith.negf %201 : vector<4x32xf32>
    %203 = math.exp %202 : vector<4x32xf32>
    %cst_60 = arith.constant 1.000000e+00 : f32
    %204 = vector.broadcast %cst_60 : f32 to vector<4x32xf32>
    %205 = arith.addf %204, %203 : vector<4x32xf32>
    %206 = arith.divf %204, %205 : vector<4x32xf32>
    %207 = vector.extract_strided_slice %200 {offsets = [0, 32], sizes = [4, 32], strides = [1, 1]} : vector<4x128xf32> to vector<4x32xf32>
    %208 = arith.negf %207 : vector<4x32xf32>
    %209 = math.exp %208 : vector<4x32xf32>
    %cst_61 = arith.constant 1.000000e+00 : f32
    %210 = vector.broadcast %cst_61 : f32 to vector<4x32xf32>
    %211 = arith.addf %210, %209 : vector<4x32xf32>
    %212 = arith.divf %210, %211 : vector<4x32xf32>
    %213 = vector.extract_strided_slice %200 {offsets = [0, 64], sizes = [4, 32], strides = [1, 1]} : vector<4x128xf32> to vector<4x32xf32>
    %214 = vector.extract_strided_slice %200 {offsets = [0, 96], sizes = [4, 32], strides = [1, 1]} : vector<4x128xf32> to vector<4x32xf32>
    %215 = arith.mulf %206, %214 : vector<4x32xf32>
    %216 = arith.addf %213, %215 : vector<4x32xf32>
    %217 = math.tanh %216 : vector<4x32xf32>
    %cst_62 = arith.constant 1.000000e+00 : f32
    %218 = vector.broadcast %cst_62 : f32 to vector<4x32xf32>
    %219 = arith.subf %218, %212 : vector<4x32xf32>
    %220 = arith.mulf %219, %217 : vector<4x32xf32>
    %221 = arith.mulf %212, %94 : vector<4x32xf32>
    %222 = arith.addf %220, %221 : vector<4x32xf32>
    %223 = vector.extract_strided_slice %137 {offsets = [0, 0], sizes = [2, 1], strides = [1, 1]} : vector<2x2xf32> to vector<2x1xf32>
    %224 = vector.extract_strided_slice %137 {offsets = [0, 1], sizes = [2, 1], strides = [1, 1]} : vector<2x2xf32> to vector<2x1xf32>
    %225 = tpu.concatenate %223, %224 in 0 : vector<2x1xf32>, vector<2x1xf32> -> vector<4x1xf32>
    %cst_63 = arith.constant 1.000000e+00 : f32
    %226 = vector.broadcast %cst_63 : f32 to vector<4x1xf32>
    %227 = arith.subf %226, %225 : vector<4x1xf32>
    %228 = vector.broadcast %227 : vector<4x1xf32> to vector<4x32xf32>
    %229 = arith.mulf %94, %228 : vector<4x32xf32>
    %230 = vector.broadcast %225 : vector<4x1xf32> to vector<4x32xf32>
    %231 = arith.mulf %222, %230 : vector<4x32xf32>
    %232 = arith.addf %229, %231 : vector<4x32xf32>
    %cst_64 = arith.constant 0.000000e+00 : f32
    %233 = vector.broadcast %cst_64 : f32 to vector<2x32xf32>
    %234 = vector.extract_strided_slice %137 {offsets = [0, 0], sizes = [2, 1], strides = [1, 1]} : vector<2x2xf32> to vector<2x1xf32>
    %235 = vector.extract_strided_slice %232 {offsets = [0, 0], sizes = [2, 32], strides = [1, 1]} : vector<4x32xf32> to vector<2x32xf32>
    %236 = vector.broadcast %234 : vector<2x1xf32> to vector<2x32xf32>
    %237 = arith.mulf %236, %235 : vector<2x32xf32>
    %238 = arith.addf %233, %237 : vector<2x32xf32>
    %239 = vector.extract_strided_slice %137 {offsets = [0, 1], sizes = [2, 1], strides = [1, 1]} : vector<2x2xf32> to vector<2x1xf32>
    %240 = vector.extract_strided_slice %232 {offsets = [2, 0], sizes = [2, 32], strides = [1, 1]} : vector<4x32xf32> to vector<2x32xf32>
    %241 = vector.broadcast %239 : vector<2x1xf32> to vector<2x32xf32>
    %242 = arith.mulf %241, %240 : vector<2x32xf32>
    %243 = arith.addf %238, %242 : vector<2x32xf32>
    %244 = tpu.concatenate %243, %132 in 1 : vector<2x32xf32>, vector<2x32xf32> -> vector<2x64xf32>
    %c0_65 = arith.constant 0 : index
    %c0_66 = arith.constant 0 : index
    %245 = vector.load %arg6[%c0_65, %c0_66] : memref<64x128xf32, #tpu.memory_space<vmem>>, vector<64x128xf32>
    %cst_67 = arith.constant dense<0.000000e+00> : vector<2x128xf32>
    %246 = tpu.matmul %244, %245, %cst_67 {dimension_numbers = #tpu.dot_dimension_numbers<[1], [0], [0], [1], [0, 0, 1, 1], [], []>} : vector<2x64xf32>, vector<64x128xf32>, vector<2x128xf32> -> vector<2x128xf32>
    %247 = vector.broadcast %2 : vector<1x128xf32> to vector<2x128xf32>
    %248 = arith.addf %246, %247 : vector<2x128xf32>
    %249 = vector.extract_strided_slice %248 {offsets = [0, 0], sizes = [2, 32], strides = [1, 1]} : vector<2x128xf32> to vector<2x32xf32>
    %250 = arith.negf %249 : vector<2x32xf32>
    %251 = math.exp %250 : vector<2x32xf32>
    %cst_68 = arith.constant 1.000000e+00 : f32
    %252 = vector.broadcast %cst_68 : f32 to vector<2x32xf32>
    %253 = arith.addf %252, %251 : vector<2x32xf32>
    %254 = arith.divf %252, %253 : vector<2x32xf32>
    %255 = vector.extract_strided_slice %248 {offsets = [0, 32], sizes = [2, 32], strides = [1, 1]} : vector<2x128xf32> to vector<2x32xf32>
    %256 = arith.negf %255 : vector<2x32xf32>
    %257 = math.exp %256 : vector<2x32xf32>
    %cst_69 = arith.constant 1.000000e+00 : f32
    %258 = vector.broadcast %cst_69 : f32 to vector<2x32xf32>
    %259 = arith.addf %258, %257 : vector<2x32xf32>
    %260 = arith.divf %258, %259 : vector<2x32xf32>
    %261 = vector.extract_strided_slice %248 {offsets = [0, 64], sizes = [2, 32], strides = [1, 1]} : vector<2x128xf32> to vector<2x32xf32>
    %262 = vector.extract_strided_slice %248 {offsets = [0, 96], sizes = [2, 32], strides = [1, 1]} : vector<2x128xf32> to vector<2x32xf32>
    %263 = arith.mulf %254, %262 : vector<2x32xf32>
    %264 = arith.addf %261, %263 : vector<2x32xf32>
    %265 = math.tanh %264 : vector<2x32xf32>
    %cst_70 = arith.constant 1.000000e+00 : f32
    %266 = vector.broadcast %cst_70 : f32 to vector<2x32xf32>
    %267 = arith.subf %266, %260 : vector<2x32xf32>
    %268 = arith.mulf %267, %265 : vector<2x32xf32>
    %269 = arith.mulf %260, %132 : vector<2x32xf32>
    %270 = arith.addf %268, %269 : vector<2x32xf32>
    %271 = tpu.concatenate %270, %189, %4 in 1 : vector<2x32xf32>, vector<2x8xf32>, vector<2x88xf32> -> vector<2x128xf32>
    %c2 = arith.constant 2 : index
    %c0_71 = arith.constant 0 : index
    %c0_72 = arith.constant 0 : index
    %272 = vector.load %arg0[%c2, %c0_71, %c0_72] : memref<8x2x32xf32, #tpu.memory_space<vmem>>, vector<1x2x32xf32>
    %273 = vector.shape_cast %272 : vector<1x2x32xf32> to vector<2x32xf32>
    %c2_73 = arith.constant 2 : index
    %c0_74 = arith.constant 0 : index
    %c0_75 = arith.constant 0 : index
    %274 = vector.load %arg1[%c2_73, %c0_74, %c0_75] : memref<8x2x2xf32, #tpu.memory_space<vmem>>, vector<1x2x2xf32>
    %275 = vector.shape_cast %274 : vector<1x2x2xf32> to vector<2x2xf32>
    %cst_76 = arith.constant 0.000000e+00 : f32
    %276 = vector.broadcast %cst_76 : f32 to vector<2x32xf32>
    %277 = vector.extract_strided_slice %275 {offsets = [0, 0], sizes = [2, 1], strides = [1, 1]} : vector<2x2xf32> to vector<2x1xf32>
    %278 = vector.extract_strided_slice %232 {offsets = [0, 0], sizes = [2, 32], strides = [1, 1]} : vector<4x32xf32> to vector<2x32xf32>
    %279 = vector.broadcast %277 : vector<2x1xf32> to vector<2x32xf32>
    %280 = arith.mulf %279, %278 : vector<2x32xf32>
    %281 = arith.addf %276, %280 : vector<2x32xf32>
    %282 = vector.extract_strided_slice %275 {offsets = [0, 1], sizes = [2, 1], strides = [1, 1]} : vector<2x2xf32> to vector<2x1xf32>
    %283 = vector.extract_strided_slice %232 {offsets = [2, 0], sizes = [2, 32], strides = [1, 1]} : vector<4x32xf32> to vector<2x32xf32>
    %284 = vector.broadcast %282 : vector<2x1xf32> to vector<2x32xf32>
    %285 = arith.mulf %284, %283 : vector<2x32xf32>
    %286 = arith.addf %281, %285 : vector<2x32xf32>
    %287 = tpu.concatenate %273, %286, %175 in 1 : vector<2x32xf32>, vector<2x32xf32>, vector<2x32xf32> -> vector<2x96xf32>
    %c0_77 = arith.constant 0 : index
    %c0_78 = arith.constant 0 : index
    %288 = vector.load %arg2[%c0_77, %c0_78] : memref<96x128xf32, #tpu.memory_space<vmem>>, vector<96x128xf32>
    %cst_79 = arith.constant dense<0.000000e+00> : vector<2x128xf32>
    %289 = tpu.matmul %287, %288, %cst_79 {dimension_numbers = #tpu.dot_dimension_numbers<[1], [0], [0], [1], [0, 0, 1, 1], [], []>} : vector<2x96xf32>, vector<96x128xf32>, vector<2x128xf32> -> vector<2x128xf32>
    %290 = vector.broadcast %0 : vector<1x128xf32> to vector<2x128xf32>
    %291 = arith.addf %289, %290 : vector<2x128xf32>
    %292 = vector.extract_strided_slice %291 {offsets = [0, 0], sizes = [2, 32], strides = [1, 1]} : vector<2x128xf32> to vector<2x32xf32>
    %293 = arith.negf %292 : vector<2x32xf32>
    %294 = math.exp %293 : vector<2x32xf32>
    %cst_80 = arith.constant 1.000000e+00 : f32
    %295 = vector.broadcast %cst_80 : f32 to vector<2x32xf32>
    %296 = arith.addf %295, %294 : vector<2x32xf32>
    %297 = arith.divf %295, %296 : vector<2x32xf32>
    %298 = vector.extract_strided_slice %291 {offsets = [0, 32], sizes = [2, 32], strides = [1, 1]} : vector<2x128xf32> to vector<2x32xf32>
    %299 = arith.negf %298 : vector<2x32xf32>
    %300 = math.exp %299 : vector<2x32xf32>
    %cst_81 = arith.constant 1.000000e+00 : f32
    %301 = vector.broadcast %cst_81 : f32 to vector<2x32xf32>
    %302 = arith.addf %301, %300 : vector<2x32xf32>
    %303 = arith.divf %301, %302 : vector<2x32xf32>
    %304 = vector.extract_strided_slice %291 {offsets = [0, 64], sizes = [2, 32], strides = [1, 1]} : vector<2x128xf32> to vector<2x32xf32>
    %305 = vector.extract_strided_slice %291 {offsets = [0, 96], sizes = [2, 32], strides = [1, 1]} : vector<2x128xf32> to vector<2x32xf32>
    %306 = arith.mulf %297, %305 : vector<2x32xf32>
    %307 = arith.addf %304, %306 : vector<2x32xf32>
    %308 = math.tanh %307 : vector<2x32xf32>
    %cst_82 = arith.constant 1.000000e+00 : f32
    %309 = vector.broadcast %cst_82 : f32 to vector<2x32xf32>
    %310 = arith.subf %309, %303 : vector<2x32xf32>
    %311 = arith.mulf %310, %308 : vector<2x32xf32>
    %312 = arith.mulf %303, %175 : vector<2x32xf32>
    %313 = arith.addf %311, %312 : vector<2x32xf32>
    %314 = tpu.concatenate %55, %193 in 1 : vector<2x1xf32>, vector<2x1xf32> -> vector<2x2xf32>
    %cst_83 = arith.constant dense<0xFF800000> : vector<2xf32>
    %315 = vector.multi_reduction <maximumf>, %314, %cst_83 [1] : vector<2x2xf32> to vector<2xf32>
    %316 = vector.shape_cast %315 : vector<2xf32> to vector<2x1xf32>
    %317 = vector.broadcast %316 : vector<2x1xf32> to vector<2x2xf32>
    %318 = arith.subf %314, %317 : vector<2x2xf32>
    %319 = math.exp %318 : vector<2x2xf32>
    %cst_84 = arith.constant dense<0.000000e+00> : vector<2xf32>
    %320 = vector.multi_reduction <add>, %319, %cst_84 [1] : vector<2x2xf32> to vector<2xf32>
    %321 = vector.shape_cast %320 : vector<2xf32> to vector<2x1xf32>
    %322 = tpu.reciprocal %321 : vector<2x1xf32> -> vector<2x1xf32>
    %323 = vector.broadcast %322 : vector<2x1xf32> to vector<2x2xf32>
    %324 = arith.mulf %319, %323 : vector<2x2xf32>
    %cst_85 = arith.constant 0.000000e+00 : f32
    %325 = vector.broadcast %cst_85 : f32 to vector<2x32xf32>
    %326 = vector.extract_strided_slice %324 {offsets = [0, 0], sizes = [2, 1], strides = [1, 1]} : vector<2x2xf32> to vector<2x1xf32>
    %327 = vector.broadcast %326 : vector<2x1xf32> to vector<2x32xf32>
    %328 = arith.mulf %327, %49 : vector<2x32xf32>
    %329 = arith.addf %325, %328 : vector<2x32xf32>
    %330 = vector.extract_strided_slice %324 {offsets = [0, 1], sizes = [2, 1], strides = [1, 1]} : vector<2x2xf32> to vector<2x1xf32>
    %331 = vector.broadcast %330 : vector<2x1xf32> to vector<2x32xf32>
    %332 = arith.mulf %331, %175 : vector<2x32xf32>
    %333 = arith.addf %329, %332 : vector<2x32xf32>
    %cst_86 = arith.constant 0.000000e+00 : f32
    %334 = vector.broadcast %cst_86 : f32 to vector<2x6xf32>
    %335 = tpu.concatenate %324, %334 in 1 : vector<2x2xf32>, vector<2x6xf32> -> vector<2x8xf32>
    %336 = vector.broadcast %3 : vector<1x32xf32> to vector<2x32xf32>
    %337 = arith.mulf %313, %336 : vector<2x32xf32>
    %cst_87 = arith.constant dense<0.000000e+00> : vector<2xf32>
    %338 = vector.multi_reduction <add>, %337, %cst_87 [1] : vector<2x32xf32> to vector<2xf32>
    %339 = vector.shape_cast %338 : vector<2xf32> to vector<2x1xf32>
    %340 = tpu.concatenate %273, %333 in 1 : vector<2x32xf32>, vector<2x32xf32> -> vector<2x64xf32>
    %341 = tpu.concatenate %340, %340 in 0 : vector<2x64xf32>, vector<2x64xf32> -> vector<4x64xf32>
    %342 = tpu.concatenate %341, %232 in 1 : vector<4x64xf32>, vector<4x32xf32> -> vector<4x96xf32>
    %c0_88 = arith.constant 0 : index
    %c0_89 = arith.constant 0 : index
    %343 = vector.load %arg4[%c0_88, %c0_89] : memref<96x128xf32, #tpu.memory_space<vmem>>, vector<96x128xf32>
    %cst_90 = arith.constant dense<0.000000e+00> : vector<4x128xf32>
    %344 = tpu.matmul %342, %343, %cst_90 {dimension_numbers = #tpu.dot_dimension_numbers<[1], [0], [0], [1], [0, 0, 1, 1], [], []>} : vector<4x96xf32>, vector<96x128xf32>, vector<4x128xf32> -> vector<4x128xf32>
    %345 = vector.broadcast %1 : vector<1x128xf32> to vector<4x128xf32>
    %346 = arith.addf %344, %345 : vector<4x128xf32>
    %347 = vector.extract_strided_slice %346 {offsets = [0, 0], sizes = [4, 32], strides = [1, 1]} : vector<4x128xf32> to vector<4x32xf32>
    %348 = arith.negf %347 : vector<4x32xf32>
    %349 = math.exp %348 : vector<4x32xf32>
    %cst_91 = arith.constant 1.000000e+00 : f32
    %350 = vector.broadcast %cst_91 : f32 to vector<4x32xf32>
    %351 = arith.addf %350, %349 : vector<4x32xf32>
    %352 = arith.divf %350, %351 : vector<4x32xf32>
    %353 = vector.extract_strided_slice %346 {offsets = [0, 32], sizes = [4, 32], strides = [1, 1]} : vector<4x128xf32> to vector<4x32xf32>
    %354 = arith.negf %353 : vector<4x32xf32>
    %355 = math.exp %354 : vector<4x32xf32>
    %cst_92 = arith.constant 1.000000e+00 : f32
    %356 = vector.broadcast %cst_92 : f32 to vector<4x32xf32>
    %357 = arith.addf %356, %355 : vector<4x32xf32>
    %358 = arith.divf %356, %357 : vector<4x32xf32>
    %359 = vector.extract_strided_slice %346 {offsets = [0, 64], sizes = [4, 32], strides = [1, 1]} : vector<4x128xf32> to vector<4x32xf32>
    %360 = vector.extract_strided_slice %346 {offsets = [0, 96], sizes = [4, 32], strides = [1, 1]} : vector<4x128xf32> to vector<4x32xf32>
    %361 = arith.mulf %352, %360 : vector<4x32xf32>
    %362 = arith.addf %359, %361 : vector<4x32xf32>
    %363 = math.tanh %362 : vector<4x32xf32>
    %cst_93 = arith.constant 1.000000e+00 : f32
    %364 = vector.broadcast %cst_93 : f32 to vector<4x32xf32>
    %365 = arith.subf %364, %358 : vector<4x32xf32>
    %366 = arith.mulf %365, %363 : vector<4x32xf32>
    %367 = arith.mulf %358, %232 : vector<4x32xf32>
    %368 = arith.addf %366, %367 : vector<4x32xf32>
    %369 = vector.extract_strided_slice %275 {offsets = [0, 0], sizes = [2, 1], strides = [1, 1]} : vector<2x2xf32> to vector<2x1xf32>
    %370 = vector.extract_strided_slice %275 {offsets = [0, 1], sizes = [2, 1], strides = [1, 1]} : vector<2x2xf32> to vector<2x1xf32>
    %371 = tpu.concatenate %369, %370 in 0 : vector<2x1xf32>, vector<2x1xf32> -> vector<4x1xf32>
    %cst_94 = arith.constant 1.000000e+00 : f32
    %372 = vector.broadcast %cst_94 : f32 to vector<4x1xf32>
    %373 = arith.subf %372, %371 : vector<4x1xf32>
    %374 = vector.broadcast %373 : vector<4x1xf32> to vector<4x32xf32>
    %375 = arith.mulf %232, %374 : vector<4x32xf32>
    %376 = vector.broadcast %371 : vector<4x1xf32> to vector<4x32xf32>
    %377 = arith.mulf %368, %376 : vector<4x32xf32>
    %378 = arith.addf %375, %377 : vector<4x32xf32>
    %cst_95 = arith.constant 0.000000e+00 : f32
    %379 = vector.broadcast %cst_95 : f32 to vector<2x32xf32>
    %380 = vector.extract_strided_slice %275 {offsets = [0, 0], sizes = [2, 1], strides = [1, 1]} : vector<2x2xf32> to vector<2x1xf32>
    %381 = vector.extract_strided_slice %378 {offsets = [0, 0], sizes = [2, 32], strides = [1, 1]} : vector<4x32xf32> to vector<2x32xf32>
    %382 = vector.broadcast %380 : vector<2x1xf32> to vector<2x32xf32>
    %383 = arith.mulf %382, %381 : vector<2x32xf32>
    %384 = arith.addf %379, %383 : vector<2x32xf32>
    %385 = vector.extract_strided_slice %275 {offsets = [0, 1], sizes = [2, 1], strides = [1, 1]} : vector<2x2xf32> to vector<2x1xf32>
    %386 = vector.extract_strided_slice %378 {offsets = [2, 0], sizes = [2, 32], strides = [1, 1]} : vector<4x32xf32> to vector<2x32xf32>
    %387 = vector.broadcast %385 : vector<2x1xf32> to vector<2x32xf32>
    %388 = arith.mulf %387, %386 : vector<2x32xf32>
    %389 = arith.addf %384, %388 : vector<2x32xf32>
    %390 = tpu.concatenate %389, %270 in 1 : vector<2x32xf32>, vector<2x32xf32> -> vector<2x64xf32>
    %c0_96 = arith.constant 0 : index
    %c0_97 = arith.constant 0 : index
    %391 = vector.load %arg6[%c0_96, %c0_97] : memref<64x128xf32, #tpu.memory_space<vmem>>, vector<64x128xf32>
    %cst_98 = arith.constant dense<0.000000e+00> : vector<2x128xf32>
    %392 = tpu.matmul %390, %391, %cst_98 {dimension_numbers = #tpu.dot_dimension_numbers<[1], [0], [0], [1], [0, 0, 1, 1], [], []>} : vector<2x64xf32>, vector<64x128xf32>, vector<2x128xf32> -> vector<2x128xf32>
    %393 = vector.broadcast %2 : vector<1x128xf32> to vector<2x128xf32>
    %394 = arith.addf %392, %393 : vector<2x128xf32>
    %395 = vector.extract_strided_slice %394 {offsets = [0, 0], sizes = [2, 32], strides = [1, 1]} : vector<2x128xf32> to vector<2x32xf32>
    %396 = arith.negf %395 : vector<2x32xf32>
    %397 = math.exp %396 : vector<2x32xf32>
    %cst_99 = arith.constant 1.000000e+00 : f32
    %398 = vector.broadcast %cst_99 : f32 to vector<2x32xf32>
    %399 = arith.addf %398, %397 : vector<2x32xf32>
    %400 = arith.divf %398, %399 : vector<2x32xf32>
    %401 = vector.extract_strided_slice %394 {offsets = [0, 32], sizes = [2, 32], strides = [1, 1]} : vector<2x128xf32> to vector<2x32xf32>
    %402 = arith.negf %401 : vector<2x32xf32>
    %403 = math.exp %402 : vector<2x32xf32>
    %cst_100 = arith.constant 1.000000e+00 : f32
    %404 = vector.broadcast %cst_100 : f32 to vector<2x32xf32>
    %405 = arith.addf %404, %403 : vector<2x32xf32>
    %406 = arith.divf %404, %405 : vector<2x32xf32>
    %407 = vector.extract_strided_slice %394 {offsets = [0, 64], sizes = [2, 32], strides = [1, 1]} : vector<2x128xf32> to vector<2x32xf32>
    %408 = vector.extract_strided_slice %394 {offsets = [0, 96], sizes = [2, 32], strides = [1, 1]} : vector<2x128xf32> to vector<2x32xf32>
    %409 = arith.mulf %400, %408 : vector<2x32xf32>
    %410 = arith.addf %407, %409 : vector<2x32xf32>
    %411 = math.tanh %410 : vector<2x32xf32>
    %cst_101 = arith.constant 1.000000e+00 : f32
    %412 = vector.broadcast %cst_101 : f32 to vector<2x32xf32>
    %413 = arith.subf %412, %406 : vector<2x32xf32>
    %414 = arith.mulf %413, %411 : vector<2x32xf32>
    %415 = arith.mulf %406, %270 : vector<2x32xf32>
    %416 = arith.addf %414, %415 : vector<2x32xf32>
    %417 = tpu.concatenate %416, %335, %4 in 1 : vector<2x32xf32>, vector<2x8xf32>, vector<2x88xf32> -> vector<2x128xf32>
    %c3 = arith.constant 3 : index
    %c0_102 = arith.constant 0 : index
    %c0_103 = arith.constant 0 : index
    %418 = vector.load %arg0[%c3, %c0_102, %c0_103] : memref<8x2x32xf32, #tpu.memory_space<vmem>>, vector<1x2x32xf32>
    %419 = vector.shape_cast %418 : vector<1x2x32xf32> to vector<2x32xf32>
    %c3_104 = arith.constant 3 : index
    %c0_105 = arith.constant 0 : index
    %c0_106 = arith.constant 0 : index
    %420 = vector.load %arg1[%c3_104, %c0_105, %c0_106] : memref<8x2x2xf32, #tpu.memory_space<vmem>>, vector<1x2x2xf32>
    %421 = vector.shape_cast %420 : vector<1x2x2xf32> to vector<2x2xf32>
    %cst_107 = arith.constant 0.000000e+00 : f32
    %422 = vector.broadcast %cst_107 : f32 to vector<2x32xf32>
    %423 = vector.extract_strided_slice %421 {offsets = [0, 0], sizes = [2, 1], strides = [1, 1]} : vector<2x2xf32> to vector<2x1xf32>
    %424 = vector.extract_strided_slice %378 {offsets = [0, 0], sizes = [2, 32], strides = [1, 1]} : vector<4x32xf32> to vector<2x32xf32>
    %425 = vector.broadcast %423 : vector<2x1xf32> to vector<2x32xf32>
    %426 = arith.mulf %425, %424 : vector<2x32xf32>
    %427 = arith.addf %422, %426 : vector<2x32xf32>
    %428 = vector.extract_strided_slice %421 {offsets = [0, 1], sizes = [2, 1], strides = [1, 1]} : vector<2x2xf32> to vector<2x1xf32>
    %429 = vector.extract_strided_slice %378 {offsets = [2, 0], sizes = [2, 32], strides = [1, 1]} : vector<4x32xf32> to vector<2x32xf32>
    %430 = vector.broadcast %428 : vector<2x1xf32> to vector<2x32xf32>
    %431 = arith.mulf %430, %429 : vector<2x32xf32>
    %432 = arith.addf %427, %431 : vector<2x32xf32>
    %433 = tpu.concatenate %419, %432, %313 in 1 : vector<2x32xf32>, vector<2x32xf32>, vector<2x32xf32> -> vector<2x96xf32>
    %c0_108 = arith.constant 0 : index
    %c0_109 = arith.constant 0 : index
    %434 = vector.load %arg2[%c0_108, %c0_109] : memref<96x128xf32, #tpu.memory_space<vmem>>, vector<96x128xf32>
    %cst_110 = arith.constant dense<0.000000e+00> : vector<2x128xf32>
    %435 = tpu.matmul %433, %434, %cst_110 {dimension_numbers = #tpu.dot_dimension_numbers<[1], [0], [0], [1], [0, 0, 1, 1], [], []>} : vector<2x96xf32>, vector<96x128xf32>, vector<2x128xf32> -> vector<2x128xf32>
    %436 = vector.broadcast %0 : vector<1x128xf32> to vector<2x128xf32>
    %437 = arith.addf %435, %436 : vector<2x128xf32>
    %438 = vector.extract_strided_slice %437 {offsets = [0, 0], sizes = [2, 32], strides = [1, 1]} : vector<2x128xf32> to vector<2x32xf32>
    %439 = arith.negf %438 : vector<2x32xf32>
    %440 = math.exp %439 : vector<2x32xf32>
    %cst_111 = arith.constant 1.000000e+00 : f32
    %441 = vector.broadcast %cst_111 : f32 to vector<2x32xf32>
    %442 = arith.addf %441, %440 : vector<2x32xf32>
    %443 = arith.divf %441, %442 : vector<2x32xf32>
    %444 = vector.extract_strided_slice %437 {offsets = [0, 32], sizes = [2, 32], strides = [1, 1]} : vector<2x128xf32> to vector<2x32xf32>
    %445 = arith.negf %444 : vector<2x32xf32>
    %446 = math.exp %445 : vector<2x32xf32>
    %cst_112 = arith.constant 1.000000e+00 : f32
    %447 = vector.broadcast %cst_112 : f32 to vector<2x32xf32>
    %448 = arith.addf %447, %446 : vector<2x32xf32>
    %449 = arith.divf %447, %448 : vector<2x32xf32>
    %450 = vector.extract_strided_slice %437 {offsets = [0, 64], sizes = [2, 32], strides = [1, 1]} : vector<2x128xf32> to vector<2x32xf32>
    %451 = vector.extract_strided_slice %437 {offsets = [0, 96], sizes = [2, 32], strides = [1, 1]} : vector<2x128xf32> to vector<2x32xf32>
    %452 = arith.mulf %443, %451 : vector<2x32xf32>
    %453 = arith.addf %450, %452 : vector<2x32xf32>
    %454 = math.tanh %453 : vector<2x32xf32>
    %cst_113 = arith.constant 1.000000e+00 : f32
    %455 = vector.broadcast %cst_113 : f32 to vector<2x32xf32>
    %456 = arith.subf %455, %449 : vector<2x32xf32>
    %457 = arith.mulf %456, %454 : vector<2x32xf32>
    %458 = arith.mulf %449, %313 : vector<2x32xf32>
    %459 = arith.addf %457, %458 : vector<2x32xf32>
    %460 = tpu.concatenate %55, %193, %339 in 1 : vector<2x1xf32>, vector<2x1xf32>, vector<2x1xf32> -> vector<2x3xf32>
    %cst_114 = arith.constant dense<0xFF800000> : vector<2xf32>
    %461 = vector.multi_reduction <maximumf>, %460, %cst_114 [1] : vector<2x3xf32> to vector<2xf32>
    %462 = vector.shape_cast %461 : vector<2xf32> to vector<2x1xf32>
    %463 = vector.broadcast %462 : vector<2x1xf32> to vector<2x3xf32>
    %464 = arith.subf %460, %463 : vector<2x3xf32>
    %465 = math.exp %464 : vector<2x3xf32>
    %cst_115 = arith.constant dense<0.000000e+00> : vector<2xf32>
    %466 = vector.multi_reduction <add>, %465, %cst_115 [1] : vector<2x3xf32> to vector<2xf32>
    %467 = vector.shape_cast %466 : vector<2xf32> to vector<2x1xf32>
    %468 = tpu.reciprocal %467 : vector<2x1xf32> -> vector<2x1xf32>
    %469 = vector.broadcast %468 : vector<2x1xf32> to vector<2x3xf32>
    %470 = arith.mulf %465, %469 : vector<2x3xf32>
    %cst_116 = arith.constant 0.000000e+00 : f32
    %471 = vector.broadcast %cst_116 : f32 to vector<2x32xf32>
    %472 = vector.extract_strided_slice %470 {offsets = [0, 0], sizes = [2, 1], strides = [1, 1]} : vector<2x3xf32> to vector<2x1xf32>
    %473 = vector.broadcast %472 : vector<2x1xf32> to vector<2x32xf32>
    %474 = arith.mulf %473, %49 : vector<2x32xf32>
    %475 = arith.addf %471, %474 : vector<2x32xf32>
    %476 = vector.extract_strided_slice %470 {offsets = [0, 1], sizes = [2, 1], strides = [1, 1]} : vector<2x3xf32> to vector<2x1xf32>
    %477 = vector.broadcast %476 : vector<2x1xf32> to vector<2x32xf32>
    %478 = arith.mulf %477, %175 : vector<2x32xf32>
    %479 = arith.addf %475, %478 : vector<2x32xf32>
    %480 = vector.extract_strided_slice %470 {offsets = [0, 2], sizes = [2, 1], strides = [1, 1]} : vector<2x3xf32> to vector<2x1xf32>
    %481 = vector.broadcast %480 : vector<2x1xf32> to vector<2x32xf32>
    %482 = arith.mulf %481, %313 : vector<2x32xf32>
    %483 = arith.addf %479, %482 : vector<2x32xf32>
    %cst_117 = arith.constant 0.000000e+00 : f32
    %484 = vector.broadcast %cst_117 : f32 to vector<2x5xf32>
    %485 = tpu.concatenate %470, %484 in 1 : vector<2x3xf32>, vector<2x5xf32> -> vector<2x8xf32>
    %486 = vector.broadcast %3 : vector<1x32xf32> to vector<2x32xf32>
    %487 = arith.mulf %459, %486 : vector<2x32xf32>
    %cst_118 = arith.constant dense<0.000000e+00> : vector<2xf32>
    %488 = vector.multi_reduction <add>, %487, %cst_118 [1] : vector<2x32xf32> to vector<2xf32>
    %489 = vector.shape_cast %488 : vector<2xf32> to vector<2x1xf32>
    %490 = tpu.concatenate %419, %483 in 1 : vector<2x32xf32>, vector<2x32xf32> -> vector<2x64xf32>
    %491 = tpu.concatenate %490, %490 in 0 : vector<2x64xf32>, vector<2x64xf32> -> vector<4x64xf32>
    %492 = tpu.concatenate %491, %378 in 1 : vector<4x64xf32>, vector<4x32xf32> -> vector<4x96xf32>
    %c0_119 = arith.constant 0 : index
    %c0_120 = arith.constant 0 : index
    %493 = vector.load %arg4[%c0_119, %c0_120] : memref<96x128xf32, #tpu.memory_space<vmem>>, vector<96x128xf32>
    %cst_121 = arith.constant dense<0.000000e+00> : vector<4x128xf32>
    %494 = tpu.matmul %492, %493, %cst_121 {dimension_numbers = #tpu.dot_dimension_numbers<[1], [0], [0], [1], [0, 0, 1, 1], [], []>} : vector<4x96xf32>, vector<96x128xf32>, vector<4x128xf32> -> vector<4x128xf32>
    %495 = vector.broadcast %1 : vector<1x128xf32> to vector<4x128xf32>
    %496 = arith.addf %494, %495 : vector<4x128xf32>
    %497 = vector.extract_strided_slice %496 {offsets = [0, 0], sizes = [4, 32], strides = [1, 1]} : vector<4x128xf32> to vector<4x32xf32>
    %498 = arith.negf %497 : vector<4x32xf32>
    %499 = math.exp %498 : vector<4x32xf32>
    %cst_122 = arith.constant 1.000000e+00 : f32
    %500 = vector.broadcast %cst_122 : f32 to vector<4x32xf32>
    %501 = arith.addf %500, %499 : vector<4x32xf32>
    %502 = arith.divf %500, %501 : vector<4x32xf32>
    %503 = vector.extract_strided_slice %496 {offsets = [0, 32], sizes = [4, 32], strides = [1, 1]} : vector<4x128xf32> to vector<4x32xf32>
    %504 = arith.negf %503 : vector<4x32xf32>
    %505 = math.exp %504 : vector<4x32xf32>
    %cst_123 = arith.constant 1.000000e+00 : f32
    %506 = vector.broadcast %cst_123 : f32 to vector<4x32xf32>
    %507 = arith.addf %506, %505 : vector<4x32xf32>
    %508 = arith.divf %506, %507 : vector<4x32xf32>
    %509 = vector.extract_strided_slice %496 {offsets = [0, 64], sizes = [4, 32], strides = [1, 1]} : vector<4x128xf32> to vector<4x32xf32>
    %510 = vector.extract_strided_slice %496 {offsets = [0, 96], sizes = [4, 32], strides = [1, 1]} : vector<4x128xf32> to vector<4x32xf32>
    %511 = arith.mulf %502, %510 : vector<4x32xf32>
    %512 = arith.addf %509, %511 : vector<4x32xf32>
    %513 = math.tanh %512 : vector<4x32xf32>
    %cst_124 = arith.constant 1.000000e+00 : f32
    %514 = vector.broadcast %cst_124 : f32 to vector<4x32xf32>
    %515 = arith.subf %514, %508 : vector<4x32xf32>
    %516 = arith.mulf %515, %513 : vector<4x32xf32>
    %517 = arith.mulf %508, %378 : vector<4x32xf32>
    %518 = arith.addf %516, %517 : vector<4x32xf32>
    %519 = vector.extract_strided_slice %421 {offsets = [0, 0], sizes = [2, 1], strides = [1, 1]} : vector<2x2xf32> to vector<2x1xf32>
    %520 = vector.extract_strided_slice %421 {offsets = [0, 1], sizes = [2, 1], strides = [1, 1]} : vector<2x2xf32> to vector<2x1xf32>
    %521 = tpu.concatenate %519, %520 in 0 : vector<2x1xf32>, vector<2x1xf32> -> vector<4x1xf32>
    %cst_125 = arith.constant 1.000000e+00 : f32
    %522 = vector.broadcast %cst_125 : f32 to vector<4x1xf32>
    %523 = arith.subf %522, %521 : vector<4x1xf32>
    %524 = vector.broadcast %523 : vector<4x1xf32> to vector<4x32xf32>
    %525 = arith.mulf %378, %524 : vector<4x32xf32>
    %526 = vector.broadcast %521 : vector<4x1xf32> to vector<4x32xf32>
    %527 = arith.mulf %518, %526 : vector<4x32xf32>
    %528 = arith.addf %525, %527 : vector<4x32xf32>
    %cst_126 = arith.constant 0.000000e+00 : f32
    %529 = vector.broadcast %cst_126 : f32 to vector<2x32xf32>
    %530 = vector.extract_strided_slice %421 {offsets = [0, 0], sizes = [2, 1], strides = [1, 1]} : vector<2x2xf32> to vector<2x1xf32>
    %531 = vector.extract_strided_slice %528 {offsets = [0, 0], sizes = [2, 32], strides = [1, 1]} : vector<4x32xf32> to vector<2x32xf32>
    %532 = vector.broadcast %530 : vector<2x1xf32> to vector<2x32xf32>
    %533 = arith.mulf %532, %531 : vector<2x32xf32>
    %534 = arith.addf %529, %533 : vector<2x32xf32>
    %535 = vector.extract_strided_slice %421 {offsets = [0, 1], sizes = [2, 1], strides = [1, 1]} : vector<2x2xf32> to vector<2x1xf32>
    %536 = vector.extract_strided_slice %528 {offsets = [2, 0], sizes = [2, 32], strides = [1, 1]} : vector<4x32xf32> to vector<2x32xf32>
    %537 = vector.broadcast %535 : vector<2x1xf32> to vector<2x32xf32>
    %538 = arith.mulf %537, %536 : vector<2x32xf32>
    %539 = arith.addf %534, %538 : vector<2x32xf32>
    %540 = tpu.concatenate %539, %416 in 1 : vector<2x32xf32>, vector<2x32xf32> -> vector<2x64xf32>
    %c0_127 = arith.constant 0 : index
    %c0_128 = arith.constant 0 : index
    %541 = vector.load %arg6[%c0_127, %c0_128] : memref<64x128xf32, #tpu.memory_space<vmem>>, vector<64x128xf32>
    %cst_129 = arith.constant dense<0.000000e+00> : vector<2x128xf32>
    %542 = tpu.matmul %540, %541, %cst_129 {dimension_numbers = #tpu.dot_dimension_numbers<[1], [0], [0], [1], [0, 0, 1, 1], [], []>} : vector<2x64xf32>, vector<64x128xf32>, vector<2x128xf32> -> vector<2x128xf32>
    %543 = vector.broadcast %2 : vector<1x128xf32> to vector<2x128xf32>
    %544 = arith.addf %542, %543 : vector<2x128xf32>
    %545 = vector.extract_strided_slice %544 {offsets = [0, 0], sizes = [2, 32], strides = [1, 1]} : vector<2x128xf32> to vector<2x32xf32>
    %546 = arith.negf %545 : vector<2x32xf32>
    %547 = math.exp %546 : vector<2x32xf32>
    %cst_130 = arith.constant 1.000000e+00 : f32
    %548 = vector.broadcast %cst_130 : f32 to vector<2x32xf32>
    %549 = arith.addf %548, %547 : vector<2x32xf32>
    %550 = arith.divf %548, %549 : vector<2x32xf32>
    %551 = vector.extract_strided_slice %544 {offsets = [0, 32], sizes = [2, 32], strides = [1, 1]} : vector<2x128xf32> to vector<2x32xf32>
    %552 = arith.negf %551 : vector<2x32xf32>
    %553 = math.exp %552 : vector<2x32xf32>
    %cst_131 = arith.constant 1.000000e+00 : f32
    %554 = vector.broadcast %cst_131 : f32 to vector<2x32xf32>
    %555 = arith.addf %554, %553 : vector<2x32xf32>
    %556 = arith.divf %554, %555 : vector<2x32xf32>
    %557 = vector.extract_strided_slice %544 {offsets = [0, 64], sizes = [2, 32], strides = [1, 1]} : vector<2x128xf32> to vector<2x32xf32>
    %558 = vector.extract_strided_slice %544 {offsets = [0, 96], sizes = [2, 32], strides = [1, 1]} : vector<2x128xf32> to vector<2x32xf32>
    %559 = arith.mulf %550, %558 : vector<2x32xf32>
    %560 = arith.addf %557, %559 : vector<2x32xf32>
    %561 = math.tanh %560 : vector<2x32xf32>
    %cst_132 = arith.constant 1.000000e+00 : f32
    %562 = vector.broadcast %cst_132 : f32 to vector<2x32xf32>
    %563 = arith.subf %562, %556 : vector<2x32xf32>
    %564 = arith.mulf %563, %561 : vector<2x32xf32>
    %565 = arith.mulf %556, %416 : vector<2x32xf32>
    %566 = arith.addf %564, %565 : vector<2x32xf32>
    %567 = tpu.concatenate %566, %485, %4 in 1 : vector<2x32xf32>, vector<2x8xf32>, vector<2x88xf32> -> vector<2x128xf32>
    %c4 = arith.constant 4 : index
    %c0_133 = arith.constant 0 : index
    %c0_134 = arith.constant 0 : index
    %568 = vector.load %arg0[%c4, %c0_133, %c0_134] : memref<8x2x32xf32, #tpu.memory_space<vmem>>, vector<1x2x32xf32>
    %569 = vector.shape_cast %568 : vector<1x2x32xf32> to vector<2x32xf32>
    %c4_135 = arith.constant 4 : index
    %c0_136 = arith.constant 0 : index
    %c0_137 = arith.constant 0 : index
    %570 = vector.load %arg1[%c4_135, %c0_136, %c0_137] : memref<8x2x2xf32, #tpu.memory_space<vmem>>, vector<1x2x2xf32>
    %571 = vector.shape_cast %570 : vector<1x2x2xf32> to vector<2x2xf32>
    %cst_138 = arith.constant 0.000000e+00 : f32
    %572 = vector.broadcast %cst_138 : f32 to vector<2x32xf32>
    %573 = vector.extract_strided_slice %571 {offsets = [0, 0], sizes = [2, 1], strides = [1, 1]} : vector<2x2xf32> to vector<2x1xf32>
    %574 = vector.extract_strided_slice %528 {offsets = [0, 0], sizes = [2, 32], strides = [1, 1]} : vector<4x32xf32> to vector<2x32xf32>
    %575 = vector.broadcast %573 : vector<2x1xf32> to vector<2x32xf32>
    %576 = arith.mulf %575, %574 : vector<2x32xf32>
    %577 = arith.addf %572, %576 : vector<2x32xf32>
    %578 = vector.extract_strided_slice %571 {offsets = [0, 1], sizes = [2, 1], strides = [1, 1]} : vector<2x2xf32> to vector<2x1xf32>
    %579 = vector.extract_strided_slice %528 {offsets = [2, 0], sizes = [2, 32], strides = [1, 1]} : vector<4x32xf32> to vector<2x32xf32>
    %580 = vector.broadcast %578 : vector<2x1xf32> to vector<2x32xf32>
    %581 = arith.mulf %580, %579 : vector<2x32xf32>
    %582 = arith.addf %577, %581 : vector<2x32xf32>
    %583 = tpu.concatenate %569, %582, %459 in 1 : vector<2x32xf32>, vector<2x32xf32>, vector<2x32xf32> -> vector<2x96xf32>
    %c0_139 = arith.constant 0 : index
    %c0_140 = arith.constant 0 : index
    %584 = vector.load %arg2[%c0_139, %c0_140] : memref<96x128xf32, #tpu.memory_space<vmem>>, vector<96x128xf32>
    %cst_141 = arith.constant dense<0.000000e+00> : vector<2x128xf32>
    %585 = tpu.matmul %583, %584, %cst_141 {dimension_numbers = #tpu.dot_dimension_numbers<[1], [0], [0], [1], [0, 0, 1, 1], [], []>} : vector<2x96xf32>, vector<96x128xf32>, vector<2x128xf32> -> vector<2x128xf32>
    %586 = vector.broadcast %0 : vector<1x128xf32> to vector<2x128xf32>
    %587 = arith.addf %585, %586 : vector<2x128xf32>
    %588 = vector.extract_strided_slice %587 {offsets = [0, 0], sizes = [2, 32], strides = [1, 1]} : vector<2x128xf32> to vector<2x32xf32>
    %589 = arith.negf %588 : vector<2x32xf32>
    %590 = math.exp %589 : vector<2x32xf32>
    %cst_142 = arith.constant 1.000000e+00 : f32
    %591 = vector.broadcast %cst_142 : f32 to vector<2x32xf32>
    %592 = arith.addf %591, %590 : vector<2x32xf32>
    %593 = arith.divf %591, %592 : vector<2x32xf32>
    %594 = vector.extract_strided_slice %587 {offsets = [0, 32], sizes = [2, 32], strides = [1, 1]} : vector<2x128xf32> to vector<2x32xf32>
    %595 = arith.negf %594 : vector<2x32xf32>
    %596 = math.exp %595 : vector<2x32xf32>
    %cst_143 = arith.constant 1.000000e+00 : f32
    %597 = vector.broadcast %cst_143 : f32 to vector<2x32xf32>
    %598 = arith.addf %597, %596 : vector<2x32xf32>
    %599 = arith.divf %597, %598 : vector<2x32xf32>
    %600 = vector.extract_strided_slice %587 {offsets = [0, 64], sizes = [2, 32], strides = [1, 1]} : vector<2x128xf32> to vector<2x32xf32>
    %601 = vector.extract_strided_slice %587 {offsets = [0, 96], sizes = [2, 32], strides = [1, 1]} : vector<2x128xf32> to vector<2x32xf32>
    %602 = arith.mulf %593, %601 : vector<2x32xf32>
    %603 = arith.addf %600, %602 : vector<2x32xf32>
    %604 = math.tanh %603 : vector<2x32xf32>
    %cst_144 = arith.constant 1.000000e+00 : f32
    %605 = vector.broadcast %cst_144 : f32 to vector<2x32xf32>
    %606 = arith.subf %605, %599 : vector<2x32xf32>
    %607 = arith.mulf %606, %604 : vector<2x32xf32>
    %608 = arith.mulf %599, %459 : vector<2x32xf32>
    %609 = arith.addf %607, %608 : vector<2x32xf32>
    %610 = tpu.concatenate %55, %193, %339, %489 in 1 : vector<2x1xf32>, vector<2x1xf32>, vector<2x1xf32>, vector<2x1xf32> -> vector<2x4xf32>
    %cst_145 = arith.constant dense<0xFF800000> : vector<2xf32>
    %611 = vector.multi_reduction <maximumf>, %610, %cst_145 [1] : vector<2x4xf32> to vector<2xf32>
    %612 = vector.shape_cast %611 : vector<2xf32> to vector<2x1xf32>
    %613 = vector.broadcast %612 : vector<2x1xf32> to vector<2x4xf32>
    %614 = arith.subf %610, %613 : vector<2x4xf32>
    %615 = math.exp %614 : vector<2x4xf32>
    %cst_146 = arith.constant dense<0.000000e+00> : vector<2xf32>
    %616 = vector.multi_reduction <add>, %615, %cst_146 [1] : vector<2x4xf32> to vector<2xf32>
    %617 = vector.shape_cast %616 : vector<2xf32> to vector<2x1xf32>
    %618 = tpu.reciprocal %617 : vector<2x1xf32> -> vector<2x1xf32>
    %619 = vector.broadcast %618 : vector<2x1xf32> to vector<2x4xf32>
    %620 = arith.mulf %615, %619 : vector<2x4xf32>
    %cst_147 = arith.constant 0.000000e+00 : f32
    %621 = vector.broadcast %cst_147 : f32 to vector<2x32xf32>
    %622 = vector.extract_strided_slice %620 {offsets = [0, 0], sizes = [2, 1], strides = [1, 1]} : vector<2x4xf32> to vector<2x1xf32>
    %623 = vector.broadcast %622 : vector<2x1xf32> to vector<2x32xf32>
    %624 = arith.mulf %623, %49 : vector<2x32xf32>
    %625 = arith.addf %621, %624 : vector<2x32xf32>
    %626 = vector.extract_strided_slice %620 {offsets = [0, 1], sizes = [2, 1], strides = [1, 1]} : vector<2x4xf32> to vector<2x1xf32>
    %627 = vector.broadcast %626 : vector<2x1xf32> to vector<2x32xf32>
    %628 = arith.mulf %627, %175 : vector<2x32xf32>
    %629 = arith.addf %625, %628 : vector<2x32xf32>
    %630 = vector.extract_strided_slice %620 {offsets = [0, 2], sizes = [2, 1], strides = [1, 1]} : vector<2x4xf32> to vector<2x1xf32>
    %631 = vector.broadcast %630 : vector<2x1xf32> to vector<2x32xf32>
    %632 = arith.mulf %631, %313 : vector<2x32xf32>
    %633 = arith.addf %629, %632 : vector<2x32xf32>
    %634 = vector.extract_strided_slice %620 {offsets = [0, 3], sizes = [2, 1], strides = [1, 1]} : vector<2x4xf32> to vector<2x1xf32>
    %635 = vector.broadcast %634 : vector<2x1xf32> to vector<2x32xf32>
    %636 = arith.mulf %635, %459 : vector<2x32xf32>
    %637 = arith.addf %633, %636 : vector<2x32xf32>
    %cst_148 = arith.constant 0.000000e+00 : f32
    %638 = vector.broadcast %cst_148 : f32 to vector<2x4xf32>
    %639 = tpu.concatenate %620, %638 in 1 : vector<2x4xf32>, vector<2x4xf32> -> vector<2x8xf32>
    %640 = vector.broadcast %3 : vector<1x32xf32> to vector<2x32xf32>
    %641 = arith.mulf %609, %640 : vector<2x32xf32>
    %cst_149 = arith.constant dense<0.000000e+00> : vector<2xf32>
    %642 = vector.multi_reduction <add>, %641, %cst_149 [1] : vector<2x32xf32> to vector<2xf32>
    %643 = vector.shape_cast %642 : vector<2xf32> to vector<2x1xf32>
    %644 = tpu.concatenate %569, %637 in 1 : vector<2x32xf32>, vector<2x32xf32> -> vector<2x64xf32>
    %645 = tpu.concatenate %644, %644 in 0 : vector<2x64xf32>, vector<2x64xf32> -> vector<4x64xf32>
    %646 = tpu.concatenate %645, %528 in 1 : vector<4x64xf32>, vector<4x32xf32> -> vector<4x96xf32>
    %c0_150 = arith.constant 0 : index
    %c0_151 = arith.constant 0 : index
    %647 = vector.load %arg4[%c0_150, %c0_151] : memref<96x128xf32, #tpu.memory_space<vmem>>, vector<96x128xf32>
    %cst_152 = arith.constant dense<0.000000e+00> : vector<4x128xf32>
    %648 = tpu.matmul %646, %647, %cst_152 {dimension_numbers = #tpu.dot_dimension_numbers<[1], [0], [0], [1], [0, 0, 1, 1], [], []>} : vector<4x96xf32>, vector<96x128xf32>, vector<4x128xf32> -> vector<4x128xf32>
    %649 = vector.broadcast %1 : vector<1x128xf32> to vector<4x128xf32>
    %650 = arith.addf %648, %649 : vector<4x128xf32>
    %651 = vector.extract_strided_slice %650 {offsets = [0, 0], sizes = [4, 32], strides = [1, 1]} : vector<4x128xf32> to vector<4x32xf32>
    %652 = arith.negf %651 : vector<4x32xf32>
    %653 = math.exp %652 : vector<4x32xf32>
    %cst_153 = arith.constant 1.000000e+00 : f32
    %654 = vector.broadcast %cst_153 : f32 to vector<4x32xf32>
    %655 = arith.addf %654, %653 : vector<4x32xf32>
    %656 = arith.divf %654, %655 : vector<4x32xf32>
    %657 = vector.extract_strided_slice %650 {offsets = [0, 32], sizes = [4, 32], strides = [1, 1]} : vector<4x128xf32> to vector<4x32xf32>
    %658 = arith.negf %657 : vector<4x32xf32>
    %659 = math.exp %658 : vector<4x32xf32>
    %cst_154 = arith.constant 1.000000e+00 : f32
    %660 = vector.broadcast %cst_154 : f32 to vector<4x32xf32>
    %661 = arith.addf %660, %659 : vector<4x32xf32>
    %662 = arith.divf %660, %661 : vector<4x32xf32>
    %663 = vector.extract_strided_slice %650 {offsets = [0, 64], sizes = [4, 32], strides = [1, 1]} : vector<4x128xf32> to vector<4x32xf32>
    %664 = vector.extract_strided_slice %650 {offsets = [0, 96], sizes = [4, 32], strides = [1, 1]} : vector<4x128xf32> to vector<4x32xf32>
    %665 = arith.mulf %656, %664 : vector<4x32xf32>
    %666 = arith.addf %663, %665 : vector<4x32xf32>
    %667 = math.tanh %666 : vector<4x32xf32>
    %cst_155 = arith.constant 1.000000e+00 : f32
    %668 = vector.broadcast %cst_155 : f32 to vector<4x32xf32>
    %669 = arith.subf %668, %662 : vector<4x32xf32>
    %670 = arith.mulf %669, %667 : vector<4x32xf32>
    %671 = arith.mulf %662, %528 : vector<4x32xf32>
    %672 = arith.addf %670, %671 : vector<4x32xf32>
    %673 = vector.extract_strided_slice %571 {offsets = [0, 0], sizes = [2, 1], strides = [1, 1]} : vector<2x2xf32> to vector<2x1xf32>
    %674 = vector.extract_strided_slice %571 {offsets = [0, 1], sizes = [2, 1], strides = [1, 1]} : vector<2x2xf32> to vector<2x1xf32>
    %675 = tpu.concatenate %673, %674 in 0 : vector<2x1xf32>, vector<2x1xf32> -> vector<4x1xf32>
    %cst_156 = arith.constant 1.000000e+00 : f32
    %676 = vector.broadcast %cst_156 : f32 to vector<4x1xf32>
    %677 = arith.subf %676, %675 : vector<4x1xf32>
    %678 = vector.broadcast %677 : vector<4x1xf32> to vector<4x32xf32>
    %679 = arith.mulf %528, %678 : vector<4x32xf32>
    %680 = vector.broadcast %675 : vector<4x1xf32> to vector<4x32xf32>
    %681 = arith.mulf %672, %680 : vector<4x32xf32>
    %682 = arith.addf %679, %681 : vector<4x32xf32>
    %cst_157 = arith.constant 0.000000e+00 : f32
    %683 = vector.broadcast %cst_157 : f32 to vector<2x32xf32>
    %684 = vector.extract_strided_slice %571 {offsets = [0, 0], sizes = [2, 1], strides = [1, 1]} : vector<2x2xf32> to vector<2x1xf32>
    %685 = vector.extract_strided_slice %682 {offsets = [0, 0], sizes = [2, 32], strides = [1, 1]} : vector<4x32xf32> to vector<2x32xf32>
    %686 = vector.broadcast %684 : vector<2x1xf32> to vector<2x32xf32>
    %687 = arith.mulf %686, %685 : vector<2x32xf32>
    %688 = arith.addf %683, %687 : vector<2x32xf32>
    %689 = vector.extract_strided_slice %571 {offsets = [0, 1], sizes = [2, 1], strides = [1, 1]} : vector<2x2xf32> to vector<2x1xf32>
    %690 = vector.extract_strided_slice %682 {offsets = [2, 0], sizes = [2, 32], strides = [1, 1]} : vector<4x32xf32> to vector<2x32xf32>
    %691 = vector.broadcast %689 : vector<2x1xf32> to vector<2x32xf32>
    %692 = arith.mulf %691, %690 : vector<2x32xf32>
    %693 = arith.addf %688, %692 : vector<2x32xf32>
    %694 = tpu.concatenate %693, %566 in 1 : vector<2x32xf32>, vector<2x32xf32> -> vector<2x64xf32>
    %c0_158 = arith.constant 0 : index
    %c0_159 = arith.constant 0 : index
    %695 = vector.load %arg6[%c0_158, %c0_159] : memref<64x128xf32, #tpu.memory_space<vmem>>, vector<64x128xf32>
    %cst_160 = arith.constant dense<0.000000e+00> : vector<2x128xf32>
    %696 = tpu.matmul %694, %695, %cst_160 {dimension_numbers = #tpu.dot_dimension_numbers<[1], [0], [0], [1], [0, 0, 1, 1], [], []>} : vector<2x64xf32>, vector<64x128xf32>, vector<2x128xf32> -> vector<2x128xf32>
    %697 = vector.broadcast %2 : vector<1x128xf32> to vector<2x128xf32>
    %698 = arith.addf %696, %697 : vector<2x128xf32>
    %699 = vector.extract_strided_slice %698 {offsets = [0, 0], sizes = [2, 32], strides = [1, 1]} : vector<2x128xf32> to vector<2x32xf32>
    %700 = arith.negf %699 : vector<2x32xf32>
    %701 = math.exp %700 : vector<2x32xf32>
    %cst_161 = arith.constant 1.000000e+00 : f32
    %702 = vector.broadcast %cst_161 : f32 to vector<2x32xf32>
    %703 = arith.addf %702, %701 : vector<2x32xf32>
    %704 = arith.divf %702, %703 : vector<2x32xf32>
    %705 = vector.extract_strided_slice %698 {offsets = [0, 32], sizes = [2, 32], strides = [1, 1]} : vector<2x128xf32> to vector<2x32xf32>
    %706 = arith.negf %705 : vector<2x32xf32>
    %707 = math.exp %706 : vector<2x32xf32>
    %cst_162 = arith.constant 1.000000e+00 : f32
    %708 = vector.broadcast %cst_162 : f32 to vector<2x32xf32>
    %709 = arith.addf %708, %707 : vector<2x32xf32>
    %710 = arith.divf %708, %709 : vector<2x32xf32>
    %711 = vector.extract_strided_slice %698 {offsets = [0, 64], sizes = [2, 32], strides = [1, 1]} : vector<2x128xf32> to vector<2x32xf32>
    %712 = vector.extract_strided_slice %698 {offsets = [0, 96], sizes = [2, 32], strides = [1, 1]} : vector<2x128xf32> to vector<2x32xf32>
    %713 = arith.mulf %704, %712 : vector<2x32xf32>
    %714 = arith.addf %711, %713 : vector<2x32xf32>
    %715 = math.tanh %714 : vector<2x32xf32>
    %cst_163 = arith.constant 1.000000e+00 : f32
    %716 = vector.broadcast %cst_163 : f32 to vector<2x32xf32>
    %717 = arith.subf %716, %710 : vector<2x32xf32>
    %718 = arith.mulf %717, %715 : vector<2x32xf32>
    %719 = arith.mulf %710, %566 : vector<2x32xf32>
    %720 = arith.addf %718, %719 : vector<2x32xf32>
    %721 = tpu.concatenate %720, %639, %4 in 1 : vector<2x32xf32>, vector<2x8xf32>, vector<2x88xf32> -> vector<2x128xf32>
    %c5 = arith.constant 5 : index
    %c0_164 = arith.constant 0 : index
    %c0_165 = arith.constant 0 : index
    %722 = vector.load %arg0[%c5, %c0_164, %c0_165] : memref<8x2x32xf32, #tpu.memory_space<vmem>>, vector<1x2x32xf32>
    %723 = vector.shape_cast %722 : vector<1x2x32xf32> to vector<2x32xf32>
    %c5_166 = arith.constant 5 : index
    %c0_167 = arith.constant 0 : index
    %c0_168 = arith.constant 0 : index
    %724 = vector.load %arg1[%c5_166, %c0_167, %c0_168] : memref<8x2x2xf32, #tpu.memory_space<vmem>>, vector<1x2x2xf32>
    %725 = vector.shape_cast %724 : vector<1x2x2xf32> to vector<2x2xf32>
    %cst_169 = arith.constant 0.000000e+00 : f32
    %726 = vector.broadcast %cst_169 : f32 to vector<2x32xf32>
    %727 = vector.extract_strided_slice %725 {offsets = [0, 0], sizes = [2, 1], strides = [1, 1]} : vector<2x2xf32> to vector<2x1xf32>
    %728 = vector.extract_strided_slice %682 {offsets = [0, 0], sizes = [2, 32], strides = [1, 1]} : vector<4x32xf32> to vector<2x32xf32>
    %729 = vector.broadcast %727 : vector<2x1xf32> to vector<2x32xf32>
    %730 = arith.mulf %729, %728 : vector<2x32xf32>
    %731 = arith.addf %726, %730 : vector<2x32xf32>
    %732 = vector.extract_strided_slice %725 {offsets = [0, 1], sizes = [2, 1], strides = [1, 1]} : vector<2x2xf32> to vector<2x1xf32>
    %733 = vector.extract_strided_slice %682 {offsets = [2, 0], sizes = [2, 32], strides = [1, 1]} : vector<4x32xf32> to vector<2x32xf32>
    %734 = vector.broadcast %732 : vector<2x1xf32> to vector<2x32xf32>
    %735 = arith.mulf %734, %733 : vector<2x32xf32>
    %736 = arith.addf %731, %735 : vector<2x32xf32>
    %737 = tpu.concatenate %723, %736, %609 in 1 : vector<2x32xf32>, vector<2x32xf32>, vector<2x32xf32> -> vector<2x96xf32>
    %c0_170 = arith.constant 0 : index
    %c0_171 = arith.constant 0 : index
    %738 = vector.load %arg2[%c0_170, %c0_171] : memref<96x128xf32, #tpu.memory_space<vmem>>, vector<96x128xf32>
    %cst_172 = arith.constant dense<0.000000e+00> : vector<2x128xf32>
    %739 = tpu.matmul %737, %738, %cst_172 {dimension_numbers = #tpu.dot_dimension_numbers<[1], [0], [0], [1], [0, 0, 1, 1], [], []>} : vector<2x96xf32>, vector<96x128xf32>, vector<2x128xf32> -> vector<2x128xf32>
    %740 = vector.broadcast %0 : vector<1x128xf32> to vector<2x128xf32>
    %741 = arith.addf %739, %740 : vector<2x128xf32>
    %742 = vector.extract_strided_slice %741 {offsets = [0, 0], sizes = [2, 32], strides = [1, 1]} : vector<2x128xf32> to vector<2x32xf32>
    %743 = arith.negf %742 : vector<2x32xf32>
    %744 = math.exp %743 : vector<2x32xf32>
    %cst_173 = arith.constant 1.000000e+00 : f32
    %745 = vector.broadcast %cst_173 : f32 to vector<2x32xf32>
    %746 = arith.addf %745, %744 : vector<2x32xf32>
    %747 = arith.divf %745, %746 : vector<2x32xf32>
    %748 = vector.extract_strided_slice %741 {offsets = [0, 32], sizes = [2, 32], strides = [1, 1]} : vector<2x128xf32> to vector<2x32xf32>
    %749 = arith.negf %748 : vector<2x32xf32>
    %750 = math.exp %749 : vector<2x32xf32>
    %cst_174 = arith.constant 1.000000e+00 : f32
    %751 = vector.broadcast %cst_174 : f32 to vector<2x32xf32>
    %752 = arith.addf %751, %750 : vector<2x32xf32>
    %753 = arith.divf %751, %752 : vector<2x32xf32>
    %754 = vector.extract_strided_slice %741 {offsets = [0, 64], sizes = [2, 32], strides = [1, 1]} : vector<2x128xf32> to vector<2x32xf32>
    %755 = vector.extract_strided_slice %741 {offsets = [0, 96], sizes = [2, 32], strides = [1, 1]} : vector<2x128xf32> to vector<2x32xf32>
    %756 = arith.mulf %747, %755 : vector<2x32xf32>
    %757 = arith.addf %754, %756 : vector<2x32xf32>
    %758 = math.tanh %757 : vector<2x32xf32>
    %cst_175 = arith.constant 1.000000e+00 : f32
    %759 = vector.broadcast %cst_175 : f32 to vector<2x32xf32>
    %760 = arith.subf %759, %753 : vector<2x32xf32>
    %761 = arith.mulf %760, %758 : vector<2x32xf32>
    %762 = arith.mulf %753, %609 : vector<2x32xf32>
    %763 = arith.addf %761, %762 : vector<2x32xf32>
    %764 = tpu.concatenate %55, %193, %339, %489, %643 in 1 : vector<2x1xf32>, vector<2x1xf32>, vector<2x1xf32>, vector<2x1xf32>, vector<2x1xf32> -> vector<2x5xf32>
    %cst_176 = arith.constant dense<0xFF800000> : vector<2xf32>
    %765 = vector.multi_reduction <maximumf>, %764, %cst_176 [1] : vector<2x5xf32> to vector<2xf32>
    %766 = vector.shape_cast %765 : vector<2xf32> to vector<2x1xf32>
    %767 = vector.broadcast %766 : vector<2x1xf32> to vector<2x5xf32>
    %768 = arith.subf %764, %767 : vector<2x5xf32>
    %769 = math.exp %768 : vector<2x5xf32>
    %cst_177 = arith.constant dense<0.000000e+00> : vector<2xf32>
    %770 = vector.multi_reduction <add>, %769, %cst_177 [1] : vector<2x5xf32> to vector<2xf32>
    %771 = vector.shape_cast %770 : vector<2xf32> to vector<2x1xf32>
    %772 = tpu.reciprocal %771 : vector<2x1xf32> -> vector<2x1xf32>
    %773 = vector.broadcast %772 : vector<2x1xf32> to vector<2x5xf32>
    %774 = arith.mulf %769, %773 : vector<2x5xf32>
    %cst_178 = arith.constant 0.000000e+00 : f32
    %775 = vector.broadcast %cst_178 : f32 to vector<2x32xf32>
    %776 = vector.extract_strided_slice %774 {offsets = [0, 0], sizes = [2, 1], strides = [1, 1]} : vector<2x5xf32> to vector<2x1xf32>
    %777 = vector.broadcast %776 : vector<2x1xf32> to vector<2x32xf32>
    %778 = arith.mulf %777, %49 : vector<2x32xf32>
    %779 = arith.addf %775, %778 : vector<2x32xf32>
    %780 = vector.extract_strided_slice %774 {offsets = [0, 1], sizes = [2, 1], strides = [1, 1]} : vector<2x5xf32> to vector<2x1xf32>
    %781 = vector.broadcast %780 : vector<2x1xf32> to vector<2x32xf32>
    %782 = arith.mulf %781, %175 : vector<2x32xf32>
    %783 = arith.addf %779, %782 : vector<2x32xf32>
    %784 = vector.extract_strided_slice %774 {offsets = [0, 2], sizes = [2, 1], strides = [1, 1]} : vector<2x5xf32> to vector<2x1xf32>
    %785 = vector.broadcast %784 : vector<2x1xf32> to vector<2x32xf32>
    %786 = arith.mulf %785, %313 : vector<2x32xf32>
    %787 = arith.addf %783, %786 : vector<2x32xf32>
    %788 = vector.extract_strided_slice %774 {offsets = [0, 3], sizes = [2, 1], strides = [1, 1]} : vector<2x5xf32> to vector<2x1xf32>
    %789 = vector.broadcast %788 : vector<2x1xf32> to vector<2x32xf32>
    %790 = arith.mulf %789, %459 : vector<2x32xf32>
    %791 = arith.addf %787, %790 : vector<2x32xf32>
    %792 = vector.extract_strided_slice %774 {offsets = [0, 4], sizes = [2, 1], strides = [1, 1]} : vector<2x5xf32> to vector<2x1xf32>
    %793 = vector.broadcast %792 : vector<2x1xf32> to vector<2x32xf32>
    %794 = arith.mulf %793, %609 : vector<2x32xf32>
    %795 = arith.addf %791, %794 : vector<2x32xf32>
    %cst_179 = arith.constant 0.000000e+00 : f32
    %796 = vector.broadcast %cst_179 : f32 to vector<2x3xf32>
    %797 = tpu.concatenate %774, %796 in 1 : vector<2x5xf32>, vector<2x3xf32> -> vector<2x8xf32>
    %798 = vector.broadcast %3 : vector<1x32xf32> to vector<2x32xf32>
    %799 = arith.mulf %763, %798 : vector<2x32xf32>
    %cst_180 = arith.constant dense<0.000000e+00> : vector<2xf32>
    %800 = vector.multi_reduction <add>, %799, %cst_180 [1] : vector<2x32xf32> to vector<2xf32>
    %801 = vector.shape_cast %800 : vector<2xf32> to vector<2x1xf32>
    %802 = tpu.concatenate %723, %795 in 1 : vector<2x32xf32>, vector<2x32xf32> -> vector<2x64xf32>
    %803 = tpu.concatenate %802, %802 in 0 : vector<2x64xf32>, vector<2x64xf32> -> vector<4x64xf32>
    %804 = tpu.concatenate %803, %682 in 1 : vector<4x64xf32>, vector<4x32xf32> -> vector<4x96xf32>
    %c0_181 = arith.constant 0 : index
    %c0_182 = arith.constant 0 : index
    %805 = vector.load %arg4[%c0_181, %c0_182] : memref<96x128xf32, #tpu.memory_space<vmem>>, vector<96x128xf32>
    %cst_183 = arith.constant dense<0.000000e+00> : vector<4x128xf32>
    %806 = tpu.matmul %804, %805, %cst_183 {dimension_numbers = #tpu.dot_dimension_numbers<[1], [0], [0], [1], [0, 0, 1, 1], [], []>} : vector<4x96xf32>, vector<96x128xf32>, vector<4x128xf32> -> vector<4x128xf32>
    %807 = vector.broadcast %1 : vector<1x128xf32> to vector<4x128xf32>
    %808 = arith.addf %806, %807 : vector<4x128xf32>
    %809 = vector.extract_strided_slice %808 {offsets = [0, 0], sizes = [4, 32], strides = [1, 1]} : vector<4x128xf32> to vector<4x32xf32>
    %810 = arith.negf %809 : vector<4x32xf32>
    %811 = math.exp %810 : vector<4x32xf32>
    %cst_184 = arith.constant 1.000000e+00 : f32
    %812 = vector.broadcast %cst_184 : f32 to vector<4x32xf32>
    %813 = arith.addf %812, %811 : vector<4x32xf32>
    %814 = arith.divf %812, %813 : vector<4x32xf32>
    %815 = vector.extract_strided_slice %808 {offsets = [0, 32], sizes = [4, 32], strides = [1, 1]} : vector<4x128xf32> to vector<4x32xf32>
    %816 = arith.negf %815 : vector<4x32xf32>
    %817 = math.exp %816 : vector<4x32xf32>
    %cst_185 = arith.constant 1.000000e+00 : f32
    %818 = vector.broadcast %cst_185 : f32 to vector<4x32xf32>
    %819 = arith.addf %818, %817 : vector<4x32xf32>
    %820 = arith.divf %818, %819 : vector<4x32xf32>
    %821 = vector.extract_strided_slice %808 {offsets = [0, 64], sizes = [4, 32], strides = [1, 1]} : vector<4x128xf32> to vector<4x32xf32>
    %822 = vector.extract_strided_slice %808 {offsets = [0, 96], sizes = [4, 32], strides = [1, 1]} : vector<4x128xf32> to vector<4x32xf32>
    %823 = arith.mulf %814, %822 : vector<4x32xf32>
    %824 = arith.addf %821, %823 : vector<4x32xf32>
    %825 = math.tanh %824 : vector<4x32xf32>
    %cst_186 = arith.constant 1.000000e+00 : f32
    %826 = vector.broadcast %cst_186 : f32 to vector<4x32xf32>
    %827 = arith.subf %826, %820 : vector<4x32xf32>
    %828 = arith.mulf %827, %825 : vector<4x32xf32>
    %829 = arith.mulf %820, %682 : vector<4x32xf32>
    %830 = arith.addf %828, %829 : vector<4x32xf32>
    %831 = vector.extract_strided_slice %725 {offsets = [0, 0], sizes = [2, 1], strides = [1, 1]} : vector<2x2xf32> to vector<2x1xf32>
    %832 = vector.extract_strided_slice %725 {offsets = [0, 1], sizes = [2, 1], strides = [1, 1]} : vector<2x2xf32> to vector<2x1xf32>
    %833 = tpu.concatenate %831, %832 in 0 : vector<2x1xf32>, vector<2x1xf32> -> vector<4x1xf32>
    %cst_187 = arith.constant 1.000000e+00 : f32
    %834 = vector.broadcast %cst_187 : f32 to vector<4x1xf32>
    %835 = arith.subf %834, %833 : vector<4x1xf32>
    %836 = vector.broadcast %835 : vector<4x1xf32> to vector<4x32xf32>
    %837 = arith.mulf %682, %836 : vector<4x32xf32>
    %838 = vector.broadcast %833 : vector<4x1xf32> to vector<4x32xf32>
    %839 = arith.mulf %830, %838 : vector<4x32xf32>
    %840 = arith.addf %837, %839 : vector<4x32xf32>
    %cst_188 = arith.constant 0.000000e+00 : f32
    %841 = vector.broadcast %cst_188 : f32 to vector<2x32xf32>
    %842 = vector.extract_strided_slice %725 {offsets = [0, 0], sizes = [2, 1], strides = [1, 1]} : vector<2x2xf32> to vector<2x1xf32>
    %843 = vector.extract_strided_slice %840 {offsets = [0, 0], sizes = [2, 32], strides = [1, 1]} : vector<4x32xf32> to vector<2x32xf32>
    %844 = vector.broadcast %842 : vector<2x1xf32> to vector<2x32xf32>
    %845 = arith.mulf %844, %843 : vector<2x32xf32>
    %846 = arith.addf %841, %845 : vector<2x32xf32>
    %847 = vector.extract_strided_slice %725 {offsets = [0, 1], sizes = [2, 1], strides = [1, 1]} : vector<2x2xf32> to vector<2x1xf32>
    %848 = vector.extract_strided_slice %840 {offsets = [2, 0], sizes = [2, 32], strides = [1, 1]} : vector<4x32xf32> to vector<2x32xf32>
    %849 = vector.broadcast %847 : vector<2x1xf32> to vector<2x32xf32>
    %850 = arith.mulf %849, %848 : vector<2x32xf32>
    %851 = arith.addf %846, %850 : vector<2x32xf32>
    %852 = tpu.concatenate %851, %720 in 1 : vector<2x32xf32>, vector<2x32xf32> -> vector<2x64xf32>
    %c0_189 = arith.constant 0 : index
    %c0_190 = arith.constant 0 : index
    %853 = vector.load %arg6[%c0_189, %c0_190] : memref<64x128xf32, #tpu.memory_space<vmem>>, vector<64x128xf32>
    %cst_191 = arith.constant dense<0.000000e+00> : vector<2x128xf32>
    %854 = tpu.matmul %852, %853, %cst_191 {dimension_numbers = #tpu.dot_dimension_numbers<[1], [0], [0], [1], [0, 0, 1, 1], [], []>} : vector<2x64xf32>, vector<64x128xf32>, vector<2x128xf32> -> vector<2x128xf32>
    %855 = vector.broadcast %2 : vector<1x128xf32> to vector<2x128xf32>
    %856 = arith.addf %854, %855 : vector<2x128xf32>
    %857 = vector.extract_strided_slice %856 {offsets = [0, 0], sizes = [2, 32], strides = [1, 1]} : vector<2x128xf32> to vector<2x32xf32>
    %858 = arith.negf %857 : vector<2x32xf32>
    %859 = math.exp %858 : vector<2x32xf32>
    %cst_192 = arith.constant 1.000000e+00 : f32
    %860 = vector.broadcast %cst_192 : f32 to vector<2x32xf32>
    %861 = arith.addf %860, %859 : vector<2x32xf32>
    %862 = arith.divf %860, %861 : vector<2x32xf32>
    %863 = vector.extract_strided_slice %856 {offsets = [0, 32], sizes = [2, 32], strides = [1, 1]} : vector<2x128xf32> to vector<2x32xf32>
    %864 = arith.negf %863 : vector<2x32xf32>
    %865 = math.exp %864 : vector<2x32xf32>
    %cst_193 = arith.constant 1.000000e+00 : f32
    %866 = vector.broadcast %cst_193 : f32 to vector<2x32xf32>
    %867 = arith.addf %866, %865 : vector<2x32xf32>
    %868 = arith.divf %866, %867 : vector<2x32xf32>
    %869 = vector.extract_strided_slice %856 {offsets = [0, 64], sizes = [2, 32], strides = [1, 1]} : vector<2x128xf32> to vector<2x32xf32>
    %870 = vector.extract_strided_slice %856 {offsets = [0, 96], sizes = [2, 32], strides = [1, 1]} : vector<2x128xf32> to vector<2x32xf32>
    %871 = arith.mulf %862, %870 : vector<2x32xf32>
    %872 = arith.addf %869, %871 : vector<2x32xf32>
    %873 = math.tanh %872 : vector<2x32xf32>
    %cst_194 = arith.constant 1.000000e+00 : f32
    %874 = vector.broadcast %cst_194 : f32 to vector<2x32xf32>
    %875 = arith.subf %874, %868 : vector<2x32xf32>
    %876 = arith.mulf %875, %873 : vector<2x32xf32>
    %877 = arith.mulf %868, %720 : vector<2x32xf32>
    %878 = arith.addf %876, %877 : vector<2x32xf32>
    %879 = tpu.concatenate %878, %797, %4 in 1 : vector<2x32xf32>, vector<2x8xf32>, vector<2x88xf32> -> vector<2x128xf32>
    %c6 = arith.constant 6 : index
    %c0_195 = arith.constant 0 : index
    %c0_196 = arith.constant 0 : index
    %880 = vector.load %arg0[%c6, %c0_195, %c0_196] : memref<8x2x32xf32, #tpu.memory_space<vmem>>, vector<1x2x32xf32>
    %881 = vector.shape_cast %880 : vector<1x2x32xf32> to vector<2x32xf32>
    %c6_197 = arith.constant 6 : index
    %c0_198 = arith.constant 0 : index
    %c0_199 = arith.constant 0 : index
    %882 = vector.load %arg1[%c6_197, %c0_198, %c0_199] : memref<8x2x2xf32, #tpu.memory_space<vmem>>, vector<1x2x2xf32>
    %883 = vector.shape_cast %882 : vector<1x2x2xf32> to vector<2x2xf32>
    %cst_200 = arith.constant 0.000000e+00 : f32
    %884 = vector.broadcast %cst_200 : f32 to vector<2x32xf32>
    %885 = vector.extract_strided_slice %883 {offsets = [0, 0], sizes = [2, 1], strides = [1, 1]} : vector<2x2xf32> to vector<2x1xf32>
    %886 = vector.extract_strided_slice %840 {offsets = [0, 0], sizes = [2, 32], strides = [1, 1]} : vector<4x32xf32> to vector<2x32xf32>
    %887 = vector.broadcast %885 : vector<2x1xf32> to vector<2x32xf32>
    %888 = arith.mulf %887, %886 : vector<2x32xf32>
    %889 = arith.addf %884, %888 : vector<2x32xf32>
    %890 = vector.extract_strided_slice %883 {offsets = [0, 1], sizes = [2, 1], strides = [1, 1]} : vector<2x2xf32> to vector<2x1xf32>
    %891 = vector.extract_strided_slice %840 {offsets = [2, 0], sizes = [2, 32], strides = [1, 1]} : vector<4x32xf32> to vector<2x32xf32>
    %892 = vector.broadcast %890 : vector<2x1xf32> to vector<2x32xf32>
    %893 = arith.mulf %892, %891 : vector<2x32xf32>
    %894 = arith.addf %889, %893 : vector<2x32xf32>
    %895 = tpu.concatenate %881, %894, %763 in 1 : vector<2x32xf32>, vector<2x32xf32>, vector<2x32xf32> -> vector<2x96xf32>
    %c0_201 = arith.constant 0 : index
    %c0_202 = arith.constant 0 : index
    %896 = vector.load %arg2[%c0_201, %c0_202] : memref<96x128xf32, #tpu.memory_space<vmem>>, vector<96x128xf32>
    %cst_203 = arith.constant dense<0.000000e+00> : vector<2x128xf32>
    %897 = tpu.matmul %895, %896, %cst_203 {dimension_numbers = #tpu.dot_dimension_numbers<[1], [0], [0], [1], [0, 0, 1, 1], [], []>} : vector<2x96xf32>, vector<96x128xf32>, vector<2x128xf32> -> vector<2x128xf32>
    %898 = vector.broadcast %0 : vector<1x128xf32> to vector<2x128xf32>
    %899 = arith.addf %897, %898 : vector<2x128xf32>
    %900 = vector.extract_strided_slice %899 {offsets = [0, 0], sizes = [2, 32], strides = [1, 1]} : vector<2x128xf32> to vector<2x32xf32>
    %901 = arith.negf %900 : vector<2x32xf32>
    %902 = math.exp %901 : vector<2x32xf32>
    %cst_204 = arith.constant 1.000000e+00 : f32
    %903 = vector.broadcast %cst_204 : f32 to vector<2x32xf32>
    %904 = arith.addf %903, %902 : vector<2x32xf32>
    %905 = arith.divf %903, %904 : vector<2x32xf32>
    %906 = vector.extract_strided_slice %899 {offsets = [0, 32], sizes = [2, 32], strides = [1, 1]} : vector<2x128xf32> to vector<2x32xf32>
    %907 = arith.negf %906 : vector<2x32xf32>
    %908 = math.exp %907 : vector<2x32xf32>
    %cst_205 = arith.constant 1.000000e+00 : f32
    %909 = vector.broadcast %cst_205 : f32 to vector<2x32xf32>
    %910 = arith.addf %909, %908 : vector<2x32xf32>
    %911 = arith.divf %909, %910 : vector<2x32xf32>
    %912 = vector.extract_strided_slice %899 {offsets = [0, 64], sizes = [2, 32], strides = [1, 1]} : vector<2x128xf32> to vector<2x32xf32>
    %913 = vector.extract_strided_slice %899 {offsets = [0, 96], sizes = [2, 32], strides = [1, 1]} : vector<2x128xf32> to vector<2x32xf32>
    %914 = arith.mulf %905, %913 : vector<2x32xf32>
    %915 = arith.addf %912, %914 : vector<2x32xf32>
    %916 = math.tanh %915 : vector<2x32xf32>
    %cst_206 = arith.constant 1.000000e+00 : f32
    %917 = vector.broadcast %cst_206 : f32 to vector<2x32xf32>
    %918 = arith.subf %917, %911 : vector<2x32xf32>
    %919 = arith.mulf %918, %916 : vector<2x32xf32>
    %920 = arith.mulf %911, %763 : vector<2x32xf32>
    %921 = arith.addf %919, %920 : vector<2x32xf32>
    %922 = tpu.concatenate %55, %193, %339, %489, %643, %801 in 1 : vector<2x1xf32>, vector<2x1xf32>, vector<2x1xf32>, vector<2x1xf32>, vector<2x1xf32>, vector<2x1xf32> -> vector<2x6xf32>
    %cst_207 = arith.constant dense<0xFF800000> : vector<2xf32>
    %923 = vector.multi_reduction <maximumf>, %922, %cst_207 [1] : vector<2x6xf32> to vector<2xf32>
    %924 = vector.shape_cast %923 : vector<2xf32> to vector<2x1xf32>
    %925 = vector.broadcast %924 : vector<2x1xf32> to vector<2x6xf32>
    %926 = arith.subf %922, %925 : vector<2x6xf32>
    %927 = math.exp %926 : vector<2x6xf32>
    %cst_208 = arith.constant dense<0.000000e+00> : vector<2xf32>
    %928 = vector.multi_reduction <add>, %927, %cst_208 [1] : vector<2x6xf32> to vector<2xf32>
    %929 = vector.shape_cast %928 : vector<2xf32> to vector<2x1xf32>
    %930 = tpu.reciprocal %929 : vector<2x1xf32> -> vector<2x1xf32>
    %931 = vector.broadcast %930 : vector<2x1xf32> to vector<2x6xf32>
    %932 = arith.mulf %927, %931 : vector<2x6xf32>
    %cst_209 = arith.constant 0.000000e+00 : f32
    %933 = vector.broadcast %cst_209 : f32 to vector<2x32xf32>
    %934 = vector.extract_strided_slice %932 {offsets = [0, 0], sizes = [2, 1], strides = [1, 1]} : vector<2x6xf32> to vector<2x1xf32>
    %935 = vector.broadcast %934 : vector<2x1xf32> to vector<2x32xf32>
    %936 = arith.mulf %935, %49 : vector<2x32xf32>
    %937 = arith.addf %933, %936 : vector<2x32xf32>
    %938 = vector.extract_strided_slice %932 {offsets = [0, 1], sizes = [2, 1], strides = [1, 1]} : vector<2x6xf32> to vector<2x1xf32>
    %939 = vector.broadcast %938 : vector<2x1xf32> to vector<2x32xf32>
    %940 = arith.mulf %939, %175 : vector<2x32xf32>
    %941 = arith.addf %937, %940 : vector<2x32xf32>
    %942 = vector.extract_strided_slice %932 {offsets = [0, 2], sizes = [2, 1], strides = [1, 1]} : vector<2x6xf32> to vector<2x1xf32>
    %943 = vector.broadcast %942 : vector<2x1xf32> to vector<2x32xf32>
    %944 = arith.mulf %943, %313 : vector<2x32xf32>
    %945 = arith.addf %941, %944 : vector<2x32xf32>
    %946 = vector.extract_strided_slice %932 {offsets = [0, 3], sizes = [2, 1], strides = [1, 1]} : vector<2x6xf32> to vector<2x1xf32>
    %947 = vector.broadcast %946 : vector<2x1xf32> to vector<2x32xf32>
    %948 = arith.mulf %947, %459 : vector<2x32xf32>
    %949 = arith.addf %945, %948 : vector<2x32xf32>
    %950 = vector.extract_strided_slice %932 {offsets = [0, 4], sizes = [2, 1], strides = [1, 1]} : vector<2x6xf32> to vector<2x1xf32>
    %951 = vector.broadcast %950 : vector<2x1xf32> to vector<2x32xf32>
    %952 = arith.mulf %951, %609 : vector<2x32xf32>
    %953 = arith.addf %949, %952 : vector<2x32xf32>
    %954 = vector.extract_strided_slice %932 {offsets = [0, 5], sizes = [2, 1], strides = [1, 1]} : vector<2x6xf32> to vector<2x1xf32>
    %955 = vector.broadcast %954 : vector<2x1xf32> to vector<2x32xf32>
    %956 = arith.mulf %955, %763 : vector<2x32xf32>
    %957 = arith.addf %953, %956 : vector<2x32xf32>
    %cst_210 = arith.constant 0.000000e+00 : f32
    %958 = vector.broadcast %cst_210 : f32 to vector<2x2xf32>
    %959 = tpu.concatenate %932, %958 in 1 : vector<2x6xf32>, vector<2x2xf32> -> vector<2x8xf32>
    %960 = vector.broadcast %3 : vector<1x32xf32> to vector<2x32xf32>
    %961 = arith.mulf %921, %960 : vector<2x32xf32>
    %cst_211 = arith.constant dense<0.000000e+00> : vector<2xf32>
    %962 = vector.multi_reduction <add>, %961, %cst_211 [1] : vector<2x32xf32> to vector<2xf32>
    %963 = vector.shape_cast %962 : vector<2xf32> to vector<2x1xf32>
    %964 = tpu.concatenate %881, %957 in 1 : vector<2x32xf32>, vector<2x32xf32> -> vector<2x64xf32>
    %965 = tpu.concatenate %964, %964 in 0 : vector<2x64xf32>, vector<2x64xf32> -> vector<4x64xf32>
    %966 = tpu.concatenate %965, %840 in 1 : vector<4x64xf32>, vector<4x32xf32> -> vector<4x96xf32>
    %c0_212 = arith.constant 0 : index
    %c0_213 = arith.constant 0 : index
    %967 = vector.load %arg4[%c0_212, %c0_213] : memref<96x128xf32, #tpu.memory_space<vmem>>, vector<96x128xf32>
    %cst_214 = arith.constant dense<0.000000e+00> : vector<4x128xf32>
    %968 = tpu.matmul %966, %967, %cst_214 {dimension_numbers = #tpu.dot_dimension_numbers<[1], [0], [0], [1], [0, 0, 1, 1], [], []>} : vector<4x96xf32>, vector<96x128xf32>, vector<4x128xf32> -> vector<4x128xf32>
    %969 = vector.broadcast %1 : vector<1x128xf32> to vector<4x128xf32>
    %970 = arith.addf %968, %969 : vector<4x128xf32>
    %971 = vector.extract_strided_slice %970 {offsets = [0, 0], sizes = [4, 32], strides = [1, 1]} : vector<4x128xf32> to vector<4x32xf32>
    %972 = arith.negf %971 : vector<4x32xf32>
    %973 = math.exp %972 : vector<4x32xf32>
    %cst_215 = arith.constant 1.000000e+00 : f32
    %974 = vector.broadcast %cst_215 : f32 to vector<4x32xf32>
    %975 = arith.addf %974, %973 : vector<4x32xf32>
    %976 = arith.divf %974, %975 : vector<4x32xf32>
    %977 = vector.extract_strided_slice %970 {offsets = [0, 32], sizes = [4, 32], strides = [1, 1]} : vector<4x128xf32> to vector<4x32xf32>
    %978 = arith.negf %977 : vector<4x32xf32>
    %979 = math.exp %978 : vector<4x32xf32>
    %cst_216 = arith.constant 1.000000e+00 : f32
    %980 = vector.broadcast %cst_216 : f32 to vector<4x32xf32>
    %981 = arith.addf %980, %979 : vector<4x32xf32>
    %982 = arith.divf %980, %981 : vector<4x32xf32>
    %983 = vector.extract_strided_slice %970 {offsets = [0, 64], sizes = [4, 32], strides = [1, 1]} : vector<4x128xf32> to vector<4x32xf32>
    %984 = vector.extract_strided_slice %970 {offsets = [0, 96], sizes = [4, 32], strides = [1, 1]} : vector<4x128xf32> to vector<4x32xf32>
    %985 = arith.mulf %976, %984 : vector<4x32xf32>
    %986 = arith.addf %983, %985 : vector<4x32xf32>
    %987 = math.tanh %986 : vector<4x32xf32>
    %cst_217 = arith.constant 1.000000e+00 : f32
    %988 = vector.broadcast %cst_217 : f32 to vector<4x32xf32>
    %989 = arith.subf %988, %982 : vector<4x32xf32>
    %990 = arith.mulf %989, %987 : vector<4x32xf32>
    %991 = arith.mulf %982, %840 : vector<4x32xf32>
    %992 = arith.addf %990, %991 : vector<4x32xf32>
    %993 = vector.extract_strided_slice %883 {offsets = [0, 0], sizes = [2, 1], strides = [1, 1]} : vector<2x2xf32> to vector<2x1xf32>
    %994 = vector.extract_strided_slice %883 {offsets = [0, 1], sizes = [2, 1], strides = [1, 1]} : vector<2x2xf32> to vector<2x1xf32>
    %995 = tpu.concatenate %993, %994 in 0 : vector<2x1xf32>, vector<2x1xf32> -> vector<4x1xf32>
    %cst_218 = arith.constant 1.000000e+00 : f32
    %996 = vector.broadcast %cst_218 : f32 to vector<4x1xf32>
    %997 = arith.subf %996, %995 : vector<4x1xf32>
    %998 = vector.broadcast %997 : vector<4x1xf32> to vector<4x32xf32>
    %999 = arith.mulf %840, %998 : vector<4x32xf32>
    %1000 = vector.broadcast %995 : vector<4x1xf32> to vector<4x32xf32>
    %1001 = arith.mulf %992, %1000 : vector<4x32xf32>
    %1002 = arith.addf %999, %1001 : vector<4x32xf32>
    %cst_219 = arith.constant 0.000000e+00 : f32
    %1003 = vector.broadcast %cst_219 : f32 to vector<2x32xf32>
    %1004 = vector.extract_strided_slice %883 {offsets = [0, 0], sizes = [2, 1], strides = [1, 1]} : vector<2x2xf32> to vector<2x1xf32>
    %1005 = vector.extract_strided_slice %1002 {offsets = [0, 0], sizes = [2, 32], strides = [1, 1]} : vector<4x32xf32> to vector<2x32xf32>
    %1006 = vector.broadcast %1004 : vector<2x1xf32> to vector<2x32xf32>
    %1007 = arith.mulf %1006, %1005 : vector<2x32xf32>
    %1008 = arith.addf %1003, %1007 : vector<2x32xf32>
    %1009 = vector.extract_strided_slice %883 {offsets = [0, 1], sizes = [2, 1], strides = [1, 1]} : vector<2x2xf32> to vector<2x1xf32>
    %1010 = vector.extract_strided_slice %1002 {offsets = [2, 0], sizes = [2, 32], strides = [1, 1]} : vector<4x32xf32> to vector<2x32xf32>
    %1011 = vector.broadcast %1009 : vector<2x1xf32> to vector<2x32xf32>
    %1012 = arith.mulf %1011, %1010 : vector<2x32xf32>
    %1013 = arith.addf %1008, %1012 : vector<2x32xf32>
    %1014 = tpu.concatenate %1013, %878 in 1 : vector<2x32xf32>, vector<2x32xf32> -> vector<2x64xf32>
    %c0_220 = arith.constant 0 : index
    %c0_221 = arith.constant 0 : index
    %1015 = vector.load %arg6[%c0_220, %c0_221] : memref<64x128xf32, #tpu.memory_space<vmem>>, vector<64x128xf32>
    %cst_222 = arith.constant dense<0.000000e+00> : vector<2x128xf32>
    %1016 = tpu.matmul %1014, %1015, %cst_222 {dimension_numbers = #tpu.dot_dimension_numbers<[1], [0], [0], [1], [0, 0, 1, 1], [], []>} : vector<2x64xf32>, vector<64x128xf32>, vector<2x128xf32> -> vector<2x128xf32>
    %1017 = vector.broadcast %2 : vector<1x128xf32> to vector<2x128xf32>
    %1018 = arith.addf %1016, %1017 : vector<2x128xf32>
    %1019 = vector.extract_strided_slice %1018 {offsets = [0, 0], sizes = [2, 32], strides = [1, 1]} : vector<2x128xf32> to vector<2x32xf32>
    %1020 = arith.negf %1019 : vector<2x32xf32>
    %1021 = math.exp %1020 : vector<2x32xf32>
    %cst_223 = arith.constant 1.000000e+00 : f32
    %1022 = vector.broadcast %cst_223 : f32 to vector<2x32xf32>
    %1023 = arith.addf %1022, %1021 : vector<2x32xf32>
    %1024 = arith.divf %1022, %1023 : vector<2x32xf32>
    %1025 = vector.extract_strided_slice %1018 {offsets = [0, 32], sizes = [2, 32], strides = [1, 1]} : vector<2x128xf32> to vector<2x32xf32>
    %1026 = arith.negf %1025 : vector<2x32xf32>
    %1027 = math.exp %1026 : vector<2x32xf32>
    %cst_224 = arith.constant 1.000000e+00 : f32
    %1028 = vector.broadcast %cst_224 : f32 to vector<2x32xf32>
    %1029 = arith.addf %1028, %1027 : vector<2x32xf32>
    %1030 = arith.divf %1028, %1029 : vector<2x32xf32>
    %1031 = vector.extract_strided_slice %1018 {offsets = [0, 64], sizes = [2, 32], strides = [1, 1]} : vector<2x128xf32> to vector<2x32xf32>
    %1032 = vector.extract_strided_slice %1018 {offsets = [0, 96], sizes = [2, 32], strides = [1, 1]} : vector<2x128xf32> to vector<2x32xf32>
    %1033 = arith.mulf %1024, %1032 : vector<2x32xf32>
    %1034 = arith.addf %1031, %1033 : vector<2x32xf32>
    %1035 = math.tanh %1034 : vector<2x32xf32>
    %cst_225 = arith.constant 1.000000e+00 : f32
    %1036 = vector.broadcast %cst_225 : f32 to vector<2x32xf32>
    %1037 = arith.subf %1036, %1030 : vector<2x32xf32>
    %1038 = arith.mulf %1037, %1035 : vector<2x32xf32>
    %1039 = arith.mulf %1030, %878 : vector<2x32xf32>
    %1040 = arith.addf %1038, %1039 : vector<2x32xf32>
    %1041 = tpu.concatenate %1040, %959, %4 in 1 : vector<2x32xf32>, vector<2x8xf32>, vector<2x88xf32> -> vector<2x128xf32>
    %c7 = arith.constant 7 : index
    %c0_226 = arith.constant 0 : index
    %c0_227 = arith.constant 0 : index
    %1042 = vector.load %arg0[%c7, %c0_226, %c0_227] : memref<8x2x32xf32, #tpu.memory_space<vmem>>, vector<1x2x32xf32>
    %1043 = vector.shape_cast %1042 : vector<1x2x32xf32> to vector<2x32xf32>
    %c7_228 = arith.constant 7 : index
    %c0_229 = arith.constant 0 : index
    %c0_230 = arith.constant 0 : index
    %1044 = vector.load %arg1[%c7_228, %c0_229, %c0_230] : memref<8x2x2xf32, #tpu.memory_space<vmem>>, vector<1x2x2xf32>
    %1045 = vector.shape_cast %1044 : vector<1x2x2xf32> to vector<2x2xf32>
    %1046 = tpu.concatenate %55, %193, %339, %489, %643, %801, %963 in 1 : vector<2x1xf32>, vector<2x1xf32>, vector<2x1xf32>, vector<2x1xf32>, vector<2x1xf32>, vector<2x1xf32>, vector<2x1xf32> -> vector<2x7xf32>
    %cst_231 = arith.constant dense<0xFF800000> : vector<2xf32>
    %1047 = vector.multi_reduction <maximumf>, %1046, %cst_231 [1] : vector<2x7xf32> to vector<2xf32>
    %1048 = vector.shape_cast %1047 : vector<2xf32> to vector<2x1xf32>
    %1049 = vector.broadcast %1048 : vector<2x1xf32> to vector<2x7xf32>
    %1050 = arith.subf %1046, %1049 : vector<2x7xf32>
    %1051 = math.exp %1050 : vector<2x7xf32>
    %cst_232 = arith.constant dense<0.000000e+00> : vector<2xf32>
    %1052 = vector.multi_reduction <add>, %1051, %cst_232 [1] : vector<2x7xf32> to vector<2xf32>
    %1053 = vector.shape_cast %1052 : vector<2xf32> to vector<2x1xf32>
    %1054 = tpu.reciprocal %1053 : vector<2x1xf32> -> vector<2x1xf32>
    %1055 = vector.broadcast %1054 : vector<2x1xf32> to vector<2x7xf32>
    %1056 = arith.mulf %1051, %1055 : vector<2x7xf32>
    %cst_233 = arith.constant 0.000000e+00 : f32
    %1057 = vector.broadcast %cst_233 : f32 to vector<2x32xf32>
    %1058 = vector.extract_strided_slice %1056 {offsets = [0, 0], sizes = [2, 1], strides = [1, 1]} : vector<2x7xf32> to vector<2x1xf32>
    %1059 = vector.broadcast %1058 : vector<2x1xf32> to vector<2x32xf32>
    %1060 = arith.mulf %1059, %49 : vector<2x32xf32>
    %1061 = arith.addf %1057, %1060 : vector<2x32xf32>
    %1062 = vector.extract_strided_slice %1056 {offsets = [0, 1], sizes = [2, 1], strides = [1, 1]} : vector<2x7xf32> to vector<2x1xf32>
    %1063 = vector.broadcast %1062 : vector<2x1xf32> to vector<2x32xf32>
    %1064 = arith.mulf %1063, %175 : vector<2x32xf32>
    %1065 = arith.addf %1061, %1064 : vector<2x32xf32>
    %1066 = vector.extract_strided_slice %1056 {offsets = [0, 2], sizes = [2, 1], strides = [1, 1]} : vector<2x7xf32> to vector<2x1xf32>
    %1067 = vector.broadcast %1066 : vector<2x1xf32> to vector<2x32xf32>
    %1068 = arith.mulf %1067, %313 : vector<2x32xf32>
    %1069 = arith.addf %1065, %1068 : vector<2x32xf32>
    %1070 = vector.extract_strided_slice %1056 {offsets = [0, 3], sizes = [2, 1], strides = [1, 1]} : vector<2x7xf32> to vector<2x1xf32>
    %1071 = vector.broadcast %1070 : vector<2x1xf32> to vector<2x32xf32>
    %1072 = arith.mulf %1071, %459 : vector<2x32xf32>
    %1073 = arith.addf %1069, %1072 : vector<2x32xf32>
    %1074 = vector.extract_strided_slice %1056 {offsets = [0, 4], sizes = [2, 1], strides = [1, 1]} : vector<2x7xf32> to vector<2x1xf32>
    %1075 = vector.broadcast %1074 : vector<2x1xf32> to vector<2x32xf32>
    %1076 = arith.mulf %1075, %609 : vector<2x32xf32>
    %1077 = arith.addf %1073, %1076 : vector<2x32xf32>
    %1078 = vector.extract_strided_slice %1056 {offsets = [0, 5], sizes = [2, 1], strides = [1, 1]} : vector<2x7xf32> to vector<2x1xf32>
    %1079 = vector.broadcast %1078 : vector<2x1xf32> to vector<2x32xf32>
    %1080 = arith.mulf %1079, %763 : vector<2x32xf32>
    %1081 = arith.addf %1077, %1080 : vector<2x32xf32>
    %1082 = vector.extract_strided_slice %1056 {offsets = [0, 6], sizes = [2, 1], strides = [1, 1]} : vector<2x7xf32> to vector<2x1xf32>
    %1083 = vector.broadcast %1082 : vector<2x1xf32> to vector<2x32xf32>
    %1084 = arith.mulf %1083, %921 : vector<2x32xf32>
    %1085 = arith.addf %1081, %1084 : vector<2x32xf32>
    %cst_234 = arith.constant 0.000000e+00 : f32
    %1086 = vector.broadcast %cst_234 : f32 to vector<2x1xf32>
    %1087 = tpu.concatenate %1056, %1086 in 1 : vector<2x7xf32>, vector<2x1xf32> -> vector<2x8xf32>
    %1088 = tpu.concatenate %1043, %1085 in 1 : vector<2x32xf32>, vector<2x32xf32> -> vector<2x64xf32>
    %1089 = tpu.concatenate %1088, %1088 in 0 : vector<2x64xf32>, vector<2x64xf32> -> vector<4x64xf32>
    %1090 = tpu.concatenate %1089, %1002 in 1 : vector<4x64xf32>, vector<4x32xf32> -> vector<4x96xf32>
    %c0_235 = arith.constant 0 : index
    %c0_236 = arith.constant 0 : index
    %1091 = vector.load %arg4[%c0_235, %c0_236] : memref<96x128xf32, #tpu.memory_space<vmem>>, vector<96x128xf32>
    %cst_237 = arith.constant dense<0.000000e+00> : vector<4x128xf32>
    %1092 = tpu.matmul %1090, %1091, %cst_237 {dimension_numbers = #tpu.dot_dimension_numbers<[1], [0], [0], [1], [0, 0, 1, 1], [], []>} : vector<4x96xf32>, vector<96x128xf32>, vector<4x128xf32> -> vector<4x128xf32>
    %1093 = vector.broadcast %1 : vector<1x128xf32> to vector<4x128xf32>
    %1094 = arith.addf %1092, %1093 : vector<4x128xf32>
    %1095 = vector.extract_strided_slice %1094 {offsets = [0, 0], sizes = [4, 32], strides = [1, 1]} : vector<4x128xf32> to vector<4x32xf32>
    %1096 = arith.negf %1095 : vector<4x32xf32>
    %1097 = math.exp %1096 : vector<4x32xf32>
    %cst_238 = arith.constant 1.000000e+00 : f32
    %1098 = vector.broadcast %cst_238 : f32 to vector<4x32xf32>
    %1099 = arith.addf %1098, %1097 : vector<4x32xf32>
    %1100 = arith.divf %1098, %1099 : vector<4x32xf32>
    %1101 = vector.extract_strided_slice %1094 {offsets = [0, 32], sizes = [4, 32], strides = [1, 1]} : vector<4x128xf32> to vector<4x32xf32>
    %1102 = arith.negf %1101 : vector<4x32xf32>
    %1103 = math.exp %1102 : vector<4x32xf32>
    %cst_239 = arith.constant 1.000000e+00 : f32
    %1104 = vector.broadcast %cst_239 : f32 to vector<4x32xf32>
    %1105 = arith.addf %1104, %1103 : vector<4x32xf32>
    %1106 = arith.divf %1104, %1105 : vector<4x32xf32>
    %1107 = vector.extract_strided_slice %1094 {offsets = [0, 64], sizes = [4, 32], strides = [1, 1]} : vector<4x128xf32> to vector<4x32xf32>
    %1108 = vector.extract_strided_slice %1094 {offsets = [0, 96], sizes = [4, 32], strides = [1, 1]} : vector<4x128xf32> to vector<4x32xf32>
    %1109 = arith.mulf %1100, %1108 : vector<4x32xf32>
    %1110 = arith.addf %1107, %1109 : vector<4x32xf32>
    %1111 = math.tanh %1110 : vector<4x32xf32>
    %cst_240 = arith.constant 1.000000e+00 : f32
    %1112 = vector.broadcast %cst_240 : f32 to vector<4x32xf32>
    %1113 = arith.subf %1112, %1106 : vector<4x32xf32>
    %1114 = arith.mulf %1113, %1111 : vector<4x32xf32>
    %1115 = arith.mulf %1106, %1002 : vector<4x32xf32>
    %1116 = arith.addf %1114, %1115 : vector<4x32xf32>
    %1117 = vector.extract_strided_slice %1045 {offsets = [0, 0], sizes = [2, 1], strides = [1, 1]} : vector<2x2xf32> to vector<2x1xf32>
    %1118 = vector.extract_strided_slice %1045 {offsets = [0, 1], sizes = [2, 1], strides = [1, 1]} : vector<2x2xf32> to vector<2x1xf32>
    %1119 = tpu.concatenate %1117, %1118 in 0 : vector<2x1xf32>, vector<2x1xf32> -> vector<4x1xf32>
    %cst_241 = arith.constant 1.000000e+00 : f32
    %1120 = vector.broadcast %cst_241 : f32 to vector<4x1xf32>
    %1121 = arith.subf %1120, %1119 : vector<4x1xf32>
    %1122 = vector.broadcast %1121 : vector<4x1xf32> to vector<4x32xf32>
    %1123 = arith.mulf %1002, %1122 : vector<4x32xf32>
    %1124 = vector.broadcast %1119 : vector<4x1xf32> to vector<4x32xf32>
    %1125 = arith.mulf %1116, %1124 : vector<4x32xf32>
    %1126 = arith.addf %1123, %1125 : vector<4x32xf32>
    %cst_242 = arith.constant 0.000000e+00 : f32
    %1127 = vector.broadcast %cst_242 : f32 to vector<2x32xf32>
    %1128 = vector.extract_strided_slice %1045 {offsets = [0, 0], sizes = [2, 1], strides = [1, 1]} : vector<2x2xf32> to vector<2x1xf32>
    %1129 = vector.extract_strided_slice %1126 {offsets = [0, 0], sizes = [2, 32], strides = [1, 1]} : vector<4x32xf32> to vector<2x32xf32>
    %1130 = vector.broadcast %1128 : vector<2x1xf32> to vector<2x32xf32>
    %1131 = arith.mulf %1130, %1129 : vector<2x32xf32>
    %1132 = arith.addf %1127, %1131 : vector<2x32xf32>
    %1133 = vector.extract_strided_slice %1045 {offsets = [0, 1], sizes = [2, 1], strides = [1, 1]} : vector<2x2xf32> to vector<2x1xf32>
    %1134 = vector.extract_strided_slice %1126 {offsets = [2, 0], sizes = [2, 32], strides = [1, 1]} : vector<4x32xf32> to vector<2x32xf32>
    %1135 = vector.broadcast %1133 : vector<2x1xf32> to vector<2x32xf32>
    %1136 = arith.mulf %1135, %1134 : vector<2x32xf32>
    %1137 = arith.addf %1132, %1136 : vector<2x32xf32>
    %1138 = tpu.concatenate %1137, %1040 in 1 : vector<2x32xf32>, vector<2x32xf32> -> vector<2x64xf32>
    %c0_243 = arith.constant 0 : index
    %c0_244 = arith.constant 0 : index
    %1139 = vector.load %arg6[%c0_243, %c0_244] : memref<64x128xf32, #tpu.memory_space<vmem>>, vector<64x128xf32>
    %cst_245 = arith.constant dense<0.000000e+00> : vector<2x128xf32>
    %1140 = tpu.matmul %1138, %1139, %cst_245 {dimension_numbers = #tpu.dot_dimension_numbers<[1], [0], [0], [1], [0, 0, 1, 1], [], []>} : vector<2x64xf32>, vector<64x128xf32>, vector<2x128xf32> -> vector<2x128xf32>
    %1141 = vector.broadcast %2 : vector<1x128xf32> to vector<2x128xf32>
    %1142 = arith.addf %1140, %1141 : vector<2x128xf32>
    %1143 = vector.extract_strided_slice %1142 {offsets = [0, 0], sizes = [2, 32], strides = [1, 1]} : vector<2x128xf32> to vector<2x32xf32>
    %1144 = arith.negf %1143 : vector<2x32xf32>
    %1145 = math.exp %1144 : vector<2x32xf32>
    %cst_246 = arith.constant 1.000000e+00 : f32
    %1146 = vector.broadcast %cst_246 : f32 to vector<2x32xf32>
    %1147 = arith.addf %1146, %1145 : vector<2x32xf32>
    %1148 = arith.divf %1146, %1147 : vector<2x32xf32>
    %1149 = vector.extract_strided_slice %1142 {offsets = [0, 32], sizes = [2, 32], strides = [1, 1]} : vector<2x128xf32> to vector<2x32xf32>
    %1150 = arith.negf %1149 : vector<2x32xf32>
    %1151 = math.exp %1150 : vector<2x32xf32>
    %cst_247 = arith.constant 1.000000e+00 : f32
    %1152 = vector.broadcast %cst_247 : f32 to vector<2x32xf32>
    %1153 = arith.addf %1152, %1151 : vector<2x32xf32>
    %1154 = arith.divf %1152, %1153 : vector<2x32xf32>
    %1155 = vector.extract_strided_slice %1142 {offsets = [0, 64], sizes = [2, 32], strides = [1, 1]} : vector<2x128xf32> to vector<2x32xf32>
    %1156 = vector.extract_strided_slice %1142 {offsets = [0, 96], sizes = [2, 32], strides = [1, 1]} : vector<2x128xf32> to vector<2x32xf32>
    %1157 = arith.mulf %1148, %1156 : vector<2x32xf32>
    %1158 = arith.addf %1155, %1157 : vector<2x32xf32>
    %1159 = math.tanh %1158 : vector<2x32xf32>
    %cst_248 = arith.constant 1.000000e+00 : f32
    %1160 = vector.broadcast %cst_248 : f32 to vector<2x32xf32>
    %1161 = arith.subf %1160, %1154 : vector<2x32xf32>
    %1162 = arith.mulf %1161, %1159 : vector<2x32xf32>
    %1163 = arith.mulf %1154, %1040 : vector<2x32xf32>
    %1164 = arith.addf %1162, %1163 : vector<2x32xf32>
    %1165 = tpu.concatenate %1164, %1087, %4 in 1 : vector<2x32xf32>, vector<2x8xf32>, vector<2x88xf32> -> vector<2x128xf32>
    %1166 = vector.shape_cast %133 : vector<2x128xf32> to vector<1x2x128xf32>
    %1167 = vector.shape_cast %271 : vector<2x128xf32> to vector<1x2x128xf32>
    %1168 = vector.shape_cast %417 : vector<2x128xf32> to vector<1x2x128xf32>
    %1169 = vector.shape_cast %567 : vector<2x128xf32> to vector<1x2x128xf32>
    %1170 = vector.shape_cast %721 : vector<2x128xf32> to vector<1x2x128xf32>
    %1171 = vector.shape_cast %879 : vector<2x128xf32> to vector<1x2x128xf32>
    %1172 = vector.shape_cast %1041 : vector<2x128xf32> to vector<1x2x128xf32>
    %1173 = vector.shape_cast %1165 : vector<2x128xf32> to vector<1x2x128xf32>
    %1174 = tpu.concatenate %1166, %1167, %1168, %1169, %1170, %1171, %1172, %1173 in 0 : vector<1x2x128xf32>, vector<1x2x128xf32>, vector<1x2x128xf32>, vector<1x2x128xf32>, vector<1x2x128xf32>, vector<1x2x128xf32>, vector<1x2x128xf32>, vector<1x2x128xf32> -> vector<8x2x128xf32>
    %c0_249 = arith.constant 0 : index
    %c0_250 = arith.constant 0 : index
    %c0_251 = arith.constant 0 : index
    %1175 = vector.load %arg9[%c0_249, %c0_250, %c0_251] : memref<8x2x128xf32, #tpu.memory_space<vmem>>, vector<8x2x128xf32>
    tpu.vector_store %arg9[%c0_249, %c0_250, %c0_251], %1174 {strides = array<i32>} : memref<8x2x128xf32, #tpu.memory_space<vmem>>, vector<8x2x128xf32>,
    return
  }
}

</mosaic_0001>

<bundles_post_ra>
// kernel: tpu_custom_call.1
= control target key start
LH: loop header
LB: loop body
LE: loop exit
PB: predicated region body
PF: predicated region fallthrough
CT: control target
= control target key end

     0   :  { %14 = vsyncpa [#allocation3], 0  ;;  %s6176_s0 = inlined_call_operand.vmem [shape: f32[8,2,32], index: 0, kind: input, shape index: {}]   ;;  %s6177_s1 = inlined_call_operand.vmem [shape: f32[8,2,2], index: 1, kind: input, shape index: {}]   ;;  %s6178_s2 = inlined_call_operand.hbm [shape: f32[96,128], index: 2, kind: input, shape index: {}]   ;;  %s6179_s3 = inlined_call_operand.vmem [shape: f32[1,128], index: 3, kind: input, shape index: {}]   ;;  %s6180_s4 = inlined_call_operand.hbm [shape: f32[96,128], index: 4, kind: input, shape index: {}]   ;;  %s6181_s5 = inlined_call_operand.vmem [shape: f32[1,128], index: 5, kind: input, shape index: {}]   ;;  %s6182_s6 = inlined_call_operand.hbm [shape: f32[64,128], index: 6, kind: input, shape index: {}]   ;;  %s6183_s7 = inlined_call_operand.vmem [shape: f32[1,128], index: 7, kind: input, shape index: {}]   ;;  %s6184_s8 = inlined_call_operand.vmem [shape: f32[1,32], index: 8, kind: input, shape index: {}]   ;;  %s6185_s9 = inlined_call_operand.hbm [shape: f32[8,2,128], index: 9, kind: output, shape index: {}]  }
   0x1   :  { %15 = vsyncpa [#allocation6], 0 }
   0x2   :  { %16 = vsyncpa [#allocation4], 0  ;;  %s4648_s30 = smov [#allocation5]   ;;  %s4649_s11 = smov [#allocation2]  }
   0x3   :  { %s40_s10 = sshll.u32 %s4648_s30, 4  ;;  %s26_s12 = sshll.u32 %s4649_s11, 4  ;;  %s41_s10 = int_to_ptr.vmem [resolvable:$true] %s40_s10  ;;  %s27_s12 = int_to_ptr.vmem [resolvable:$true] %s26_s12 }
   0x4   :  { %s4570_s13 = scalar_lea.vmem %s41_s10, 1536  ;;  %p4575_p1 = scmp.lt.s32.totalorder %s41_s10, %s41_s10 }
   0x5   :  { %p4571_p0 = scmp.ne.s32.totalorder %s41_s10, %s4570_s13  ;;  %p4576_p2 = scmp.lt.s32.totalorder %s4570_s13, %s4570_s13 }
   0x7   :  { %p4577_p3 = por %p4576_p2, %p4575_p1 }
   0x9   :  { %p4578_p4 = pnand %p4577_p3, %p4571_p0 }
   0xb   :  { %4581 = shalt.err (!%p4578_p4)
}
   0xc   :  { %s4650_s14 = smov 128   ;;  %s4651_s15 = smov 8  }
   0xd   :  { %46 = dma.hbm_to_vmem [thread:$0]  %s6180_s4, 1536, %s41_s10, [#allocation6], %s4650_s14, %s4650_s14, %s4651_s15  }
   0xe   :  { %s4590_s18 = scalar_lea.vmem %s27_s12, 1536  ;;  %p4595_p6 = scmp.lt.s32.totalorder %s27_s12, %s27_s12 }
   0xf   :  { %p4591_p5 = scmp.ne.s32.totalorder %s27_s12, %s4590_s18  ;;  %p4596_p7 = scmp.lt.s32.totalorder %s4590_s18, %s4590_s18 }
  0x11   :  { %p4597_p8 = por %p4596_p7, %p4595_p6 }
  0x13   :  { %p4598_p9 = pnand %p4597_p8, %p4591_p5 }
  0x15   :  { %4601 = shalt.err (!%p4598_p9)
}
  0x16   :  { %32 = dma.hbm_to_vmem [thread:$0]  %s6178_s2, 1536, %s27_s12, [#allocation3], %s4650_s14, %s4650_s14, %s4651_s15  }
  0x17   :  { %s4652_s21 = smov [#allocation7]  }
  0x18   :  { %s54_s22 = sshll.u32 %s4652_s21, 4  ;;  %s55_s22 = int_to_ptr.vmem [resolvable:$true] %s54_s22 }
  0x19   :  { %s4610_s23 = scalar_lea.vmem %s55_s22, 1024  ;;  %p4615_p11 = scmp.lt.s32.totalorder %s55_s22, %s55_s22 }
  0x1a   :  { %p4611_p10 = scmp.ne.s32.totalorder %s55_s22, %s4610_s23  ;;  %p4616_p12 = scmp.lt.s32.totalorder %s4610_s23, %s4610_s23 }
  0x1c   :  { %p4617_p13 = por %p4616_p12, %p4615_p11 }
  0x1e   :  { %p4618_p0 = pnand %p4617_p13, %p4611_p10 }
  0x20   :  { %4621 = shalt.err (!%p4618_p0)
}
  0x21   :  { %60 = dma.hbm_to_vmem [thread:$0]  %s6182_s6, 1024, %s55_s22, [#allocation6], %s4650_s14, %s4650_s14, %s4651_s15  }
  0x22   :  { %4642 = dma.done.wait [#allocation3], 1536  }
  0x23   :  { %4643 = vsyncadd [#allocation3], 4294965760 }
  0x24   :  { %4644 = dma.done.wait [#allocation6], 2560  }
  0x25   :  { %4645 = vsyncadd [#allocation6], 4294964736  ;;  %v6195_v0 = vmov 0.0   ;;  %v6188_v1 = vmov 0   ;;  %vm4655_vm0 = vmmov 0   ;;  %v4735_v2 = vld [vmem:[#allocation5 + $0x58] sm:$0xff] }
  0x26   :  { %3737 = vmatprep.subr.mxu1 %v6195_v0  ;;  %4287 = vset.pattern.permute.xlu0 %v6188_v1  ;;  %v4740_v3 = vld [vmem:[%s6177_s1] sm:$0x3]  ;;  %v4742_v4 = vld [vmem:[#allocation5 + $0x50] sm:$0xff]  ;;  %v4747_v5 = vld [vmem:[#allocation5 + $0x48] sm:$0xff]  ;;  %v6190_v8 = vmov 1   ;;  %vm93_vm1 = vcmask 261120  }
  0x27   :  { %3761 = vmatprep.mubr.msk.f32.mxu1 %vm4655_vm0, %v6195_v0  ;;  %3710 = vmatprep.subr.mxu0 %v6195_v0  ;;  %v4751_v6 = vld [vmem:[#allocation5 + $0x40] sm:$0xff]  ;;  %v4753_v7 = vld [vmem:[#allocation2 + $0x58] sm:$0xff]  ;;  %v4761_v10 = vld [vmem:[#allocation2 + $0x50] sm:$0xff]  ;;  %vm235_vm2 = vcmask 1041408   ;;  %vm95_vm3 = vcmask 523264   ;;  %vm115_vm4 = vcmask 785408  }
  0x28   :  { %3734 = vmatprep.mubr.msk.f32.mxu0 %vm4655_vm0, %v6195_v0  ;;  %4290 = vset.pattern.permute.xlu1 %v6188_v1  ;;  %v4759_v9 = vld [vmem:[#allocation5 + $0x38] sm:$0xff]  ;;  %v4766_v11 = vld [vmem:[#allocation5 + $0x30] sm:$0xff]  ;;  %v4771_v12 = vld [vmem:[%s6176_s0] sm:$0x3]  ;;  %v354_v40 = vrot.slane %v4740_v3, 6  ;;  %s4657_s27 = smov 127  }
  0x29   :  { %3738 = vmatpush3.msra.mxu1 %v4735_v2  ;;  %82 = vperm.xlu0 %4287, %v4740_v3   ;;  %v4774_v13 = vld [vmem:[#allocation2 + $0x48] sm:$0xff]  ;;  %v4782_v15 = vld [vmem:[#allocation2 + $0x40] sm:$0xff]  ;;  %v231_v16 = vsel %vm93_vm1, %v4771_v12, 0.0  ;;  %v4792_v18 = vld [vmem:[#allocation2 + $0x38] sm:$0xff]  ;;  %s4658_s30 = smov 32   ;;  %s4659_s12 = smov 64  }
  0x2a   :  { %3739 = vmatprep.subr.mxu1 %v6195_v0  ;;  %3711 = vmatpush3.msra.mxu0 %v4753_v7  ;;  %v4779_v14 = vld [vmem:[#allocation5 + $0x28] sm:$0xff]  ;;  %v4789_v17 = vld [vmem:[#allocation5 + $0x20] sm:$0xff]  ;;  %v4797_v19 = vld [vmem:[#allocation5 + $0x18] sm:$0xff]  ;;  %v233_v20 = vrot.slane %v231_v16, 6  ;;  %s4660_s13 = smov 96   ;;  %vm227_vm5 = vcmask 254976  }
  0x2b   :  { %3740 = vmatpush3.msra.mxu1 %v4742_v4  ;;  %3712 = vmatprep.subr.mxu0 %v6195_v0  ;;  %v4800_v21 = vld [vmem:[#allocation2 + $0x30] sm:$0xff]  ;;  %v4808_v23 = vld [vmem:[#allocation2 + $0x28] sm:$0xff]  ;;  %v4817_v26 = vld [vmem:[#allocation2 + $0x20] sm:$0xff]  ;;  %vm1031_vm6 = vcmask 9216   ;;  %vm643_vm7 = vcmask 7168   ;;  %vm1444_vm8 = vcmask 17408  }
  0x2c   :  { %3741 = vmatprep.subr.mxu1 %v6195_v0  ;;  %3713 = vmatpush3.msra.mxu0 %v4761_v10  ;;  %v4805_v22 = vld [vmem:[#allocation5 + $0x10] sm:$0xff]  ;;  %v4813_v24 = vld [vmem:[#allocation5 + $0x8] sm:$0xff]  ;;  %v236_v25 = vsel %vm235_vm2, %v231_v16, %v233_v20  ;;  %v4822_v27 = vld [vmem:[#allocation5] sm:$0xff]  ;;  %vm1056_vm9 = vcmask 15360   ;;  %vm1863_vm10 = vcmask 25600   ;;  %vm1475_vm11 = vcmask 23552  }
  0x2d   :  { %3742 = vmatpush3.msra.mxu1 %v4747_v5  ;;  %4288 = vset.pattern.permute.xlu0 %v6190_v8  ;;  %v4825_v28 = vld [vmem:[#allocation2 + $0x18] sm:$0xff]  ;;  %v237_v29 = vsel %vm95_vm3, %v236_v25, 0.0  ;;  %v4832_v30 = vld [vmem:[#allocation2 + $0x10] sm:$0xff]  ;;  %v4838_v31 = vld [vmem:[#allocation2 + $0x8] sm:$0xff]  ;;  %vm2288_vm12 = vcmask 33792   ;;  %vm1900_vm13 = vcmask 31744  }
  0x2e   :  { %3743 = vmatprep.subr.mxu1 %v6195_v0  ;;  %88 = vperm.xlu0 %4288, %v4740_v3   ;;  %v4843_v32 = vld [vmem:[#allocation2] sm:$0xff]  ;;  %vm2719_vm14 = vcmask 41984   ;;  %vm2331_vm15 = vcmask 39936  }
  0x2f   :  { %3744 = vmatpush3.msra.mxu1 %v4751_v6  ;;  %3714 = vmatprep.subr.mxu0 %v6195_v0  ;;  %v4893_v41 = vld [vmem:[%s6181_s5] ss:$0 sm:$0xff] }
  0x30   :  { %3745 = vmatprep.subr.mxu1 %v6195_v0  ;;  %3715 = vmatpush3.msra.mxu0 %v4774_v13  ;;  %v4902_v50 = vld [vmem:[%s6179_s3] ss:$0 sm:$0xff] }
  0x31   :  { %3746 = vmatpush3.msra.mxu1 %v4759_v9  ;;  %3716 = vmatprep.subr.mxu0 %v6195_v0  ;;  %v3382_v20 = vld [vmem:[%s6184_s8] ss:$0 sm:$0xff] }
  0x32   :  { %3747 = vmatprep.subr.mxu1 %v6195_v0  ;;  %3717 = vmatpush3.msra.mxu0 %v4782_v15 }
  0x33   :  { %3748 = vmatpush3.msra.mxu1 %v4766_v11  ;;  %3718 = vmatprep.subr.mxu0 %v6195_v0 }
  0x34   :  { %3749 = vmatprep.subr.mxu1 %v6195_v0  ;;  %3719 = vmatpush3.msra.mxu0 %v4792_v18 }
  0x35   :  { %3750 = vmatpush3.msra.mxu1 %v4779_v14  ;;  %3720 = vmatprep.subr.mxu0 %v6195_v0 }
  0x36   :  { %3751 = vmatprep.subr.mxu1 %v6195_v0  ;;  %3721 = vmatpush3.msra.mxu0 %v4800_v21 }
  0x37   :  { %3752 = vmatpush3.msra.mxu1 %v4789_v17  ;;  %3722 = vmatprep.subr.mxu0 %v6195_v0 }
  0x38   :  { %3753 = vmatprep.subr.mxu1 %v6195_v0  ;;  %3723 = vmatpush3.msra.mxu0 %v4808_v23 }
  0x39   :  { %3754 = vmatpush3.msra.mxu1 %v4797_v19  ;;  %3724 = vmatprep.subr.mxu0 %v6195_v0 }
  0x3a   :  { %3755 = vmatprep.subr.mxu1 %v6195_v0  ;;  %3725 = vmatpush3.msra.mxu0 %v4817_v26 }
  0x3b   :  { %3756 = vmatpush3.msra.mxu1 %v4805_v22  ;;  %3726 = vmatprep.subr.mxu0 %v6195_v0 }
  0x3c   :  { %3757 = vmatprep.subr.mxu1 %v6195_v0  ;;  %3727 = vmatpush3.msra.mxu0 %v4825_v28 }
  0x3d   :  { %3758 = vmatpush3.msra.mxu1 %v4813_v24  ;;  %3728 = vmatprep.subr.mxu0 %v6195_v0 }
  0x3e   :  { %3759 = vmatprep.subr.mxu1 %v6195_v0  ;;  %3729 = vmatpush3.msra.mxu0 %v4832_v30 }
  0x3f   :  { %3760 = vmatpush3.msra.mxu1 %v4822_v27  ;;  %4289 = vset.pattern.permute.xlu0 %v6188_v1 }
  0x40   :  { %3762 = vmatmul.mubr.msk.f32.vlgmr.msra.gmra.mxu1 %vm115_vm4, %v237_v29  ;;  %3730 = vmatprep.subr.mxu0 %v6195_v0 }
  0x41   :  { %3783 = vmatprep.subr.mxu1 %v6195_v0  ;;  %3731 = vmatpush3.msra.mxu0 %v4838_v31 }
  0x42   :  { %3784 = vmatpush3.msra.mxu1 %v4753_v7  ;;  %3732 = vmatprep.subr.mxu0 %v6195_v0 }
  0x43   :  { %3785 = vmatprep.subr.mxu1 %v6195_v0  ;;  %3733 = vmatpush3.msra.mxu0 %v4843_v32 }
  0x44   :  { %3786 = vmatpush3.msra.mxu1 %v4761_v10  ;;  %3807 = vmatprep.mubr.msk.f32.mxu1 %vm4655_vm0, %v6195_v0 }
  0x45   :  { %3787 = vmatprep.subr.mxu1 %v6195_v0  ;;  %3764 = vmatprep.subr.mxu0 %v6195_v0 }
  0x46   :  { %3788 = vmatpush3.msra.mxu1 %v4774_v13  ;;  %355 = vrot.lane.b32.xlu0 %v354_v40, %s4657_s27 }
  0x47   :  { %3789 = vmatprep.subr.mxu1 %v6195_v0 }
  0x48   :  { %3790 = vmatpush3.msra.mxu1 %v4782_v15 }
  0x49   :  { %3791 = vmatprep.subr.mxu1 %v6195_v0 }
  0x4a   :  { %3792 = vmatpush3.msra.mxu1 %v4792_v18 }
  0x4b   :  { %3793 = vmatprep.subr.mxu1 %v6195_v0 }
  0x4c   :  { %3794 = vmatpush3.msra.mxu1 %v4800_v21 }
  0x4d   :  { %3795 = vmatprep.subr.mxu1 %v6195_v0 }
  0x4e   :  { %3796 = vmatpush3.msra.mxu1 %v4808_v23 }
  0x4f   :  { %3797 = vmatprep.subr.mxu1 %v6195_v0 }
  0x50   :  { %3798 = vmatpush3.msra.mxu1 %v4817_v26 }
  0x51   :  { %3799 = vmatprep.subr.mxu1 %v6195_v0 }
  0x52   :  { %3800 = vmatpush3.msra.mxu1 %v4825_v28 }
  0x53   :  { %3801 = vmatprep.subr.mxu1 %v6195_v0 }
  0x54   :  { %3802 = vmatpush3.msra.mxu1 %v4832_v30 }
  0x55   :  { %3803 = vmatprep.subr.mxu1 %v6195_v0 }
  0x56   :  { %3804 = vmatpush3.msra.mxu1 %v4838_v31 }
  0x57   :  { %3805 = vmatprep.subr.mxu1 %v6195_v0 }
  0x58   :  { %3806 = vmatpush3.msra.mxu1 %v4843_v32 }
  0x59   :  { %3837 = vmatprep.subr.mxu1 %v6195_v0 }
  0xa4   :  { %v4876_v33 = vpop.permute.xlu0 %82 }
  0xa5   :  { %v85_v35 = vmul.f32 0.0, %v4876_v33 }
  0xa9   :  { %v4878_v34 = vpop.permute.xlu0 %88 }
  0xaa   :  { %v91_v36 = vmul.f32 0.0, %v4878_v34 }
  0xac   :  { %v92_v37 = vadd.f32 %v91_v36, %v85_v35 }
  0xae   :  { %v94_v38 = vsel %vm93_vm1, %v4771_v12, %v92_v37 }
  0xaf   :  { %v96_v39 = vsel %vm95_vm3, %v94_v38, 0.0  ;;  %v4918_v38 = vld [vmem:[%s6177_s1 + $0x2] sm:$0x3] }
  0xb0   :  { %3735 = vmatmul.mubr.msk.f32.vlgmr.msra.gmra.mxu0 %vm115_vm4, %v96_v39 }
  0xb1   :  { %3780 = vmatprep.mubr.msk.f32.mxu0 %vm4655_vm0, %v6195_v0 }
  0xb8   :  { %v356_v48 = vpop.permute.xlu0 %355 }
  0xb9   :  { %v358_v49 = vsel %vm235_vm2, %v4740_v3, %v356_v48 }
  0xba   :  { %v359_v51 = vsub.f32 1.0, %v358_v49 }
  0xbc   :  { %362 = vperm.xlu0 %4289, %v359_v51  }
  0xc0   :  { %4291 = vset.pattern.permute.xlu0 %v6190_v8 }
 0x100   :  { %v325_v42 = vpop.f32.mrf.mxu1 }
 0x101   :  { %v326_v43 = vadd.f32 %v4893_v41, %v325_v42 }
 0x102   :  { %v3763_v44 = vpop.f32.mrf.mxu1 }
 0x103   :  { %336 = vrot.lane.b32.xlu1 %v326_v43, %s4658_s30  ;;  %v3385_v45 = vmul.f32 -1.442695, %v326_v43 }
 0x105   :  { %4335 = vpow2.f32 %v3385_v45 }
 0x112   :  { %v4336_v46 = vpop.eup %4335 }
 0x113   :  { %v332_v47 = vadd.f32 1.0, %v4336_v46 }
 0x115   :  { %4337 = vrcp.f32 %v332_v47 }
 0x122   :  { %v4338_v55 = vpop.eup %4337 }
 0x123   :  { %v346_v37 = vsub.f32 1.0, %v4338_v55  ;;  %v352_v40 = vmul.f32 0.0, %v4338_v55 }
 0x170   :  { %v185_v52 = vpop.f32.mrf.mxu0 }
 0x171   :  { %v186_v53 = vadd.f32 %v4902_v50, %v185_v52 }
 0x172   :  { %v3736_v54 = vpop.f32.mrf.mxu0 }
 0x173   :  { %196 = vrot.lane.b32.xlu1 %v186_v53, %s4658_s30  ;;  %v3381_v58 = vmul.f32 -1.442695, %v186_v53 }
 0x175   :  { %v337_v56 = vpop.permute.xlu1 %336  ;;  %4339 = vpow2.f32 %v3381_v58  ;;  %v4938_v58 = vld [vmem:[#allocation7 + $0x30] sm:$0xff] }
 0x176   :  { %v339_v57 = vmul.f32 %v4338_v55, %v337_v56 }
 0x178   :  { %341 = vrot.lane.b32.xlu1 %v339_v57, %s4659_s12  ;;  %v4936_v57 = vld [vmem:[#allocation7 + $0x38] sm:$0xff] }
 0x179   :  { %3765 = vmatpush3.msra.mxu0 %v4936_v57 }
 0x17a   :  { %3766 = vmatprep.subr.mxu0 %v6195_v0 }
 0x17b   :  { %3767 = vmatpush3.msra.mxu0 %v4938_v58 }
 0x17c   :  { %3768 = vmatprep.subr.mxu0 %v6195_v0 }
 0x182   :  { %v4340_v59 = vpop.eup %4339 }
 0x183   :  { %v192_v60 = vadd.f32 1.0, %v4340_v59 }
 0x185   :  { %4341 = vrcp.f32 %v192_v60  ;;  %v4942_v60 = vld [vmem:[#allocation7 + $0x28] sm:$0xff] }
 0x186   :  { %3769 = vmatpush3.msra.mxu0 %v4942_v60 }
 0x187   :  { %3770 = vmatprep.subr.mxu0 %v6195_v0 }
 0x192   :  { %v4342_v61 = vpop.eup %4341 }
 0x193   :  { %v212_v52 = vmul.f32 0.0, %v4342_v61 }
 0x1e5   :  { %v197_v62 = vpop.permute.xlu1 %196 }
 0x1e6   :  { %v199_v63 = vmul.f32 %v4342_v61, %v197_v62 }
 0x1e8   :  { %201 = vrot.lane.b32.xlu1 %v199_v63, %s4659_s12  ;;  %v4949_v63 = vld [vmem:[#allocation7 + $0x20] sm:$0xff] }
 0x1e9   :  { %3771 = vmatpush3.msra.mxu0 %v4949_v63 }
 0x1ea   :  { %v342_v3 = vpop.permute.xlu1 %341  ;;  %3772 = vmatprep.subr.mxu0 %v6195_v0 }
 0x1eb   :  { %v344_v12 = vadd.f32 %v342_v3, %v326_v43  ;;  %v363_v43 = vpop.permute.xlu0 %362  ;;  %v4954_v3 = vld [vmem:[#allocation7 + $0x18] sm:$0xff] }
 0x1ec   :  { %368 = vperm.xlu1 %4290, %v358_v49   ;;  %v365_v45 = vmul.f32 0.0, %v363_v43  ;;  %v206_v49 = vsub.f32 1.0, %v4342_v61  ;;  %3773 = vmatpush3.msra.mxu0 %v4954_v3 }
 0x1ed   :  { %4343 = vtanh.f32 %v344_v12  ;;  %3774 = vmatprep.subr.mxu0 %v6195_v0 }
 0x1fa   :  { %v4344_v16 = vpop.eup %4343 }
 0x1fb   :  { %348 = vrot.lane.b32.xlu1 %v4344_v16, %s4660_s13  ;;  %v4964_v16 = vld [vmem:[#allocation7 + $0x8] sm:$0xff] }
 0x1ff   :  { %219 = vrot.lane.b32.xlu1 %v3382_v20, %s4658_s30  ;;  %v4970_v20 = vld [vmem:[#allocation7] sm:$0xff] }
 0x25a   :  { %v202_v25 = vpop.permute.xlu1 %201 }
 0x25b   :  { %v204_v29 = vadd.f32 %v202_v25, %v186_v53 }
 0x25d   :  { %4345 = vtanh.f32 %v204_v29 }
 0x267   :  { %v369_v35 = vpop.permute.xlu1 %368 }
 0x26a   :  { %v4346_v36 = vpop.eup %4345 }
 0x26b   :  { %208 = vrot.lane.b32.xlu0 %v4346_v36, %s4660_s13 }
 0x26d   :  { %v349_v39 = vpop.permute.xlu1 %348 }
 0x26e   :  { %v351_v42 = vmul.f32 %v349_v39, %v346_v37 }
 0x26f   :  { %522 = vperm.xlu0 %4291, %v4918_v38  }
 0x270   :  { %v353_v44 = vadd.f32 %v352_v40, %v351_v42  ;;  %v4985_v42 = vld [vmem:[%s6176_s0 + $0x2] sm:$0x3] }
 0x271   :  { %v4927_v54 = vpop.permute.xlu1 %219 }
 0x272   :  { %v371_v46 = vmul.f32 %v369_v35, %v353_v44 }
 0x273   :  { %4292 = vset.pattern.permute.xlu0 %v6188_v1 }
 0x274   :  { %v4922_v47 = vadd.f32 %v371_v46, %v365_v45  ;;  %516 = vperm.xlu0 %4292, %v4918_v38  }
 0x276   :  { %v376_v48 = vrot.slane %v4922_v47, 2  ;;  %v373_v35 = vmul.f32 %v4922_v47, %v4876_v33 }
 0x278   :  { %377 = vrot.lane.b32.xlu1 %v376_v48, %s4660_s13 }
 0x2dd   :  { %v209_v51 = vpop.permute.xlu0 %208 }
 0x2de   :  { %v211_v53 = vmul.f32 %v209_v51, %v206_v49 }
 0x2e0   :  { %v4929_v55 = vadd.f32 %v212_v52, %v211_v53 }
 0x2e2   :  { %532 = vrot.lane.b32.xlu0 %v4929_v55, %s4658_s30  ;;  %v222_v56 = vmul.f32 %v4927_v54, %v4929_v55 }
 0x2e4   :  { %224 = vrot.lane.b32.xlu1 %v222_v56, %s4660_s13 }
 0x2ea   :  { %v378_v59 = vpop.permute.xlu1 %377  ;;  %v4946_v62 = vpop.permute.xlu0 %522 }
 0x2eb   :  { %v380_v61 = vmul.f32 %v378_v59, %v4878_v34  ;;  %v525_v12 = vmul.f32 %v4946_v62, %v378_v59  ;;  %v4959_v34 = vld [vmem:[#allocation7 + $0x10] sm:$0xff] }
 0x2ec   :  { %3775 = vmatpush3.msra.mxu0 %v4959_v34 }
 0x2ed   :  { %382 = vrot.lane.b32.xlu1 %v380_v61, %s4658_s30  ;;  %3776 = vmatprep.subr.mxu0 %v6195_v0 }
 0x2ee   :  { %3777 = vmatpush3.msra.mxu0 %v4964_v16 }
 0x2ef   :  { %3778 = vmatprep.subr.mxu0 %v6195_v0  ;;  %v4977_v36 = vpop.permute.xlu0 %516 }
 0x2f0   :  { %3779 = vmatpush3.msra.mxu0 %v4970_v20  ;;  %v519_v40 = vmul.f32 %v4977_v36, %v4922_v47 }
 0x2f1   :  { %527 = vrot.lane.b32.xlu1 %v525_v12, %s4658_s30  ;;  %3810 = vmatprep.subr.mxu0 %v6195_v0 }
 0x354   :  { %v533_v45 = vpop.permute.xlu0 %532 }
 0x356   :  { %v225_v25 = vpop.permute.xlu1 %224 }
 0x357   :  { %v228_v29 = vsel %vm227_vm5, %v225_v25, 0.0 }
 0x358   :  { %229 = vadd.xlane.f32.xlu1 %v228_v29 }
 0x35f   :  { %v383_v37 = vpop.permute.xlu1 %382 }
 0x360   :  { %v385_v39 = vadd.f32 %v383_v37, %v373_v35 }
 0x362   :  { %387 = vrot.lane.b32.xlu0 %v385_v39, %s4660_s13 }
 0x363   :  { %v528_v43 = vpop.permute.xlu1 %527 }
 0x364   :  { %v530_v44 = vadd.f32 %v528_v43, %v519_v40 }
 0x366   :  { %v535_v33 = vsel %vm93_vm1, %v4985_v42, %v530_v44  ;;  %658 = vrot.lane.b32.xlu0 %v4922_v47, %s4658_s30 }
 0x367   :  { %v536_v46 = vsel %vm95_vm3, %v535_v33, %v533_v45 }
 0x368   :  { %3808 = vmatmul.mubr.msk.f32.vlgmr.msra.gmra.mxu1 %vm115_vm4, %v536_v46 }
 0x369   :  { %3838 = vmatpush3.msra.mxu1 %v4936_v57  ;;  %3853 = vmatprep.mubr.msk.f32.mxu1 %vm4655_vm0, %v6195_v0 }
 0x36a   :  { %3839 = vmatprep.subr.mxu1 %v6195_v0 }
 0x36b   :  { %3840 = vmatpush3.msra.mxu1 %v4938_v58 }
 0x36c   :  { %3841 = vmatprep.subr.mxu1 %v6195_v0 }
 0x36d   :  { %3842 = vmatpush3.msra.mxu1 %v4942_v60 }
 0x36e   :  { %3843 = vmatprep.subr.mxu1 %v6195_v0 }
 0x36f   :  { %3844 = vmatpush3.msra.mxu1 %v4949_v63 }
 0x370   :  { %3845 = vmatprep.subr.mxu1 %v6195_v0 }
 0x371   :  { %3846 = vmatpush3.msra.mxu1 %v4954_v3 }
 0x372   :  { %3847 = vmatprep.subr.mxu1 %v6195_v0 }
 0x373   :  { %3848 = vmatpush3.msra.mxu1 %v4959_v34 }
 0x374   :  { %3849 = vmatprep.subr.mxu1 %v6195_v0 }
 0x375   :  { %3850 = vmatpush3.msra.mxu1 %v4964_v16 }
 0x376   :  { %3851 = vmatprep.subr.mxu1 %v6195_v0 }
 0x377   :  { %3852 = vmatpush3.msra.mxu1 %v4970_v20 }
 0x378   :  { %3883 = vmatprep.subr.mxu1 %v6195_v0 }
 0x3d4   :  { %v388_v48 = vpop.permute.xlu0 %387 }
 0x3d5   :  { %v390_v49 = vsel %vm93_vm1, %v388_v48, 0.0 }
 0x3d6   :  { %3781 = vmatmul.mubr.msk.f32.vlgmr.msra.gmra.mxu0 %vm95_vm3, %v390_v49 }
 0x3d7   :  { %3811 = vmatpush3.msra.mxu0 %v4735_v2  ;;  %3834 = vmatprep.mubr.msk.f32.mxu0 %vm4655_vm0, %v6195_v0 }
 0x3d8   :  { %3812 = vmatprep.subr.mxu0 %v6195_v0  ;;  %v659_v35 = vpop.permute.xlu0 %658 }
 0x3d9   :  { %3813 = vmatpush3.msra.mxu0 %v4742_v4 }
 0x3da   :  { %3814 = vmatprep.subr.mxu0 %v6195_v0 }
 0x3db   :  { %3815 = vmatpush3.msra.mxu0 %v4747_v5 }
 0x3dc   :  { %3816 = vmatprep.subr.mxu0 %v6195_v0 }
 0x3dd   :  { %3817 = vmatpush3.msra.mxu0 %v4751_v6 }
 0x3de   :  { %3818 = vmatprep.subr.mxu0 %v6195_v0 }
 0x3df   :  { %3819 = vmatpush3.msra.mxu0 %v4759_v9 }
 0x3e0   :  { %3820 = vmatprep.subr.mxu0 %v6195_v0 }
 0x3e1   :  { %v5025_v51 = vpop.xlane.xlu1 %229  ;;  %3821 = vmatpush3.msra.mxu0 %v4766_v11 }
 0x3e2   :  { %v635_v52 = vsub.f32 %v5025_v51, %v5025_v51  ;;  %3822 = vmatprep.subr.mxu0 %v6195_v0 }
 0x3e3   :  { %3823 = vmatpush3.msra.mxu0 %v4779_v14 }
 0x3e4   :  { %v636_v53 = vmul.f32 1.442695, %v635_v52  ;;  %3824 = vmatprep.subr.mxu0 %v6195_v0 }
 0x3e5   :  { %3825 = vmatpush3.msra.mxu0 %v4789_v17 }
 0x3e6   :  { %4347 = vpow2.f32 %v636_v53  ;;  %3826 = vmatprep.subr.mxu0 %v6195_v0 }
 0x3e7   :  { %3827 = vmatpush3.msra.mxu0 %v4797_v19 }
 0x3e8   :  { %3828 = vmatprep.subr.mxu0 %v6195_v0 }
 0x3e9   :  { %3829 = vmatpush3.msra.mxu0 %v4805_v22 }
 0x3ea   :  { %3830 = vmatprep.subr.mxu0 %v6195_v0 }
 0x3eb   :  { %3831 = vmatpush3.msra.mxu0 %v4813_v24 }
 0x3ec   :  { %3832 = vmatprep.subr.mxu0 %v6195_v0 }
 0x3ed   :  { %3833 = vmatpush3.msra.mxu0 %v4822_v27 }
 0x3ee   :  { %3856 = vmatprep.subr.mxu0 %v6195_v0 }
 0x3f3   :  { %v4348_v56 = vpop.eup %4347 }
 0x3f4   :  { %4349 = vrcp.f32 %v4348_v56 }
 0x401   :  { %v4350_v59 = vpop.eup %4349 }
 0x402   :  { %v5043_v61 = vmul.f32 %v4350_v59, %v4348_v56 }
 0x404   :  { %6203 = vst [vmem:[#allocation12_spill] sm:$0xff] %v5043_v61  ;;  %v641_v12 = vmul.f32 %v5043_v61, %v4929_v55 }
 0x406   :  { %v653_v25 = vsel %vm93_vm1, %v4985_v42, %v641_v12 }
 0x407   :  { %v655_v29 = vrot.slane %v653_v25, 6 }
 0x409   :  { %v657_v37 = vsel %vm235_vm2, %v653_v25, %v655_v29 }
 0x40a   :  { %v661_v39 = vsel %vm95_vm3, %v657_v37, %v659_v35 }
 0x40b   :  { %3835 = vmatmul.mubr.msk.f32.vlgmr.msra.gmra.mxu0 %vm115_vm4, %v661_v39 }
 0x40c   :  { %3857 = vmatpush3.msra.mxu0 %v4753_v7  ;;  %3880 = vmatprep.mubr.msk.f32.mxu0 %vm4655_vm0, %v6195_v0 }
 0x40d   :  { %3858 = vmatprep.subr.mxu0 %v6195_v0 }
 0x40e   :  { %3859 = vmatpush3.msra.mxu0 %v4761_v10 }
 0x40f   :  { %3860 = vmatprep.subr.mxu0 %v6195_v0 }
 0x410   :  { %3861 = vmatpush3.msra.mxu0 %v4774_v13 }
 0x411   :  { %3862 = vmatprep.subr.mxu0 %v6195_v0 }
 0x412   :  { %3863 = vmatpush3.msra.mxu0 %v4782_v15 }
 0x413   :  { %3864 = vmatprep.subr.mxu0 %v6195_v0 }
 0x414   :  { %3865 = vmatpush3.msra.mxu0 %v4792_v18 }
 0x415   :  { %3866 = vmatprep.subr.mxu0 %v6195_v0 }
 0x416   :  { %3867 = vmatpush3.msra.mxu0 %v4800_v21 }
 0x417   :  { %3868 = vmatprep.subr.mxu0 %v6195_v0 }
 0x418   :  { %3869 = vmatpush3.msra.mxu0 %v4808_v23 }
 0x419   :  { %3870 = vmatprep.subr.mxu0 %v6195_v0 }
 0x41a   :  { %3871 = vmatpush3.msra.mxu0 %v4817_v26 }
 0x41b   :  { %3872 = vmatprep.subr.mxu0 %v6195_v0 }
 0x41c   :  { %3873 = vmatpush3.msra.mxu0 %v4825_v28 }
 0x41d   :  { %3874 = vmatprep.subr.mxu0 %v6195_v0 }
 0x41e   :  { %3875 = vmatpush3.msra.mxu0 %v4832_v30 }
 0x41f   :  { %3876 = vmatprep.subr.mxu0 %v6195_v0 }
 0x420   :  { %3877 = vmatpush3.msra.mxu0 %v4838_v31 }
 0x421   :  { %3878 = vmatprep.subr.mxu0 %v6195_v0 }
 0x422   :  { %3879 = vmatpush3.msra.mxu0 %v4843_v32 }
 0x423   :  { %3910 = vmatprep.subr.mxu0 %v6195_v0 }
 0x428   :  { %v606_v7 = vpop.f32.mrf.mxu1 }
 0x429   :  { %v607_v10 = vadd.f32 %v4902_v50, %v606_v7 }
 0x42a   :  { %v3809_v13 = vpop.f32.mrf.mxu1 }
 0x42b   :  { %617 = vrot.lane.b32.xlu0 %v607_v10, %s4658_s30  ;;  %v3392_v40 = vmul.f32 -1.442695, %v607_v10  ;;  %v760_v13 = vrot.slane %v4918_v38, 6 }
 0x42d   :  { %4351 = vpow2.f32 %v3392_v40 }
 0x43a   :  { %v4352_v42 = vpop.eup %4351 }
 0x43b   :  { %v613_v43 = vadd.f32 1.0, %v4352_v42 }
 0x43d   :  { %4353 = vrcp.f32 %v613_v43 }
 0x44a   :  { %v4354_v33 = vpop.eup %4353 }
 0x44b   :  { %v627_v40 = vsub.f32 1.0, %v4354_v33  ;;  %v633_v42 = vmul.f32 %v4354_v33, %v4929_v55 }
 0x496   :  { %v474_v44 = vpop.f32.mrf.mxu0 }
 0x498   :  { %v3782_v45 = vpop.f32.mrf.mxu0 }
 0x49d   :  { %v618_v46 = vpop.permute.xlu0 %617 }
 0x49e   :  { %v620_v48 = vmul.f32 %v4354_v33, %v618_v46  ;;  %v5098_v33 = vld [vmem:[%s6177_s1 + $0x4] sm:$0x3] }
 0x4a0   :  { %622 = vrot.lane.b32.xlu0 %v620_v48, %s4659_s12 }
 0x4cb   :  { %v731_v49 = vpop.f32.mrf.mxu0 }
 0x4cc   :  { %v732_v52 = vadd.f32 %v4893_v41, %v731_v49 }
 0x4cd   :  { %v3836_v53 = vpop.f32.mrf.mxu0 }
 0x4ce   :  { %742 = vrot.lane.b32.xlu0 %v732_v52, %s4658_s30  ;;  %v3394_v12 = vmul.f32 -1.442695, %v732_v52 }
 0x512   :  { %v623_v56 = vpop.permute.xlu0 %622 }
 0x513   :  { %v625_v59 = vadd.f32 %v623_v56, %v607_v10 }
 0x515   :  { %4355 = vtanh.f32 %v625_v59 }
 0x516   :  { %4357 = vpow2.f32 %v3394_v12 }
 0x522   :  { %v4356_v25 = vpop.eup %4355 }
 0x523   :  { %629 = vrot.lane.b32.xlu0 %v4356_v25, %s4660_s13  ;;  %v4358_v29 = vpop.eup %4357  ;;  %v5109_v25 = vld [vmem:[%s6183_s7] ss:$0 sm:$0xff] }
 0x524   :  { %v738_v35 = vadd.f32 1.0, %v4358_v29  ;;  %v475_v29 = vadd.f32 %v5109_v25, %v474_v44 }
 0x526   :  { %4359 = vrcp.f32 %v738_v35  ;;  %v3388_v44 = vmul.f32 -1.442695, %v475_v29 }
 0x533   :  { %v4360_v37 = vpop.eup %4359 }
 0x540   :  { %v743_v39 = vpop.permute.xlu0 %742 }
 0x541   :  { %v745_v7 = vmul.f32 %v4360_v37, %v743_v39  ;;  %v752_v39 = vsub.f32 1.0, %v4360_v37 }
 0x543   :  { %747 = vrot.lane.b32.xlu0 %v745_v7, %s4659_s12 }
 0x547   :  { %761 = vrot.lane.b32.xlu0 %v760_v13, %s4657_s27  ;;  %v758_v13 = vmul.f32 %v4360_v37, %v4922_v47 }
 0x595   :  { %v630_v10 = vpop.permute.xlu0 %629 }
 0x596   :  { %v632_v43 = vmul.f32 %v630_v10, %v627_v40 }
 0x598   :  { %v5088_v45 = vadd.f32 %v633_v42, %v632_v43 }
 0x59a   :  { %v645_v46 = vmul.f32 %v5088_v45, %v4927_v54 }
 0x59c   :  { %647 = vrot.lane.b32.xlu0 %v645_v46, %s4660_s13 }
 0x5b5   :  { %v748_v48 = vpop.permute.xlu0 %747 }
 0x5b6   :  { %v750_v49 = vadd.f32 %v748_v48, %v732_v52 }
 0x5b8   :  { %4361 = vtanh.f32 %v750_v49 }
 0x5b9   :  { %v762_v53 = vpop.permute.xlu0 %761  ;;  %4363 = vpow2.f32 %v3388_v44 }
 0x5ba   :  { %v764_v56 = vsel %vm235_vm2, %v4918_v38, %v762_v53 }
 0x5bb   :  { %774 = vperm.xlu0 %4292, %v764_v56   ;;  %v765_v59 = vsub.f32 1.0, %v764_v56 }
 0x5bd   :  { %768 = vperm.xlu1 %4290, %v765_v59  }
 0x5c1   :  { %4293 = vset.pattern.permute.xlu1 %v6190_v8 }
 0x5c2   :  { %917 = vperm.xlu1 %4293, %v5098_v33  }
 0x5c5   :  { %v4362_v12 = vpop.eup %4361 }
 0x5c6   :  { %754 = vrot.lane.b32.xlu0 %v4362_v12, %s4660_s13  ;;  %4294 = vset.pattern.permute.xlu1 %v6188_v1  ;;  %v4364_v53 = vpop.eup %4363 }
 0x5c7   :  { %v481_v56 = vadd.f32 1.0, %v4364_v53  ;;  %v5142_v53 = vld [vmem:[%s6176_s0 + $0x4] sm:$0x3] }
 0x5c9   :  { %4365 = vrcp.f32 %v481_v56 }
 0x60e   :  { %v648_v52 = vpop.permute.xlu0 %647 }
 0x60f   :  { %v650_v38 = vsel %vm227_vm5, %v648_v52, 0.0 }
 0x610   :  { %651 = vadd.xlane.f32.xlu0 %v650_v38  ;;  %v4366_v38 = vpop.eup %4365 }
 0x626   :  { %911 = vperm.xlu0 %4292, %v5098_v33  }
 0x62a   :  { %927 = vrot.lane.b32.xlu0 %v5088_v45, %s4658_s30 }
 0x62e   :  { %485 = vrot.lane.b32.xlu0 %v475_v29, %s4658_s30 }
 0x636   :  { %v775_v35 = vpop.permute.xlu0 %774 }
 0x638   :  { %v769_v10 = vpop.permute.xlu1 %768 }
 0x639   :  { %v771_v43 = vmul.f32 %v769_v10, %v4922_v47 }
 0x63a   :  { %v755_v7 = vpop.permute.xlu0 %754 }
 0x63b   :  { %v757_v40 = vmul.f32 %v755_v7, %v752_v39 }
 0x63d   :  { %v759_v42 = vadd.f32 %v758_v13, %v757_v40  ;;  %v5130_v7 = vpop.permute.xlu1 %917 }
 0x63f   :  { %v777_v46 = vmul.f32 %v775_v35, %v759_v42 }
 0x641   :  { %v5117_v48 = vadd.f32 %v777_v46, %v771_v43 }
 0x643   :  { %v782_v49 = vrot.slane %v5117_v48, 2 }
 0x645   :  { %783 = vrot.lane.b32.xlu1 %v782_v49, %s4660_s13 }
 0x699   :  { %v652_v59 = vpop.xlane.xlu0 %651 }
 0x69a   :  { %v5123_v37 = vsel %vm643_vm7, %v5025_v51, %v652_v59 }
 0x69b   :  { %v1032_v47 = vsel %vm1031_vm6, %v5123_v37, -inf }
 0x69c   :  { %1033 = vmax.xlane.f32.xlu1 %v1032_v47  ;;  %v779_v47 = vmul.f32 %v5117_v48, %v4977_v36 }
 0x6a1   :  { %v5127_v12 = vpop.permute.xlu0 %911 }
 0x6a2   :  { %v914_v44 = vmul.f32 %v5127_v12, %v5117_v48 }
 0x6a5   :  { %v928_v52 = vpop.permute.xlu0 %927 }
 0x6a9   :  { %v486_v35 = vpop.permute.xlu0 %485 }
 0x6aa   :  { %v488_v39 = vmul.f32 %v4366_v38, %v486_v35 }
 0x6ac   :  { %490 = vrot.lane.b32.xlu0 %v488_v39, %s4659_s12 }
 0x6b7   :  { %v784_v13 = vpop.permute.xlu1 %783 }
 0x6b8   :  { %v920_v40 = vmul.f32 %v5130_v7, %v784_v13  ;;  %v786_v51 = vmul.f32 %v784_v13, %v4946_v62 }
 0x6ba   :  { %922 = vrot.lane.b32.xlu1 %v920_v40, %s4658_s30  ;;  %v495_v40 = vsub.f32 1.0, %v4366_v38 }
 0x6be   :  { %788 = vrot.lane.b32.xlu1 %v786_v51, %s4658_s30 }
 0x71e   :  { %v491_v10 = vpop.permute.xlu0 %490 }
 0x71f   :  { %v493_v42 = vadd.f32 %v491_v10, %v475_v29  ;;  %v501_v10 = vmul.f32 0.0, %v4366_v38 }
 0x721   :  { %4367 = vtanh.f32 %v493_v42 }
 0x725   :  { %v1034_v43 = vpop.xlane.xlu1 %1033 }
 0x726   :  { %v1035_v46 = vsub.f32 %v5123_v37, %v1034_v43 }
 0x728   :  { %v1036_v49 = vmul.f32 1.442695, %v1035_v46 }
 0x72a   :  { %4369 = vpow2.f32 %v1036_v49 }
 0x72c   :  { %v923_v56 = vpop.permute.xlu1 %922 }
 0x72d   :  { %v925_v62 = vadd.f32 %v923_v56, %v914_v44 }
 0x72e   :  { %v4368_v59 = vpop.eup %4367 }
 0x72f   :  { %v930_v29 = vsel %vm93_vm1, %v5142_v53, %v925_v62  ;;  %497 = vrot.lane.b32.xlu1 %v4368_v59, %s4660_s13 }
 0x730   :  { %v789_v35 = vpop.permute.xlu1 %788  ;;  %v931_v39 = vsel %vm95_vm3, %v930_v29, %v928_v52 }
 0x731   :  { %v791_v13 = vadd.f32 %v789_v35, %v779_v47  ;;  %3881 = vmatmul.mubr.msk.f32.vlgmr.msra.gmra.mxu0 %vm115_vm4, %v931_v39  ;;  %v5219_v47 = vld [vmem:[#allocation2 + $0x58] sm:$0xff]  ;;  %v5225_v35 = vld [vmem:[#allocation2 + $0x50] sm:$0xff] }
 0x732   :  { %3911 = vmatpush3.msra.mxu0 %v4936_v57  ;;  %3926 = vmatprep.mubr.msk.f32.mxu0 %vm4655_vm0, %v6195_v0 }
 0x733   :  { %793 = vrot.lane.b32.xlu1 %v791_v13, %s4660_s13  ;;  %3912 = vmatprep.subr.mxu0 %v6195_v0 }
 0x734   :  { %3913 = vmatpush3.msra.mxu0 %v4938_v58 }
 0x735   :  { %3914 = vmatprep.subr.mxu0 %v6195_v0 }
 0x736   :  { %3915 = vmatpush3.msra.mxu0 %v4942_v60 }
 0x737   :  { %v4370_v36 = vpop.eup %4369  ;;  %3916 = vmatprep.subr.mxu0 %v6195_v0 }
 0x738   :  { %v1038_v52 = vsel %vm1031_vm6, %v4370_v36, 0.0  ;;  %3917 = vmatpush3.msra.mxu0 %v4949_v63  ;;  %vm3035_vm6 = vcmask 50176  }
 0x739   :  { %1039 = vadd.xlane.f32.xlu0 %v1038_v52  ;;  %3918 = vmatprep.subr.mxu0 %v6195_v0 }
 0x73a   :  { %3919 = vmatpush3.msra.mxu0 %v4954_v3 }
 0x73b   :  { %3920 = vmatprep.subr.mxu0 %v6195_v0 }
 0x73c   :  { %3921 = vmatpush3.msra.mxu0 %v4959_v34 }
 0x73d   :  { %3922 = vmatprep.subr.mxu0 %v6195_v0 }
 0x73e   :  { %3923 = vmatpush3.msra.mxu0 %v4964_v16 }
 0x73f   :  { %3924 = vmatprep.subr.mxu0 %v6195_v0 }
 0x740   :  { %3925 = vmatpush3.msra.mxu0 %v4970_v20 }
 0x741   :  { %3956 = vmatprep.subr.mxu0 %v6195_v0 }
 0x7a1   :  { %v498_v51 = vpop.permute.xlu1 %497 }
 0x7a2   :  { %v500_v42 = vmul.f32 %v498_v51, %v495_v40 }
 0x7a4   :  { %v5171_v43 = vadd.f32 %v501_v10, %v500_v42 }
 0x7a5   :  { %v794_v46 = vpop.permute.xlu1 %793 }
 0x7a6   :  { %6204 = vst [vmem:[#allocation13_spill] sm:$0xff] %v5171_v43  ;;  %v796_v49 = vsel %vm93_vm1, %v794_v46, %v5171_v43 }
 0x7a7   :  { %3854 = vmatmul.mubr.msk.f32.vlgmr.msra.gmra.mxu1 %vm95_vm3, %v796_v49 }
 0x7a8   :  { %3884 = vmatpush3.msra.mxu1 %v4735_v2  ;;  %3907 = vmatprep.mubr.msk.f32.mxu1 %vm4655_vm0, %v6195_v0 }
 0x7a9   :  { %3885 = vmatprep.subr.mxu1 %v6195_v0 }
 0x7aa   :  { %3886 = vmatpush3.msra.mxu1 %v4742_v4 }
 0x7ab   :  { %3887 = vmatprep.subr.mxu1 %v6195_v0 }
 0x7ac   :  { %3888 = vmatpush3.msra.mxu1 %v4747_v5 }
 0x7ad   :  { %3889 = vmatprep.subr.mxu1 %v6195_v0 }
 0x7ae   :  { %3890 = vmatpush3.msra.mxu1 %v4751_v6 }
 0x7af   :  { %3891 = vmatprep.subr.mxu1 %v6195_v0 }
 0x7b0   :  { %3892 = vmatpush3.msra.mxu1 %v4759_v9 }
 0x7b1   :  { %3893 = vmatprep.subr.mxu1 %v6195_v0 }
 0x7b2   :  { %3894 = vmatpush3.msra.mxu1 %v4766_v11 }
 0x7b3   :  { %3895 = vmatprep.subr.mxu1 %v6195_v0 }
 0x7b4   :  { %3896 = vmatpush3.msra.mxu1 %v4779_v14 }
 0x7b5   :  { %3897 = vmatprep.subr.mxu1 %v6195_v0 }
 0x7b6   :  { %3898 = vmatpush3.msra.mxu1 %v4789_v17 }
 0x7b7   :  { %3899 = vmatprep.subr.mxu1 %v6195_v0 }
 0x7b8   :  { %3900 = vmatpush3.msra.mxu1 %v4797_v19 }
 0x7b9   :  { %3901 = vmatprep.subr.mxu1 %v6195_v0 }
 0x7ba   :  { %3902 = vmatpush3.msra.mxu1 %v4805_v22 }
 0x7bb   :  { %3903 = vmatprep.subr.mxu1 %v6195_v0 }
 0x7bc   :  { %3904 = vmatpush3.msra.mxu1 %v4813_v24 }
 0x7bd   :  { %3905 = vmatprep.subr.mxu1 %v6195_v0 }
 0x7be   :  { %3906 = vmatpush3.msra.mxu1 %v4822_v27 }
 0x7bf   :  { %3929 = vmatprep.subr.mxu1 %v6195_v0 }
 0x7c2   :  { %v1040_v2 = vpop.xlane.xlu0 %1039 }
 0x7c3   :  { %4371 = vrcp.f32 %v1040_v2 }
 0x7d0   :  { %v4372_v4 = vpop.eup %4371 }
 0x7d1   :  { %v5202_v5 = vmul.f32 %v4372_v4, %v4370_v36 }
 0x7d3   :  { %6205 = vst [vmem:[#allocation14_spill] sm:$0xff] %v5202_v5  ;;  %1045 = vperm.xlu1 %4294, %v5202_v5  }
 0x7d7   :  { %4295 = vset.pattern.permute.xlu1 %v6190_v8 }
 0x7d8   :  { %1051 = vperm.xlu1 %4295, %v5202_v5  }
 0x7dc   :  { %1071 = vrot.lane.b32.xlu1 %v5117_v48, %s4658_s30 }
 0x7dd   :  { %4298 = vset.pattern.permute.xlu1 %v6188_v1 }
 0x7f1   :  { %v1001_v6 = vpop.f32.mrf.mxu0 }
 0x7f2   :  { %v1002_v9 = vadd.f32 %v4902_v50, %v1001_v6 }
 0x7f3   :  { %v3882_v11 = vpop.f32.mrf.mxu0 }
 0x7f4   :  { %1012 = vrot.lane.b32.xlu1 %v1002_v9, %s4658_s30  ;;  %v3400_v14 = vmul.f32 -1.442695, %v1002_v9 }
 0x7f6   :  { %4373 = vpow2.f32 %v3400_v14 }
 0x803   :  { %v4374_v19 = vpop.eup %4373 }
 0x804   :  { %v1008_v38 = vadd.f32 1.0, %v4374_v19 }
 0x806   :  { %4375 = vrcp.f32 %v1008_v38 }
 0x813   :  { %v4376_v39 = vpop.eup %4375 }
 0x814   :  { %v1028_v51 = vmul.f32 %v4376_v39, %v5088_v45 }
 0x84e   :  { %v1046_v17 = vpop.permute.xlu1 %1045 }
 0x84f   :  { %v1048_v24 = vmul.f32 %v1046_v17, %v4929_v55 }
 0x853   :  { %v1052_v22 = vpop.permute.xlu1 %1051 }
 0x854   :  { %v1054_v27 = vmul.f32 %v1052_v22, %v5088_v45 }
 0x856   :  { %v1055_v44 = vadd.f32 %v1054_v27, %v1048_v24 }
 0x857   :  { %v1072_v59 = vpop.permute.xlu1 %1071 }
 0x858   :  { %v1066_v56 = vsel %vm93_vm1, %v5142_v53, %v1055_v44  ;;  %v5229_v53 = vld [vmem:[#allocation2 + $0x48] sm:$0xff] }
 0x859   :  { %v1068_v62 = vrot.slane %v1066_v56, 6 }
 0x85b   :  { %v1070_v50 = vsel %vm235_vm2, %v1066_v56, %v1068_v62 }
 0x85c   :  { %v1074_v29 = vsel %vm95_vm3, %v1070_v50, %v1072_v59 }
 0x85d   :  { %3908 = vmatmul.mubr.msk.f32.vlgmr.msra.gmra.mxu1 %vm115_vm4, %v1074_v29 }
 0x85e   :  { %3930 = vmatpush3.msra.mxu1 %v5219_v47  ;;  %3953 = vmatprep.mubr.msk.f32.mxu1 %vm4655_vm0, %v6195_v0 }
 0x85f   :  { %3931 = vmatprep.subr.mxu1 %v6195_v0 }
 0x860   :  { %3932 = vmatpush3.msra.mxu1 %v5225_v35 }
 0x861   :  { %3933 = vmatprep.subr.mxu1 %v6195_v0 }
 0x862   :  { %3934 = vmatpush3.msra.mxu1 %v5229_v53 }
 0x863   :  { %3935 = vmatprep.subr.mxu1 %v6195_v0 }
 0x864   :  { %3936 = vmatpush3.msra.mxu1 %v4782_v15 }
 0x865   :  { %3937 = vmatprep.subr.mxu1 %v6195_v0 }
 0x866   :  { %v1013_v13 = vpop.permute.xlu1 %1012  ;;  %3938 = vmatpush3.msra.mxu1 %v4792_v18 }
 0x867   :  { %v1015_v36 = vmul.f32 %v4376_v39, %v1013_v13  ;;  %v866_v52 = vpop.f32.mrf.mxu1  ;;  %3939 = vmatprep.subr.mxu1 %v6195_v0 }
 0x868   :  { %3940 = vmatpush3.msra.mxu1 %v4800_v21  ;;  %v867_v17 = vadd.f32 %v5109_v25, %v866_v52 }
 0x869   :  { %v3855_v40 = vpop.f32.mrf.mxu1  ;;  %1017 = vrot.lane.b32.xlu1 %v1015_v36, %s4659_s12  ;;  %3941 = vmatprep.subr.mxu1 %v6195_v0 }
 0x86a   :  { %3942 = vmatpush3.msra.mxu1 %v4808_v23  ;;  %v3396_v59 = vmul.f32 -1.442695, %v867_v17 }
 0x86b   :  { %3943 = vmatprep.subr.mxu1 %v6195_v0 }
 0x86c   :  { %3944 = vmatpush3.msra.mxu1 %v4817_v26 }
 0x86d   :  { %3945 = vmatprep.subr.mxu1 %v6195_v0 }
 0x86e   :  { %3946 = vmatpush3.msra.mxu1 %v4825_v28 }
 0x86f   :  { %3947 = vmatprep.subr.mxu1 %v6195_v0 }
 0x870   :  { %3948 = vmatpush3.msra.mxu1 %v4832_v30  ;;  %v1022_v30 = vsub.f32 1.0, %v4376_v39 }
 0x871   :  { %3949 = vmatprep.subr.mxu1 %v6195_v0 }
 0x872   :  { %3950 = vmatpush3.msra.mxu1 %v4838_v31 }
 0x873   :  { %3951 = vmatprep.subr.mxu1 %v6195_v0 }
 0x874   :  { %3952 = vmatpush3.msra.mxu1 %v4843_v32 }
 0x875   :  { %3983 = vmatprep.subr.mxu1 %v6195_v0 }
 0x8db   :  { %v1018_v15 = vpop.permute.xlu1 %1017 }
 0x8dc   :  { %v1020_v18 = vadd.f32 %v1018_v15, %v1002_v9  ;;  %v1173_v9 = vrot.slane %v5098_v33, 6 }
 0x8de   :  { %4377 = vtanh.f32 %v1020_v18 }
 0x8eb   :  { %v4378_v21 = vpop.eup %4377 }
 0x8ec   :  { %1024 = vrot.lane.b32.xlu0 %v4378_v21, %s4660_s13 }
 0x91d   :  { %v1144_v23 = vpop.f32.mrf.mxu1 }
 0x91e   :  { %v1145_v26 = vadd.f32 %v4893_v41, %v1144_v23 }
 0x91f   :  { %v3909_v28 = vpop.f32.mrf.mxu1 }
 0x920   :  { %1155 = vrot.lane.b32.xlu1 %v1145_v26, %s4658_s30  ;;  %v3402_v46 = vmul.f32 -1.442695, %v1145_v26 }
 0x922   :  { %4379 = vpow2.f32 %v3402_v46 }
 0x92f   :  { %v4380_v49 = vpop.eup %4379 }
 0x930   :  { %v1151_v2 = vadd.f32 1.0, %v4380_v49 }
 0x932   :  { %4381 = vrcp.f32 %v1151_v2 }
 0x93f   :  { %v4382_v41 = vpop.eup %4381 }
 0x940   :  { %v1165_v36 = vsub.f32 1.0, %v4382_v41  ;;  %v1171_v40 = vmul.f32 %v4382_v41, %v5117_v48 }
 0x95e   :  { %v1025_v31 = vpop.permute.xlu0 %1024 }
 0x95f   :  { %v1027_v10 = vmul.f32 %v1025_v31, %v1022_v30 }
 0x961   :  { %v5256_v32 = vadd.f32 %v1028_v51, %v1027_v10 }
 0x963   :  { %v1058_v42 = vmul.f32 %v5256_v32, %v4927_v54 }
 0x965   :  { %1060 = vrot.lane.b32.xlu1 %v1058_v42, %s4660_s13 }
 0x992   :  { %v1156_v4 = vpop.permute.xlu1 %1155 }
 0x993   :  { %v1158_v6 = vmul.f32 %v4382_v41, %v1156_v4 }
 0x995   :  { %1160 = vrot.lane.b32.xlu1 %v1158_v6, %s4659_s12 }
 0x999   :  { %1174 = vrot.lane.b32.xlu1 %v1173_v9, %s4657_s27 }
 0x9d7   :  { %v1061_v11 = vpop.permute.xlu1 %1060 }
 0x9d8   :  { %v1063_v14 = vsel %vm227_vm5, %v1061_v11, 0.0 }
 0x9d9   :  { %1064 = vadd.xlane.f32.xlu1 %v1063_v14 }
 0x9ea   :  { %877 = vrot.lane.b32.xlu1 %v867_v17, %s4658_s30 }
 0xa07   :  { %v1161_v19 = vpop.permute.xlu1 %1160 }
 0xa08   :  { %v1163_v22 = vadd.f32 %v1161_v19, %v1145_v26 }
 0xa0a   :  { %4383 = vtanh.f32 %v1163_v22 }
 0xa0b   :  { %v1175_v24 = vpop.permute.xlu1 %1174  ;;  %4385 = vpow2.f32 %v3396_v59 }
 0xa0c   :  { %v1177_v27 = vsel %vm235_vm2, %v5098_v33, %v1175_v24  ;;  %v5280_v33 = vld [vmem:[%s6177_s1 + $0x6] sm:$0x3] }
 0xa0d   :  { %v1178_v38 = vsub.f32 1.0, %v1177_v27  ;;  %v5314_v24 = vld [vmem:[%s6176_s0 + $0x6] sm:$0x3] }
 0xa0f   :  { %1181 = vperm.xlu0 %4292, %v1178_v38  }
 0xa13   :  { %1187 = vperm.xlu0 %4292, %v1177_v27  }
 0xa17   :  { %v4384_v44 = vpop.eup %4383  ;;  %4296 = vset.pattern.permute.xlu0 %v6190_v8 }
 0xa18   :  { %1167 = vrot.lane.b32.xlu0 %v4384_v44, %s4660_s13 }
 0xa62   :  { %v1065_v56 = vpop.xlane.xlu1 %1064 }
 0xa63   :  { %v5273_v62 = vsel %vm1056_vm9, %v5123_v37, %v1065_v56  ;;  %v4386_v37 = vpop.eup %4385 }
 0xa64   :  { %v1445_v50 = vsel %vm1444_vm8, %v5273_v62, -inf  ;;  %v873_v39 = vadd.f32 1.0, %v4386_v37 }
 0xa65   :  { %1446 = vmax.xlane.f32.xlu0 %v1445_v50 }
 0xa66   :  { %4387 = vrcp.f32 %v873_v39  ;;  %v878_v30 = vpop.permute.xlu1 %877  ;;  %v5359_v39 = vld [vmem:[#allocation5 + $0x58] sm:$0xff] }
 0xa73   :  { %v5292_v31 = vpop.eup %4387 }
 0xa74   :  { %v880_v51 = vmul.f32 %v5292_v31, %v878_v30  ;;  %v5393_v30 = vld [vmem:[#allocation5 + $0x18] sm:$0xff] }
 0xa7b   :  { %1330 = vperm.xlu0 %4296, %v5280_v33  }
 0xa7f   :  { %4297 = vset.pattern.permute.xlu0 %v6188_v1 }
 0xa80   :  { %1324 = vperm.xlu0 %4297, %v5280_v33  }
 0xa84   :  { %4299 = vset.pattern.permute.xlu0 %v6190_v8 }
 0xa8a   :  { %v1182_v29 = vpop.permute.xlu0 %1181 }
 0xa8b   :  { %v1184_v21 = vmul.f32 %v1182_v29, %v5117_v48 }
 0xa8e   :  { %v1188_v13 = vpop.permute.xlu0 %1187 }
 0xa92   :  { %v1168_v52 = vpop.permute.xlu0 %1167 }
 0xa93   :  { %v1170_v15 = vmul.f32 %v1168_v52, %v1165_v36  ;;  %v5369_v36 = vld [vmem:[#allocation5 + $0x48] sm:$0xff]  ;;  %v5373_v52 = vld [vmem:[#allocation5 + $0x40] sm:$0xff] }
 0xa95   :  { %v1172_v18 = vadd.f32 %v1171_v40, %v1170_v15  ;;  %v5377_v40 = vld [vmem:[#allocation5 + $0x38] sm:$0xff]  ;;  %v5381_v15 = vld [vmem:[#allocation5 + $0x30] sm:$0xff] }
 0xa97   :  { %v1190_v23 = vmul.f32 %v1188_v13, %v1172_v18  ;;  %v5365_v13 = vld [vmem:[#allocation5 + $0x50] sm:$0xff]  ;;  %v5385_v18 = vld [vmem:[#allocation5 + $0x28] sm:$0xff] }
 0xa99   :  { %v5288_v26 = vadd.f32 %v1190_v23, %v1184_v21  ;;  %v5389_v21 = vld [vmem:[#allocation5 + $0x20] sm:$0xff] }
 0xa9b   :  { %v1195_v28 = vrot.slane %v5288_v26, 2  ;;  %v1192_v50 = vmul.f32 %v5288_v26, %v5127_v12 }
 0xa9d   :  { %1196 = vrot.lane.b32.xlu1 %v1195_v28, %s4660_s13 }
 0xaa1   :  { %882 = vrot.lane.b32.xlu1 %v880_v51, %s4659_s12 }
 0xaee   :  { %v1447_v10 = vpop.xlane.xlu0 %1446 }
 0xaef   :  { %v1448_v42 = vsub.f32 %v5273_v62, %v1447_v10  ;;  %v5399_v10 = vld [vmem:[#allocation5 + $0x10] sm:$0xff] }
 0xaf1   :  { %v1449_v46 = vmul.f32 1.442695, %v1448_v42  ;;  %v5403_v42 = vld [vmem:[#allocation5 + $0x8] sm:$0xff] }
 0xaf3   :  { %4389 = vpow2.f32 %v1449_v46 }
 0xaf6   :  { %v5298_v2 = vpop.permute.xlu0 %1330 }
 0xafb   :  { %v5307_v19 = vpop.permute.xlu0 %1324 }
 0xb00   :  { %v4390_v48 = vpop.eup %4389 }
 0xb01   :  { %v1451_v49 = vsel %vm1444_vm8, %v4390_v48, 0.0  ;;  %vm2768_vm8 = vcmask 48128  }
 0xb02   :  { %1452 = vadd.xlane.f32.xlu1 %v1451_v49 }
 0xb0f   :  { %v1197_v41 = vpop.permute.xlu1 %1196 }
 0xb10   :  { %v1199_v4 = vmul.f32 %v1197_v41, %v5130_v7  ;;  %v1333_v6 = vmul.f32 %v5298_v2, %v1197_v41  ;;  %v1327_v7 = vmul.f32 %v5307_v19, %v5288_v26  ;;  %v5408_v41 = vld [vmem:[#allocation5] sm:$0xff] }
 0xb12   :  { %1335 = vrot.lane.b32.xlu0 %v1333_v6, %s4658_s30 }
 0xb13   :  { %1201 = vrot.lane.b32.xlu1 %v1199_v4, %s4658_s30  ;;  %v883_v9 = vpop.permute.xlu1 %882 }
 0xb14   :  { %v885_v11 = vadd.f32 %v883_v9, %v867_v17 }
 0xb16   :  { %4391 = vtanh.f32 %v885_v11  ;;  %1340 = vrot.lane.b32.xlu0 %v5256_v32, %s4658_s30 }
 0xb23   :  { %v4392_v14 = vpop.eup %4391 }
 0xb24   :  { %889 = vrot.lane.b32.xlu0 %v4392_v14, %s4660_s13 }
 0xb84   :  { %v1336_v22 = vpop.permute.xlu0 %1335 }
 0xb85   :  { %v1338_v27 = vadd.f32 %v1336_v22, %v1327_v7  ;;  %v5425_v22 = vld [vmem:[#allocation2 + $0x40] sm:$0xff] }
 0xb87   :  { %v1343_v17 = vsel %vm93_vm1, %v5314_v24, %v1338_v27  ;;  %v5433_v27 = vld [vmem:[#allocation2 + $0x30] sm:$0xff] }
 0xb88   :  { %v1341_v38 = vpop.permute.xlu0 %1340 }
 0xb89   :  { %v1344_v44 = vsel %vm95_vm3, %v1343_v17, %v1341_v38  ;;  %v5437_v17 = vld [vmem:[#allocation2 + $0x28] sm:$0xff]  ;;  %v5441_v38 = vld [vmem:[#allocation2 + $0x20] sm:$0xff] }
 0xb8a   :  { %3954 = vmatmul.mubr.msk.f32.vlgmr.msra.gmra.mxu1 %vm115_vm4, %v1344_v44  ;;  %v5445_v44 = vld [vmem:[#allocation2 + $0x18] sm:$0xff] }
 0xb8b   :  { %v1453_v56 = vpop.xlane.xlu1 %1452  ;;  %3984 = vmatpush3.msra.mxu1 %v4936_v57  ;;  %3999 = vmatprep.mubr.msk.f32.mxu1 %vm4655_vm0, %v6195_v0 }
 0xb8c   :  { %4393 = vrcp.f32 %v1453_v56  ;;  %3985 = vmatprep.subr.mxu1 %v6195_v0  ;;  %v5449_v56 = vld [vmem:[#allocation2 + $0x10] sm:$0xff] }
 0xb8d   :  { %3986 = vmatpush3.msra.mxu1 %v4938_v58 }
 0xb8e   :  { %3987 = vmatprep.subr.mxu1 %v6195_v0 }
 0xb8f   :  { %v1202_v59 = vpop.permute.xlu1 %1201  ;;  %3988 = vmatpush3.msra.mxu1 %v4942_v60  ;;  %v6186_v60 = vmov 2  }
 0xb90   :  { %v1204_v37 = vadd.f32 %v1202_v59, %v1192_v50  ;;  %3989 = vmatprep.subr.mxu1 %v6195_v0  ;;  %v5453_v50 = vld [vmem:[#allocation2 + $0x8] sm:$0xff]  ;;  %v5457_v59 = vld [vmem:[#allocation2] sm:$0xff] }
 0xb91   :  { %3990 = vmatpush3.msra.mxu1 %v4949_v63 }
 0xb92   :  { %1206 = vrot.lane.b32.xlu0 %v1204_v37, %s4660_s13  ;;  %3991 = vmatprep.subr.mxu1 %v6195_v0 }
 0xb93   :  { %3992 = vmatpush3.msra.mxu1 %v4954_v3  ;;  %v887_v3 = vsub.f32 1.0, %v5292_v31 }
 0xb94   :  { %3993 = vmatprep.subr.mxu1 %v6195_v0 }
 0xb95   :  { %3994 = vmatpush3.msra.mxu1 %v4959_v34 }
 0xb96   :  { %3995 = vmatprep.subr.mxu1 %v6195_v0  ;;  %v890_v63 = vpop.permute.xlu0 %889 }
 0xb97   :  { %3996 = vmatpush3.msra.mxu1 %v4964_v16  ;;  %v892_v34 = vmul.f32 %v890_v63, %v887_v3  ;;  %v893_v16 = vmul.f32 %v5292_v31, %v5171_v43 }
 0xb98   :  { %3997 = vmatprep.subr.mxu1 %v6195_v0 }
 0xb99   :  { %v4394_v57 = vpop.eup %4393  ;;  %3998 = vmatpush3.msra.mxu1 %v4970_v20  ;;  %v5354_v20 = vadd.f32 %v893_v16, %v892_v34 }
 0xb9a   :  { %v5340_v58 = vmul.f32 %v4394_v57, %v4390_v48  ;;  %4029 = vmatprep.subr.mxu1 %v6195_v0  ;;  %v5464_v57 = vld [vmem:[%s6179_s3] ss:$0 sm:$0xff] }
 0xb9b   :  { %6207 = vst [vmem:[#allocation16_spill] sm:$0xff] %v5354_v20  ;;  %6208 = vst [vmem:[#allocation17_spill] sm:$0xff] %v5464_v57 }
 0xb9c   :  { %6206 = vst [vmem:[#allocation15_spill] sm:$0xff] %v5340_v58  ;;  %1458 = vperm.xlu1 %4298, %v5340_v58   ;;  %1464 = vperm.xlu0 %4299, %v5340_v58  }
 0xba0   :  { %4300 = vset.pattern.permute.xlu1 %v6186_v60  ;;  %4302 = vset.pattern.permute.xlu0 %v6188_v1 }
 0xba1   :  { %1470 = vperm.xlu1 %4300, %v5340_v58  }
 0xba5   :  { %1490 = vrot.lane.b32.xlu1 %v5288_v26, %s4658_s30 }
 0xba6   :  { %4301 = vset.pattern.permute.xlu1 %v6188_v1 }
 0xc04   :  { %v1207_v12 = vpop.permute.xlu0 %1206 }
 0xc05   :  { %v1209_v29 = vsel %vm93_vm1, %v1207_v12, %v5354_v20 }
 0xc06   :  { %3927 = vmatmul.mubr.msk.f32.vlgmr.msra.gmra.mxu0 %vm95_vm3, %v1209_v29 }
 0xc07   :  { %3957 = vmatpush3.msra.mxu0 %v5359_v39  ;;  %3980 = vmatprep.mubr.msk.f32.mxu0 %vm4655_vm0, %v6195_v0 }
 0xc08   :  { %3958 = vmatprep.subr.mxu0 %v6195_v0 }
 0xc09   :  { %3959 = vmatpush3.msra.mxu0 %v5365_v13 }
 0xc0a   :  { %3960 = vmatprep.subr.mxu0 %v6195_v0 }
 0xc0b   :  { %3961 = vmatpush3.msra.mxu0 %v5369_v36 }
 0xc0c   :  { %3962 = vmatprep.subr.mxu0 %v6195_v0 }
 0xc0d   :  { %3963 = vmatpush3.msra.mxu0 %v5373_v52 }
 0xc0e   :  { %3964 = vmatprep.subr.mxu0 %v6195_v0 }
 0xc0f   :  { %3965 = vmatpush3.msra.mxu0 %v5377_v40 }
 0xc10   :  { %3966 = vmatprep.subr.mxu0 %v6195_v0 }
 0xc11   :  { %3967 = vmatpush3.msra.mxu0 %v5381_v15 }
 0xc12   :  { %3968 = vmatprep.subr.mxu0 %v6195_v0 }
 0xc13   :  { %3969 = vmatpush3.msra.mxu0 %v5385_v18 }
 0xc14   :  { %3970 = vmatprep.subr.mxu0 %v6195_v0 }
 0xc15   :  { %3971 = vmatpush3.msra.mxu0 %v5389_v21 }
 0xc16   :  { %3972 = vmatprep.subr.mxu0 %v6195_v0 }
 0xc17   :  { %v1465_v23 = vpop.permute.xlu0 %1464  ;;  %v1459_v28 = vpop.permute.xlu1 %1458  ;;  %3973 = vmatpush3.msra.mxu0 %v5393_v30 }
 0xc18   :  { %3974 = vmatprep.subr.mxu0 %v6195_v0  ;;  %v1467_v31 = vmul.f32 %v1465_v23, %v5088_v45  ;;  %v1461_v51 = vmul.f32 %v1459_v28, %v4929_v55 }
 0xc19   :  { %3975 = vmatpush3.msra.mxu0 %v5399_v10 }
 0xc1a   :  { %3976 = vmatprep.subr.mxu0 %v6195_v0  ;;  %v1468_v48 = vadd.f32 %v1467_v31, %v1461_v51 }
 0xc1b   :  { %3977 = vmatpush3.msra.mxu0 %v5403_v42 }
 0xc1c   :  { %v1471_v46 = vpop.permute.xlu1 %1470  ;;  %3978 = vmatprep.subr.mxu0 %v6195_v0 }
 0xc1d   :  { %v1473_v49 = vmul.f32 %v1471_v46, %v5256_v32  ;;  %3979 = vmatpush3.msra.mxu0 %v5408_v41 }
 0xc1e   :  { %4002 = vmatprep.subr.mxu0 %v6195_v0 }
 0xc1f   :  { %v1474_v4 = vadd.f32 %v1473_v49, %v1468_v48  ;;  %v5472_v48 = vld [vmem:[%s6181_s5] ss:$0 sm:$0xff] }
 0xc20   :  { %v1491_v14 = vpop.permute.xlu1 %1490 }
 0xc21   :  { %v1485_v6 = vsel %vm93_vm1, %v5314_v24, %v1474_v4  ;;  %v5429_v24 = vld [vmem:[#allocation2 + $0x38] sm:$0xff] }
 0xc22   :  { %v1487_v9 = vrot.slane %v1485_v6, 6 }
 0xc24   :  { %v1489_v11 = vsel %vm235_vm2, %v1485_v6, %v1487_v9 }
 0xc25   :  { %v1493_v7 = vsel %vm95_vm3, %v1489_v11, %v1491_v14 }
 0xc26   :  { %3981 = vmatmul.mubr.msk.f32.vlgmr.msra.gmra.mxu0 %vm115_vm4, %v1493_v7  ;;  %v1592_v7 = vrot.slane %v5280_v33, 6 }
 0xc27   :  { %4003 = vmatpush3.msra.mxu0 %v5219_v47  ;;  %4026 = vmatprep.mubr.msk.f32.mxu0 %vm4655_vm0, %v6195_v0 }
 0xc28   :  { %4004 = vmatprep.subr.mxu0 %v6195_v0 }
 0xc29   :  { %4005 = vmatpush3.msra.mxu0 %v5225_v35 }
 0xc2a   :  { %4006 = vmatprep.subr.mxu0 %v6195_v0 }
 0xc2b   :  { %4007 = vmatpush3.msra.mxu0 %v5229_v53 }
 0xc2c   :  { %4008 = vmatprep.subr.mxu0 %v6195_v0 }
 0xc2d   :  { %4009 = vmatpush3.msra.mxu0 %v5425_v22 }
 0xc2e   :  { %4010 = vmatprep.subr.mxu0 %v6195_v0 }
 0xc2f   :  { %4011 = vmatpush3.msra.mxu0 %v5429_v24 }
 0xc30   :  { %4012 = vmatprep.subr.mxu0 %v6195_v0 }
 0xc31   :  { %4013 = vmatpush3.msra.mxu0 %v5433_v27 }
 0xc32   :  { %4014 = vmatprep.subr.mxu0 %v6195_v0 }
 0xc33   :  { %4015 = vmatpush3.msra.mxu0 %v5437_v17 }
 0xc34   :  { %4016 = vmatprep.subr.mxu0 %v6195_v0 }
 0xc35   :  { %4017 = vmatpush3.msra.mxu0 %v5441_v38 }
 0xc36   :  { %4018 = vmatprep.subr.mxu0 %v6195_v0 }
 0xc37   :  { %4019 = vmatpush3.msra.mxu0 %v5445_v44 }
 0xc38   :  { %4020 = vmatprep.subr.mxu0 %v6195_v0 }
 0xc39   :  { %4021 = vmatpush3.msra.mxu0 %v5449_v56 }
 0xc3a   :  { %4022 = vmatprep.subr.mxu0 %v6195_v0 }
 0xc3b   :  { %4023 = vmatpush3.msra.mxu0 %v5453_v50 }
 0xc3c   :  { %4024 = vmatprep.subr.mxu0 %v6195_v0 }
 0xc3d   :  { %4025 = vmatpush3.msra.mxu0 %v5457_v59 }
 0xc3e   :  { %4056 = vmatprep.subr.mxu0 %v6195_v0 }
 0xc4a   :  { %v1414_v37 = vpop.f32.mrf.mxu1 }
 0xc4b   :  { %v1415_v63 = vadd.f32 %v5464_v57, %v1414_v37 }
 0xc4c   :  { %v3955_v3 = vpop.f32.mrf.mxu1 }
 0xc4d   :  { %1425 = vrot.lane.b32.xlu0 %v1415_v63, %s4658_s30  ;;  %v3408_v34 = vmul.f32 -1.442695, %v1415_v63 }
 0xc4f   :  { %4395 = vpow2.f32 %v3408_v34 }
 0xc5c   :  { %v4396_v16 = vpop.eup %4395 }
 0xc5d   :  { %v1421_v12 = vadd.f32 1.0, %v4396_v16 }
 0xc5f   :  { %4397 = vrcp.f32 %v1421_v12 }
 0xc6c   :  { %v4398_v29 = vpop.eup %4397 }
 0xcbf   :  { %v1426_v23 = vpop.permute.xlu0 %1425 }
 0xcc0   :  { %v1428_v28 = vmul.f32 %v4398_v29, %v1426_v23  ;;  %v1435_v23 = vsub.f32 1.0, %v4398_v29 }
 0xcc2   :  { %1430 = vrot.lane.b32.xlu1 %v1428_v28, %s4659_s12  ;;  %v1441_v28 = vmul.f32 %v4398_v29, %v5256_v32 }
 0xcc6   :  { %v1279_v31 = vpop.f32.mrf.mxu0 }
 0xcc8   :  { %v3928_v51 = vpop.f32.mrf.mxu0 }
 0xce6   :  { %v1563_v46 = vpop.f32.mrf.mxu0 }
 0xce7   :  { %v1564_v49 = vadd.f32 %v5472_v48, %v1563_v46 }
 0xce8   :  { %v3982_v4 = vpop.f32.mrf.mxu0 }
 0xce9   :  { %1574 = vrot.lane.b32.xlu0 %v1564_v49, %s4658_s30  ;;  %v3410_v11 = vmul.f32 -1.442695, %v1564_v49 }
 0xd34   :  { %v1431_v6 = vpop.permute.xlu1 %1430 }
 0xd35   :  { %v1433_v9 = vadd.f32 %v1431_v6, %v1415_v63 }
 0xd37   :  { %4399 = vtanh.f32 %v1433_v9 }
 0xd38   :  { %4401 = vpow2.f32 %v3410_v11 }
 0xd44   :  { %v4400_v14 = vpop.eup %4399 }
 0xd45   :  { %1437 = vrot.lane.b32.xlu1 %v4400_v14, %s4660_s13  ;;  %v4402_v37 = vpop.eup %4401  ;;  %v5491_v14 = vld [vmem:[%s6177_s1 + $0x8] sm:$0x3] }
 0xd46   :  { %v1570_v3 = vadd.f32 1.0, %v4402_v37 }
 0xd48   :  { %4403 = vrcp.f32 %v1570_v3 }
 0xd49   :  { %1593 = vrot.lane.b32.xlu1 %v1592_v7, %s4657_s27 }
 0xd55   :  { %v4404_v34 = vpop.eup %4403 }
 0xd5b   :  { %v1575_v16 = vpop.permute.xlu0 %1574 }
 0xd5c   :  { %v1577_v12 = vmul.f32 %v4404_v34, %v1575_v16  ;;  %v1280_v16 = vadd.f32 %v5109_v25, %v1279_v31 }
 0xd5e   :  { %1579 = vrot.lane.b32.xlu0 %v1577_v12, %s4659_s12  ;;  %v1584_v12 = vsub.f32 1.0, %v4404_v34  ;;  %v3404_v25 = vmul.f32 -1.442695, %v1280_v16 }
 0xdb7   :  { %v1438_v63 = vpop.permute.xlu1 %1437 }
 0xdb8   :  { %v1440_v51 = vmul.f32 %v1438_v63, %v1435_v23 }
 0xdba   :  { %v5481_v46 = vadd.f32 %v1441_v28, %v1440_v51  ;;  %v1590_v28 = vmul.f32 %v4404_v34, %v5288_v26 }
 0xdbb   :  { %v1594_v4 = vpop.permute.xlu1 %1593 }
 0xdbc   :  { %v1596_v6 = vsel %vm235_vm2, %v5280_v33, %v1594_v4  ;;  %v1477_v9 = vmul.f32 %v5481_v46, %v4927_v54 }
 0xdbd   :  { %v1597_v11 = vsub.f32 1.0, %v1596_v6 }
 0xdbe   :  { %1479 = vrot.lane.b32.xlu0 %v1477_v9, %s4660_s13 }
 0xdbf   :  { %1600 = vperm.xlu1 %4301, %v1597_v11  }
 0xdc2   :  { %1606 = vperm.xlu0 %4302, %v1596_v6  }
 0xdc6   :  { %4303 = vset.pattern.permute.xlu0 %v6190_v8 }
 0xdc7   :  { %1749 = vperm.xlu0 %4303, %v5491_v14  }
 0xdcb   :  { %4304 = vset.pattern.permute.xlu0 %v6188_v1 }
 0xdd0   :  { %v1580_v33 = vpop.permute.xlu0 %1579 }
 0xdd1   :  { %v1582_v29 = vadd.f32 %v1580_v33, %v1564_v49 }
 0xdd3   :  { %4405 = vtanh.f32 %v1582_v29 }
 0xdd4   :  { %4407 = vpow2.f32 %v3404_v25  ;;  %v5531_v25 = vld [vmem:[%s6176_s0 + $0x8] sm:$0x3] }
 0xde0   :  { %v4406_v7 = vpop.eup %4405 }
 0xde1   :  { %1586 = vrot.lane.b32.xlu1 %v4406_v7, %s4660_s13 }
 0xe30   :  { %v1480_v37 = vpop.permute.xlu0 %1479 }
 0xe31   :  { %v1482_v3 = vsel %vm227_vm5, %v1480_v37, 0.0 }
 0xe32   :  { %1483 = vadd.xlane.f32.xlu1 %v1482_v3 }
 0xe3a   :  { %v1601_v49 = vpop.permute.xlu1 %1600 }
 0xe3b   :  { %v1603_v6 = vmul.f32 %v1601_v49, %v5288_v26  ;;  %v4408_v26 = vpop.eup %4407 }
 0xe3c   :  { %v1286_v7 = vadd.f32 1.0, %v4408_v26 }
 0xe3d   :  { %v1607_v4 = vpop.permute.xlu0 %1606 }
 0xe3e   :  { %4409 = vrcp.f32 %v1286_v7 }
 0xe42   :  { %v5518_v3 = vpop.permute.xlu0 %1749 }
 0xe43   :  { %1743 = vperm.xlu1 %4301, %v5491_v14  }
 0xe47   :  { %1759 = vrot.lane.b32.xlu1 %v5481_v46, %s4658_s30 }
 0xe48   :  { %4306 = vset.pattern.permute.xlu1 %v6186_v60 }
 0xe4b   :  { %1290 = vrot.lane.b32.xlu1 %v1280_v16, %s4658_s30 }
 0xe53   :  { %v1587_v23 = vpop.permute.xlu1 %1586 }
 0xe54   :  { %v1589_v63 = vmul.f32 %v1587_v23, %v1584_v12 }
 0xe56   :  { %v1591_v51 = vadd.f32 %v1590_v28, %v1589_v63 }
 0xe58   :  { %v1609_v9 = vmul.f32 %v1607_v4, %v1591_v51 }
 0xe5a   :  { %v5506_v11 = vadd.f32 %v1609_v9, %v1603_v6 }
 0xe5c   :  { %v1614_v33 = vrot.slane %v5506_v11, 2 }
 0xe5e   :  { %1615 = vrot.lane.b32.xlu0 %v1614_v33, %s4660_s13 }
 0xebb   :  { %v1484_v31 = vpop.xlane.xlu1 %1483 }
 0xebc   :  { %v5512_v29 = vsel %vm1475_vm11, %v5273_v62, %v1484_v31  ;;  %v4410_v62 = vpop.eup %4409 }
 0xebd   :  { %v1864_v34 = vsel %vm1863_vm10, %v5512_v29, -inf }
 0xebe   :  { %1865 = vmax.xlane.f32.xlu0 %v1864_v34 }
 0xebf   :  { %v5516_v37 = vpop.permute.xlu1 %1743 }
 0xec0   :  { %v1746_v9 = vmul.f32 %v5516_v37, %v5506_v11 }
 0xec3   :  { %v1760_v49 = vpop.permute.xlu1 %1759 }
 0xec7   :  { %v1291_v63 = vpop.permute.xlu1 %1290 }
 0xec8   :  { %v1293_v28 = vmul.f32 %v4410_v62, %v1291_v63  ;;  %v5543_v63 = vld [vmem:[#allocation7 + $0x30] sm:$0xff] }
 0xed0   :  { %v1616_v12 = vpop.permute.xlu0 %1615 }
 0xed1   :  { %v1752_v23 = vmul.f32 %v5518_v3, %v1616_v12  ;;  %v1618_v51 = vmul.f32 %v1616_v12, %v5298_v2 }
 0xed4   :  { %1754 = vrot.lane.b32.xlu0 %v1752_v23, %s4658_s30  ;;  %v5537_v23 = vld [vmem:[#allocation7 + $0x38] sm:$0xff] }
 0xed8   :  { %1295 = vrot.lane.b32.xlu0 %v1293_v28, %s4659_s12 }
 0xedc   :  { %1620 = vrot.lane.b32.xlu0 %v1618_v51, %s4658_s30  ;;  %v5555_v51 = vld [vmem:[#allocation7 + $0x18] sm:$0xff] }
 0xf47   :  { %v1866_v4 = vpop.xlane.xlu0 %1865 }
 0xf48   :  { %v1867_v6 = vsub.f32 %v5512_v29, %v1866_v4 }
 0xf4a   :  { %v1868_v33 = vmul.f32 1.442695, %v1867_v6  ;;  %v5560_v6 = vld [vmem:[#allocation7 + $0x10] sm:$0xff] }
 0xf4b   :  { %v1755_v31 = vpop.permute.xlu0 %1754 }
 0xf4c   :  { %4411 = vpow2.f32 %v1868_v33  ;;  %v1757_v34 = vadd.f32 %v1755_v31, %v1746_v9  ;;  %v5564_v9 = vld [vmem:[#allocation7 + $0x8] sm:$0xff] }
 0xf4e   :  { %v1762_v2 = vsel %vm93_vm1, %v5531_v25, %v1757_v34  ;;  %v5568_v34 = vld [vmem:[#allocation7] sm:$0xff] }
 0xf4f   :  { %v1296_v26 = vpop.permute.xlu0 %1295  ;;  %v1763_v7 = vsel %vm95_vm3, %v1762_v2, %v1760_v49  ;;  %v5547_v49 = vld [vmem:[#allocation7 + $0x28] sm:$0xff]  ;;  %v1611_v2 = vmul.f32 %v5506_v11, %v5307_v19 }
 0xf50   :  { %v1298_v12 = vadd.f32 %v1296_v26, %v1280_v16  ;;  %4027 = vmatmul.mubr.msk.f32.vlgmr.msra.gmra.mxu0 %vm115_vm4, %v1763_v7  ;;  %v5551_v16 = vld [vmem:[#allocation7 + $0x20] sm:$0xff]  ;;  %v1300_v7 = vsub.f32 1.0, %v4410_v62 }
 0xf51   :  { %4057 = vmatpush3.msra.mxu0 %v5537_v23  ;;  %4072 = vmatprep.mubr.msk.f32.mxu0 %vm4655_vm0, %v6195_v0 }
 0xf52   :  { %4413 = vtanh.f32 %v1298_v12  ;;  %4058 = vmatprep.subr.mxu0 %v6195_v0 }
 0xf53   :  { %4059 = vmatpush3.msra.mxu0 %v5543_v63  ;;  %v1621_v31 = vpop.permute.xlu0 %1620 }
 0xf54   :  { %4060 = vmatprep.subr.mxu0 %v6195_v0  ;;  %v1623_v26 = vadd.f32 %v1621_v31, %v1611_v2 }
 0xf55   :  { %4061 = vmatpush3.msra.mxu0 %v5547_v49 }
 0xf56   :  { %4062 = vmatprep.subr.mxu0 %v6195_v0 }
 0xf57   :  { %4063 = vmatpush3.msra.mxu0 %v5551_v16 }
 0xf58   :  { %4064 = vmatprep.subr.mxu0 %v6195_v0 }
 0xf59   :  { %v4412_v28 = vpop.eup %4411  ;;  %4065 = vmatpush3.msra.mxu0 %v5555_v51 }
 0xf5a   :  { %v1870_v4 = vsel %vm1863_vm10, %v4412_v28, 0.0  ;;  %4066 = vmatprep.subr.mxu0 %v6195_v0 }
 0xf5b   :  { %1871 = vadd.xlane.f32.xlu1 %v1870_v4  ;;  %4067 = vmatpush3.msra.mxu0 %v5560_v6  ;;  %v1306_v4 = vmul.f32 %v4410_v62, %v5354_v20  ;;  %v6211_v62 = vmov 0  }
 0xf5c   :  { %4068 = vmatprep.subr.mxu0 %v6195_v0 }
 0xf5d   :  { %4069 = vmatpush3.msra.mxu0 %v5564_v9 }
 0xf5e   :  { %4070 = vmatprep.subr.mxu0 %v6195_v0 }
 0xf5f   :  { %v4414_v33 = vpop.eup %4413  ;;  %4071 = vmatpush3.msra.mxu0 %v5568_v34 }
 0xf60   :  { %1302 = vrot.lane.b32.xlu0 %v4414_v33, %s4660_s13  ;;  %4102 = vmatprep.subr.mxu0 %v6195_v0  ;;  %v6193_v33 = vmov 3  }
 0xf64   :  { %1625 = vrot.lane.b32.xlu0 %v1623_v26, %s4660_s13 }
 0xfd2   :  { %v1303_v12 = vpop.permute.xlu0 %1302 }
 0xfd3   :  { %v1305_v60 = vmul.f32 %v1303_v12, %v1300_v7 }
 0xfd5   :  { %v5577_v1 = vadd.f32 %v1306_v4, %v1305_v60  ;;  %v6210_v60 = vmov 1  }
 0xfd6   :  { %v1626_v8 = vpop.permute.xlu0 %1625 }
 0xfd7   :  { %v1628_v58 = vsel %vm93_vm1, %v1626_v8, %v5577_v1 }
 0xfd8   :  { %4000 = vmatmul.mubr.msk.f32.vlgmr.msra.gmra.mxu1 %vm95_vm3, %v1628_v58 }
 0xfd9   :  { %4030 = vmatpush3.msra.mxu1 %v5359_v39  ;;  %4053 = vmatprep.mubr.msk.f32.mxu1 %vm4655_vm0, %v6195_v0 }
 0xfda   :  { %4031 = vmatprep.subr.mxu1 %v6195_v0 }
 0xfdb   :  { %4032 = vmatpush3.msra.mxu1 %v5365_v13 }
 0xfdc   :  { %4033 = vmatprep.subr.mxu1 %v6195_v0 }
 0xfdd   :  { %4034 = vmatpush3.msra.mxu1 %v5369_v36 }
 0xfde   :  { %4035 = vmatprep.subr.mxu1 %v6195_v0 }
 0xfdf   :  { %4036 = vmatpush3.msra.mxu1 %v5373_v52 }
 0xfe0   :  { %4037 = vmatprep.subr.mxu1 %v6195_v0 }
 0xfe1   :  { %4038 = vmatpush3.msra.mxu1 %v5377_v40 }
 0xfe2   :  { %4039 = vmatprep.subr.mxu1 %v6195_v0 }
 0xfe3   :  { %4040 = vmatpush3.msra.mxu1 %v5381_v15 }
 0xfe4   :  { %v1872_v8 = vpop.xlane.xlu1 %1871  ;;  %4041 = vmatprep.subr.mxu1 %v6195_v0 }
 0xfe5   :  { %4415 = vrcp.f32 %v1872_v8  ;;  %4042 = vmatpush3.msra.mxu1 %v5385_v18 }
 0xfe6   :  { %4043 = vmatprep.subr.mxu1 %v6195_v0 }
 0xfe7   :  { %4044 = vmatpush3.msra.mxu1 %v5389_v21 }
 0xfe8   :  { %4045 = vmatprep.subr.mxu1 %v6195_v0 }
 0xfe9   :  { %4046 = vmatpush3.msra.mxu1 %v5393_v30 }
 0xfea   :  { %4047 = vmatprep.subr.mxu1 %v6195_v0 }
 0xfeb   :  { %4048 = vmatpush3.msra.mxu1 %v5399_v10 }
 0xfec   :  { %4049 = vmatprep.subr.mxu1 %v6195_v0 }
 0xfed   :  { %4050 = vmatpush3.msra.mxu1 %v5403_v42 }
 0xfee   :  { %4051 = vmatprep.subr.mxu1 %v6195_v0 }
 0xfef   :  { %4052 = vmatpush3.msra.mxu1 %v5408_v41 }
 0xff0   :  { %4075 = vmatprep.subr.mxu1 %v6195_v0 }
 0xff2   :  { %v4416_v19 = vpop.eup %4415 }
 0xff3   :  { %v5608_v58 = vmul.f32 %v4416_v19, %v4412_v28 }
 0xff5   :  { %6209 = vst [vmem:[#allocation18_spill] sm:$0xff] %v5608_v58  ;;  %1889 = vperm.xlu1 %4306, %v5608_v58   ;;  %1877 = vperm.xlu0 %4304, %v5608_v58  }
 0xff9   :  { %4305 = vset.pattern.permute.xlu0 %v6210_v60  ;;  %4308 = vset.pattern.permute.xlu1 %v6211_v62 }
 0xffa   :  { %1883 = vperm.xlu0 %4305, %v5608_v58  }
 0xffe   :  { %4307 = vset.pattern.permute.xlu0 %v6193_v33 }
 0xfff   :  { %1895 = vperm.xlu0 %4307, %v5608_v58  }
0x1003   :  { %1915 = vrot.lane.b32.xlu0 %v5506_v11, %s4658_s30 }
0x1004   :  { %4309 = vset.pattern.permute.xlu0 %v6210_v60 }
0x1010   :  { %v1833_v28 = vpop.f32.mrf.mxu0 }
0x1011   :  { %v1834_v31 = vadd.f32 %v5464_v57, %v1833_v28 }
0x1012   :  { %v4028_v2 = vpop.f32.mrf.mxu0 }
0x1013   :  { %1844 = vrot.lane.b32.xlu0 %v1834_v31, %s4658_s30  ;;  %v3416_v26 = vmul.f32 -1.442695, %v1834_v31 }
0x1015   :  { %4417 = vpow2.f32 %v3416_v26 }
0x1022   :  { %v4418_v12 = vpop.eup %4417 }
0x1023   :  { %v1840_v4 = vadd.f32 1.0, %v4418_v12 }
0x1025   :  { %4419 = vrcp.f32 %v1840_v4 }
0x1032   :  { %v4420_v4 = vpop.eup %4419 }
0x1070   :  { %v1878_v7 = vpop.permute.xlu0 %1877  ;;  %v1890_v8 = vpop.permute.xlu1 %1889 }
0x1071   :  { %v1880_v33 = vmul.f32 %v1878_v7, %v4929_v55  ;;  %v1892_v20 = vmul.f32 %v1890_v8, %v5256_v32  ;;  %v1860_v8 = vmul.f32 %v4420_v4, %v5481_v46 }
0x1075   :  { %v1884_v19 = vpop.permute.xlu0 %1883 }
0x1076   :  { %v1886_v0 = vmul.f32 %v1884_v19, %v5088_v45 }
0x1078   :  { %v1887_v58 = vadd.f32 %v1886_v0, %v1880_v33  ;;  %v6212_v0 = vmov 0.0  }
0x107a   :  { %v1893_v5 = vadd.f32 %v1892_v20, %v1887_v58  ;;  %v1896_v28 = vpop.permute.xlu0 %1895  ;;  %v1854_v58 = vsub.f32 1.0, %v4420_v4 }
0x107b   :  { %v1898_v2 = vmul.f32 %v1896_v28, %v5481_v46 }
0x107d   :  { %v1899_v61 = vadd.f32 %v1898_v2, %v1893_v5 }
0x107e   :  { %v1916_v12 = vpop.permute.xlu0 %1915 }
0x107f   :  { %v1910_v26 = vsel %vm93_vm1, %v5531_v25, %v1899_v61 }
0x1080   :  { %v1912_v43 = vrot.slane %v1910_v26, 6 }
0x1082   :  { %v1914_v57 = vsel %vm235_vm2, %v1910_v26, %v1912_v43  ;;  %v2017_v26 = vrot.slane %v5491_v14, 6 }
0x1083   :  { %v1918_v7 = vsel %vm95_vm3, %v1914_v57, %v1916_v12 }
0x1084   :  { %4054 = vmatmul.mubr.msk.f32.vlgmr.msra.gmra.mxu1 %vm115_vm4, %v1918_v7 }
0x1085   :  { %v1845_v19 = vpop.permute.xlu0 %1844  ;;  %4076 = vmatpush3.msra.mxu1 %v5219_v47  ;;  %4099 = vmatprep.mubr.msk.f32.mxu1 %vm4655_vm0, %v6212_v0 }
0x1086   :  { %v1847_v20 = vmul.f32 %v4420_v4, %v1845_v19  ;;  %4077 = vmatprep.subr.mxu1 %v6212_v0 }
0x1087   :  { %4078 = vmatpush3.msra.mxu1 %v5225_v35 }
0x1088   :  { %1849 = vrot.lane.b32.xlu0 %v1847_v20, %s4659_s12  ;;  %4079 = vmatprep.subr.mxu1 %v6212_v0 }
0x1089   :  { %4080 = vmatpush3.msra.mxu1 %v5229_v53 }
0x108a   :  { %4081 = vmatprep.subr.mxu1 %v6212_v0 }
0x108b   :  { %4082 = vmatpush3.msra.mxu1 %v5425_v22 }
0x108c   :  { %4083 = vmatprep.subr.mxu1 %v6212_v0 }
0x108d   :  { %4084 = vmatpush3.msra.mxu1 %v5429_v24 }
0x108e   :  { %4085 = vmatprep.subr.mxu1 %v6212_v0 }
0x108f   :  { %4086 = vmatpush3.msra.mxu1 %v5433_v27 }
0x1090   :  { %4087 = vmatprep.subr.mxu1 %v6212_v0 }
0x1091   :  { %4088 = vmatpush3.msra.mxu1 %v5437_v17 }
0x1092   :  { %4089 = vmatprep.subr.mxu1 %v6212_v0 }
0x1093   :  { %4090 = vmatpush3.msra.mxu1 %v5441_v38 }
0x1094   :  { %4091 = vmatprep.subr.mxu1 %v6212_v0 }
0x1095   :  { %4092 = vmatpush3.msra.mxu1 %v5445_v44 }
0x1096   :  { %4093 = vmatprep.subr.mxu1 %v6212_v0 }
0x1097   :  { %4094 = vmatpush3.msra.mxu1 %v5449_v56 }
0x1098   :  { %v1698_v61 = vpop.f32.mrf.mxu1  ;;  %4095 = vmatprep.subr.mxu1 %v6212_v0 }
0x1099   :  { %4096 = vmatpush3.msra.mxu1 %v5453_v50 }
0x109a   :  { %v4001_v43 = vpop.f32.mrf.mxu1  ;;  %4097 = vmatprep.subr.mxu1 %v6212_v0 }
0x109b   :  { %4098 = vmatpush3.msra.mxu1 %v5457_v59 }
0x109c   :  { %4129 = vmatprep.subr.mxu1 %v6212_v0 }
0x10fa   :  { %v1850_v5 = vpop.permute.xlu0 %1849 }
0x10fb   :  { %v1852_v47 = vadd.f32 %v1850_v5, %v1834_v31 }
0x10fd   :  { %4421 = vtanh.f32 %v1852_v47 }
0x110a   :  { %v4422_v35 = vpop.eup %4421 }
0x110b   :  { %1856 = vrot.lane.b32.xlu1 %v4422_v35, %s4660_s13 }
0x1144   :  { %v1988_v53 = vpop.f32.mrf.mxu1 }
0x1145   :  { %v1989_v57 = vadd.f32 %v5472_v48, %v1988_v53 }
0x1146   :  { %v4055_v25 = vpop.f32.mrf.mxu1 }
0x1147   :  { %1999 = vrot.lane.b32.xlu0 %v1989_v57, %s4658_s30  ;;  %v3418_v12 = vmul.f32 -1.442695, %v1989_v57 }
0x1149   :  { %4423 = vpow2.f32 %v3418_v12 }
0x1156   :  { %v4424_v7 = vpop.eup %4423 }
0x1157   :  { %v1995_v19 = vadd.f32 1.0, %v4424_v7 }
0x1159   :  { %4425 = vrcp.f32 %v1995_v19 }
0x1166   :  { %v4426_v20 = vpop.eup %4425 }
0x117d   :  { %v1857_v33 = vpop.permute.xlu1 %1856 }
0x117e   :  { %v1859_v28 = vmul.f32 %v1857_v33, %v1854_v58  ;;  %v5676_v58 = vld [vmem:[%s6183_s7] ss:$0 sm:$0xff] }
0x117f   :  { %v1699_v33 = vadd.f32 %v5676_v58, %v1698_v61 }
0x1180   :  { %v5662_v2 = vadd.f32 %v1860_v8, %v1859_v28 }
0x1181   :  { %v3412_v61 = vmul.f32 -1.442695, %v1699_v33 }
0x1182   :  { %v1902_v31 = vmul.f32 %v5662_v2, %v4927_v54 }
0x1184   :  { %1904 = vrot.lane.b32.xlu1 %v1902_v31, %s4660_s13 }
0x1188   :  { %2018 = vrot.lane.b32.xlu1 %v2017_v26, %s4657_s27 }
0x11b9   :  { %v2000_v43 = vpop.permute.xlu0 %1999 }
0x11ba   :  { %v2002_v4 = vmul.f32 %v4426_v20, %v2000_v43 }
0x11bc   :  { %2004 = vrot.lane.b32.xlu0 %v2002_v4, %s4659_s12  ;;  %v2009_v4 = vsub.f32 1.0, %v4426_v20 }
0x11f6   :  { %v1905_v5 = vpop.permute.xlu1 %1904 }
0x11f7   :  { %v1907_v47 = vsel %vm227_vm5, %v1905_v5, 0.0 }
0x11f8   :  { %1908 = vadd.xlane.f32.xlu0 %v1907_v47  ;;  %v2015_v47 = vmul.f32 %v4426_v20, %v5506_v11 }
0x11fa   :  { %v2019_v35 = vpop.permute.xlu1 %2018 }
0x11fb   :  { %v2021_v53 = vsel %vm235_vm2, %v5491_v14, %v2019_v35 }
0x11fc   :  { %v2022_v25 = vsub.f32 1.0, %v2021_v53 }
0x11fe   :  { %2025 = vperm.xlu1 %4308, %v2022_v25  }
0x1202   :  { %2031 = vperm.xlu1 %4308, %v2021_v53  }
0x120e   :  { %1709 = vrot.lane.b32.xlu0 %v1699_v33, %s4658_s30 }
0x122e   :  { %v2005_v8 = vpop.permute.xlu0 %2004 }
0x122f   :  { %v2007_v28 = vadd.f32 %v2005_v8, %v1989_v57 }
0x1231   :  { %4427 = vtanh.f32 %v2007_v28 }
0x1232   :  { %4429 = vpow2.f32 %v3412_v61 }
0x123e   :  { %v4428_v31 = vpop.eup %4427 }
0x123f   :  { %2011 = vrot.lane.b32.xlu1 %v4428_v31, %s4660_s13  ;;  %v4430_v19 = vpop.eup %4429 }
0x1240   :  { %v1705_v43 = vadd.f32 1.0, %v4430_v19 }
0x1242   :  { %4431 = vrcp.f32 %v1705_v43 }
0x1279   :  { %v2026_v7 = vpop.permute.xlu1 %2025 }
0x127d   :  { %v2032_v57 = vpop.permute.xlu1 %2031 }
0x1281   :  { %v1909_v14 = vpop.xlane.xlu0 %1908 }
0x1282   :  { %v5683_v26 = vsel %vm1900_vm13, %v5512_v29, %v1909_v14  ;;  %v2028_v29 = vmul.f32 %v2026_v7, %v5506_v11  ;;  %v4432_v14 = vpop.eup %4431 }
0x1283   :  { %v2289_v12 = vsel %vm2288_vm12, %v5683_v26, -inf }
0x1284   :  { %2290 = vmax.xlane.f32.xlu1 %v2289_v12 }
0x1285   :  { %v1710_v31 = vpop.permute.xlu0 %1709 }
0x1286   :  { %v1712_v12 = vmul.f32 %v4432_v14, %v1710_v31 }
0x12b1   :  { %v2012_v5 = vpop.permute.xlu1 %2011 }
0x12b2   :  { %v2014_v35 = vmul.f32 %v2012_v5, %v2009_v4 }
0x12b4   :  { %v2016_v53 = vadd.f32 %v2015_v47, %v2014_v35 }
0x12b6   :  { %v2034_v25 = vmul.f32 %v2032_v57, %v2016_v53 }
0x12b8   :  { %v5689_v8 = vadd.f32 %v2034_v25, %v2028_v29 }
0x12ba   :  { %v2039_v28 = vrot.slane %v5689_v8, 2  ;;  %v2036_v35 = vmul.f32 %v5689_v8, %v5516_v37  ;;  %v6214_v37 = vmov 3  }
0x12bc   :  { %2040 = vrot.lane.b32.xlu1 %v2039_v28, %s4660_s13 }
0x12c0   :  { %1714 = vrot.lane.b32.xlu1 %v1712_v12, %s4659_s12  ;;  %v6213_v12 = vmov 2  }
0x130d   :  { %v2291_v61 = vpop.xlane.xlu1 %2290 }
0x130e   :  { %v2292_v19 = vsub.f32 %v5683_v26, %v2291_v61  ;;  %v4663_v61 = vmov 4  }
0x1310   :  { %v2293_v20 = vmul.f32 1.442695, %v2292_v19 }
0x1312   :  { %4433 = vpow2.f32 %v2293_v20  ;;  %v1719_v20 = vsub.f32 1.0, %v4432_v14 }
0x131f   :  { %v4434_v43 = vpop.eup %4433 }
0x1320   :  { %v2295_v11 = vsel %vm2288_vm12, %v4434_v43, 0.0 }
0x1321   :  { %2296 = vadd.xlane.f32.xlu0 %v2295_v11  ;;  %v1725_v11 = vmul.f32 %v4432_v14, %v5577_v1 }
0x132e   :  { %v5696_v7 = vpop.permute.xlu1 %2040 }
0x132f   :  { %v2043_v57 = vmul.f32 %v5696_v7, %v5518_v3  ;;  %v3422_v3 = vld [vmem:[%s6177_s1 + $0xa] sm:$0x3] }
0x1331   :  { %2045 = vrot.lane.b32.xlu1 %v2043_v57, %s4658_s30 }
0x1332   :  { %v1715_v4 = vpop.permute.xlu1 %1714 }
0x1333   :  { %v1717_v5 = vadd.f32 %v1715_v4, %v1699_v33  ;;  %v2448_v33 = vrot.slane %v3422_v3, 6 }
0x1335   :  { %4435 = vtanh.f32 %v1717_v5 }
0x1342   :  { %v4436_v47 = vpop.eup %4435 }
0x1343   :  { %1721 = vrot.lane.b32.xlu1 %v4436_v47, %s4660_s13 }
0x13a3   :  { %v2046_v53 = vpop.permute.xlu1 %2045 }
0x13a4   :  { %v2048_v29 = vadd.f32 %v2046_v53, %v2036_v35 }
0x13a6   :  { %2050 = vrot.lane.b32.xlu1 %v2048_v29, %s4660_s13  ;;  %v3421_v29 = vld [vmem:[%s6176_s0 + $0xa] sm:$0x3] }
0x13aa   :  { %v2297_v25 = vpop.xlane.xlu0 %2296 }
0x13ab   :  { %4437 = vrcp.f32 %v2297_v25 }
0x13b5   :  { %v1722_v19 = vpop.permute.xlu1 %1721 }
0x13b8   :  { %v4438_v28 = vpop.eup %4437 }
0x13b9   :  { %v5708_v31 = vmul.f32 %v4438_v28, %v4434_v43  ;;  %v1724_v43 = vmul.f32 %v1722_v19, %v1719_v20 }
0x13bb   :  { %2308 = vperm.xlu0 %4309, %v5708_v31   ;;  %2302 = vperm.xlu1 %4308, %v5708_v31   ;;  %v5725_v57 = vadd.f32 %v1725_v11, %v1724_v43 }
0x13bf   :  { %4310 = vset.pattern.permute.xlu1 %v6213_v12  ;;  %2449 = vrot.lane.b32.xlu0 %v2448_v33, %s4657_s27 }
0x13c0   :  { %2314 = vperm.xlu1 %4310, %v5708_v31   ;;  %4315 = vset.pattern.permute.xlu0 %v6211_v62 }
0x13c4   :  { %4311 = vset.pattern.permute.xlu1 %v6214_v37 }
0x13c5   :  { %2320 = vperm.xlu1 %4311, %v5708_v31  }
0x13c9   :  { %4312 = vset.pattern.permute.xlu1 %v4663_v61 }
0x13ca   :  { %2326 = vperm.xlu1 %4312, %v5708_v31  }
0x13ce   :  { %4313 = vset.pattern.permute.xlu1 %v6210_v60 }
0x13cf   :  { %2174 = vperm.xlu1 %4313, %v3422_v3  }
0x13d3   :  { %2346 = vrot.lane.b32.xlu1 %v5689_v8, %s4658_s30 }
0x13d4   :  { %4314 = vset.pattern.permute.xlu1 %v6211_v62 }
0x13d7   :  { %2168 = vperm.xlu1 %4314, %v3422_v3  }
0x1418   :  { %v2051_v4 = vpop.permute.xlu1 %2050 }
0x1419   :  { %v2053_v5 = vsel %vm93_vm1, %v2051_v4, %v5725_v57  ;;  %v4536_v4 = vld [vmem:[#allocation2 + $0x58] sm:$0xff] }
0x141a   :  { %4073 = vmatmul.mubr.msk.f32.vlgmr.msra.gmra.mxu0 %vm95_vm3, %v2053_v5  ;;  %v4538_v5 = vld [vmem:[#allocation2 + $0x48] sm:$0xff] }
0x141b   :  { %4103 = vmatpush3.msra.mxu0 %v5359_v39  ;;  %4126 = vmatprep.mubr.msk.f32.mxu0 %vm4655_vm0, %v6212_v0 }
0x141c   :  { %4104 = vmatprep.subr.mxu0 %v6212_v0 }
0x141d   :  { %4105 = vmatpush3.msra.mxu0 %v5365_v13 }
0x141e   :  { %4106 = vmatprep.subr.mxu0 %v6212_v0 }
0x141f   :  { %4107 = vmatpush3.msra.mxu0 %v5369_v36 }
0x1420   :  { %4108 = vmatprep.subr.mxu0 %v6212_v0 }
0x1421   :  { %4109 = vmatpush3.msra.mxu0 %v5373_v52 }
0x1422   :  { %4110 = vmatprep.subr.mxu0 %v6212_v0 }
0x1423   :  { %4111 = vmatpush3.msra.mxu0 %v5377_v40 }
0x1424   :  { %4112 = vmatprep.subr.mxu0 %v6212_v0 }
0x1425   :  { %4113 = vmatpush3.msra.mxu0 %v5381_v15 }
0x1426   :  { %4114 = vmatprep.subr.mxu0 %v6212_v0 }
0x1427   :  { %4115 = vmatpush3.msra.mxu0 %v5385_v18 }
0x1428   :  { %4116 = vmatprep.subr.mxu0 %v6212_v0 }
0x1429   :  { %4117 = vmatpush3.msra.mxu0 %v5389_v21 }
0x142a   :  { %4118 = vmatprep.subr.mxu0 %v6212_v0 }
0x142b   :  { %4119 = vmatpush3.msra.mxu0 %v5393_v30 }
0x142c   :  { %4120 = vmatprep.subr.mxu0 %v6212_v0 }
0x142d   :  { %4121 = vmatpush3.msra.mxu0 %v5399_v10 }
0x142e   :  { %4122 = vmatprep.subr.mxu0 %v6212_v0 }
0x142f   :  { %4123 = vmatpush3.msra.mxu0 %v5403_v42 }
0x1430   :  { %4124 = vmatprep.subr.mxu0 %v6212_v0 }
0x1431   :  { %4125 = vmatpush3.msra.mxu0 %v5408_v41 }
0x1432   :  { %4148 = vmatprep.subr.mxu0 %v6212_v0 }
0x1436   :  { %v2309_v39 = vpop.permute.xlu0 %2308  ;;  %v2303_v13 = vpop.permute.xlu1 %2302 }
0x1437   :  { %v2311_v18 = vmul.f32 %v2309_v39, %v5088_v45  ;;  %v2305_v21 = vmul.f32 %v2303_v13, %v4929_v55 }
0x1439   :  { %v2312_v42 = vadd.f32 %v2311_v18, %v2305_v21 }
0x143a   :  { %v2450_v36 = vpop.permute.xlu0 %2449 }
0x143b   :  { %v5757_v52 = vsel %vm235_vm2, %v3422_v3, %v2450_v36  ;;  %v2315_v40 = vpop.permute.xlu1 %2314 }
0x143c   :  { %v2453_v15 = vsub.f32 1.0, %v5757_v52  ;;  %v2317_v30 = vmul.f32 %v2315_v40, %v5256_v32 }
0x143e   :  { %2456 = vperm.xlu0 %4315, %v2453_v15   ;;  %v2318_v14 = vadd.f32 %v2317_v30, %v2312_v42 }
0x1440   :  { %v2321_v10 = vpop.permute.xlu1 %2320 }
0x1441   :  { %v2323_v41 = vmul.f32 %v2321_v10, %v5481_v46 }
0x1442   :  { %4316 = vset.pattern.permute.xlu0 %v6210_v60 }
0x1443   :  { %v2324_v35 = vadd.f32 %v2323_v41, %v2318_v14  ;;  %v6215_v14 = vld [vmem:[#allocation17_spill] sm:$0xff] }
0x1445   :  { %v2327_v47 = vpop.permute.xlu1 %2326 }
0x1446   :  { %v2329_v53 = vmul.f32 %v2327_v47, %v5662_v2 }
0x1448   :  { %v2330_v25 = vadd.f32 %v2329_v53, %v2324_v35 }
0x144a   :  { %v5769_v28 = vpop.permute.xlu1 %2174  ;;  %v2341_v3 = vsel %vm93_vm1, %v3421_v29, %v2330_v25 }
0x144b   :  { %v2177_v33 = vmul.f32 %v5769_v28, %v5696_v7  ;;  %v2343_v19 = vrot.slane %v2341_v3, 6  ;;  %v4537_v7 = vld [vmem:[#allocation2 + $0x50] sm:$0xff] }
0x144d   :  { %2179 = vrot.lane.b32.xlu1 %v2177_v33, %s4658_s30  ;;  %v2345_v20 = vsel %vm235_vm2, %v2341_v3, %v2343_v19 }
0x144e   :  { %v2347_v43 = vpop.permute.xlu1 %2346 }
0x144f   :  { %v2349_v11 = vsel %vm95_vm3, %v2345_v20, %v2347_v43 }
0x1450   :  { %4127 = vmatmul.mubr.msk.f32.vlgmr.msra.gmra.mxu0 %vm115_vm4, %v2349_v11 }
0x1451   :  { %2184 = vrot.lane.b32.xlu1 %v5662_v2, %s4658_s30  ;;  %4149 = vmatpush3.msra.mxu0 %v4536_v4 }
0x1452   :  { %4150 = vmatprep.subr.mxu0 %v6212_v0  ;;  %4172 = vmatprep.mubr.msk.f32.mxu0 %vm4655_vm0, %v6212_v0 }
0x1453   :  { %4151 = vmatpush3.msra.mxu0 %v4537_v7 }
0x1454   :  { %4152 = vmatprep.subr.mxu0 %v6212_v0 }
0x1455   :  { %4153 = vmatpush3.msra.mxu0 %v4538_v5 }
0x1456   :  { %4154 = vmatprep.subr.mxu0 %v6212_v0 }
0x1457   :  { %4155 = vmatpush3.msra.mxu0 %v5425_v22  ;;  %v5803_v22 = vpop.permute.xlu1 %2168 }
0x1458   :  { %4156 = vmatprep.subr.mxu0 %v6212_v0 }
0x1459   :  { %4157 = vmatpush3.msra.mxu0 %v5429_v24  ;;  %v2171_v24 = vmul.f32 %v5803_v22, %v5689_v8 }
0x145a   :  { %4158 = vmatprep.subr.mxu0 %v6212_v0 }
0x145b   :  { %4159 = vmatpush3.msra.mxu0 %v5433_v27 }
0x145c   :  { %4160 = vmatprep.subr.mxu0 %v6212_v0 }
0x145d   :  { %4161 = vmatpush3.msra.mxu0 %v5437_v17 }
0x145e   :  { %4162 = vmatprep.subr.mxu0 %v6212_v0 }
0x145f   :  { %4163 = vmatpush3.msra.mxu0 %v5441_v38 }
0x1460   :  { %4164 = vmatprep.subr.mxu0 %v6212_v0 }
0x1461   :  { %4165 = vmatpush3.msra.mxu0 %v5445_v44 }
0x1462   :  { %4166 = vmatprep.subr.mxu0 %v6212_v0 }
0x1463   :  { %4167 = vmatpush3.msra.mxu0 %v5449_v56 }
0x1464   :  { %4168 = vmatprep.subr.mxu0 %v6212_v0 }
0x1465   :  { %4169 = vmatpush3.msra.mxu0 %v5453_v50 }
0x1466   :  { %4170 = vmatprep.subr.mxu0 %v6212_v0 }
0x1467   :  { %4171 = vmatpush3.msra.mxu0 %v5457_v59 }
0x1468   :  { %4202 = vmatprep.subr.mxu0 %v6212_v0 }
0x14bf   :  { %v2180_v27 = vpop.permute.xlu1 %2179 }
0x14c0   :  { %v2182_v17 = vadd.f32 %v2180_v27, %v2171_v24 }
0x14c2   :  { %v2187_v38 = vsel %vm93_vm1, %v3421_v29, %v2182_v17 }
0x14c3   :  { %v2185_v44 = vpop.permute.xlu1 %2184 }
0x14c4   :  { %v2188_v56 = vsel %vm95_vm3, %v2187_v38, %v2185_v44  ;;  %v2457_v44 = vpop.permute.xlu0 %2456 }
0x14c5   :  { %4100 = vmatmul.mubr.msk.f32.vlgmr.msra.gmra.mxu1 %vm115_vm4, %v2188_v56 }
0x14c6   :  { %4130 = vmatpush3.msra.mxu1 %v5537_v23  ;;  %4145 = vmatprep.mubr.msk.f32.mxu1 %vm4655_vm0, %v6212_v0 }
0x14c7   :  { %4131 = vmatprep.subr.mxu1 %v6212_v0 }
0x14c8   :  { %4132 = vmatpush3.msra.mxu1 %v5543_v63 }
0x14c9   :  { %4133 = vmatprep.subr.mxu1 %v6212_v0 }
0x14ca   :  { %4134 = vmatpush3.msra.mxu1 %v5547_v49 }
0x14cb   :  { %4135 = vmatprep.subr.mxu1 %v6212_v0 }
0x14cc   :  { %4136 = vmatpush3.msra.mxu1 %v5551_v16 }
0x14cd   :  { %4137 = vmatprep.subr.mxu1 %v6212_v0 }
0x14ce   :  { %4138 = vmatpush3.msra.mxu1 %v5555_v51 }
0x14cf   :  { %4139 = vmatprep.subr.mxu1 %v6212_v0 }
0x14d0   :  { %4140 = vmatpush3.msra.mxu1 %v5560_v6 }
0x14d1   :  { %4141 = vmatprep.subr.mxu1 %v6212_v0 }
0x14d2   :  { %4142 = vmatpush3.msra.mxu1 %v5564_v9 }
0x14d3   :  { %4143 = vmatprep.subr.mxu1 %v6212_v0 }
0x14d4   :  { %4144 = vmatpush3.msra.mxu1 %v5568_v34 }
0x14d5   :  { %4175 = vmatprep.subr.mxu1 %v6212_v0 }
0x14da   :  { %v5828_v50 = vpop.f32.mrf.mxu0 }
0x14dc   :  { %v4074_v59 = vpop.f32.mrf.mxu0 }
0x1510   :  { %v2419_v39 = vpop.f32.mrf.mxu0 }
0x1511   :  { %v2420_v13 = vadd.f32 %v5472_v48, %v2419_v39  ;;  %v5837_v48 = vld [vmem:[%s6177_s1 + $0xc] sm:$0x3] }
0x1512   :  { %v4128_v36 = vpop.f32.mrf.mxu0  ;;  %2605 = vperm.xlu0 %4316, %v5837_v48  }
0x1513   :  { %2430 = vrot.lane.b32.xlu1 %v2420_v13, %s4658_s30  ;;  %v3426_v40 = vmul.f32 -1.442695, %v2420_v13 }
0x1515   :  { %4439 = vpow2.f32 %v3426_v40 }
0x1516   :  { %4317 = vset.pattern.permute.xlu0 %v6211_v62 }
0x1517   :  { %2599 = vperm.xlu0 %4317, %v5837_v48  }
0x1522   :  { %v4440_v15 = vpop.eup %4439 }
0x1523   :  { %v2426_v18 = vadd.f32 1.0, %v4440_v15 }
0x1525   :  { %4441 = vrcp.f32 %v2426_v18 }
0x1532   :  { %v4442_v21 = vpop.eup %4441 }
0x1533   :  { %v2440_v24 = vsub.f32 1.0, %v4442_v21  ;;  %v2446_v17 = vmul.f32 %v4442_v21, %v5689_v8 }
0x1585   :  { %v2258_v30 = vpop.f32.mrf.mxu1  ;;  %v2431_v10 = vpop.permute.xlu1 %2430 }
0x1586   :  { %v2433_v42 = vmul.f32 %v4442_v21, %v2431_v10  ;;  %v2259_v47 = vadd.f32 %v6215_v14, %v2258_v30 }
0x1587   :  { %v4101_v41 = vpop.f32.mrf.mxu1 }
0x1588   :  { %2435 = vrot.lane.b32.xlu1 %v2433_v42, %s4659_s12  ;;  %v3424_v35 = vmul.f32 -1.442695, %v2259_v47 }
0x158a   :  { %4443 = vpow2.f32 %v3424_v35 }
0x158c   :  { %2269 = vrot.lane.b32.xlu1 %v2259_v47, %s4658_s30 }
0x158d   :  { %v5859_v21 = vpop.permute.xlu0 %2605 }
0x1592   :  { %v5866_v41 = vpop.permute.xlu0 %2599 }
0x1597   :  { %v4444_v53 = vpop.eup %4443 }
0x1598   :  { %v2265_v29 = vadd.f32 1.0, %v4444_v53 }
0x159a   :  { %4445 = vrcp.f32 %v2265_v29 }
0x15a7   :  { %v4446_v33 = vpop.eup %4445 }
0x15a8   :  { %v2279_v36 = vsub.f32 1.0, %v4446_v33  ;;  %v2285_v15 = vmul.f32 %v4446_v33, %v5662_v2 }
0x15fa   :  { %v2436_v25 = vpop.permute.xlu1 %2435 }
0x15fb   :  { %v2438_v3 = vadd.f32 %v2436_v25, %v2420_v13 }
0x15fd   :  { %4447 = vtanh.f32 %v2438_v3 }
0x15fe   :  { %v2270_v19 = vpop.permute.xlu1 %2269 }
0x15ff   :  { %v2272_v20 = vmul.f32 %v4446_v33, %v2270_v19 }
0x1601   :  { %2274 = vrot.lane.b32.xlu1 %v2272_v20, %s4659_s12 }
0x1605   :  { %2462 = vperm.xlu1 %4314, %v5757_v52   ;;  %v2459_v52 = vmul.f32 %v2457_v44, %v5689_v8 }
0x1609   :  { %4318 = vset.pattern.permute.xlu1 %v6210_v60 }
0x160a   :  { %v4448_v43 = vpop.eup %4447 }
0x160b   :  { %2442 = vrot.lane.b32.xlu1 %v4448_v43, %s4660_s13 }
0x1673   :  { %v2275_v11 = vpop.permute.xlu1 %2274 }
0x1674   :  { %v2277_v4 = vadd.f32 %v2275_v11, %v2259_v47  ;;  %v5873_v47 = vld [vmem:[%s6176_s0 + $0xc] sm:$0x3] }
0x1676   :  { %4449 = vtanh.f32 %v2277_v4 }
0x1680   :  { %v2463_v7 = vpop.permute.xlu1 %2462 }
0x1683   :  { %v4450_v5 = vpop.eup %4449 }
0x1684   :  { %2281 = vrot.lane.b32.xlu1 %v4450_v5, %s4660_s13  ;;  %v2443_v27 = vpop.permute.xlu1 %2442 }
0x1685   :  { %v2445_v38 = vmul.f32 %v2443_v27, %v2440_v24  ;;  %v4539_v24 = vld [vmem:[%s6179_s3] ss:$0 sm:$0xff] }
0x1687   :  { %v2447_v56 = vadd.f32 %v2446_v17, %v2445_v38 }
0x1689   :  { %v2465_v59 = vmul.f32 %v2463_v7, %v2447_v56 }
0x168b   :  { %v5850_v39 = vadd.f32 %v2465_v59, %v2459_v52 }
0x168d   :  { %v2470_v13 = vrot.slane %v5850_v39, 2  ;;  %v2602_v14 = vmul.f32 %v5866_v41, %v5850_v39  ;;  %v2467_v38 = vmul.f32 %v5850_v39, %v5803_v22 }
0x168f   :  { %2471 = vrot.lane.b32.xlu1 %v2470_v13, %s4660_s13 }
0x16f6   :  { %v2282_v40 = vpop.permute.xlu1 %2281 }
0x16f7   :  { %v2284_v18 = vmul.f32 %v2282_v40, %v2279_v36 }
0x16f9   :  { %v5855_v30 = vadd.f32 %v2285_v15, %v2284_v18 }
0x16fb   :  { %2615 = vrot.lane.b32.xlu0 %v5855_v30, %s4658_s30  ;;  %v2333_v42 = vmul.f32 %v5855_v30, %v4927_v54 }
0x1701   :  { %v2472_v8 = vpop.permute.xlu1 %2471 }
0x1702   :  { %v2608_v10 = vmul.f32 %v5859_v21, %v2472_v8 }
0x1704   :  { %2610 = vrot.lane.b32.xlu1 %v2608_v10, %s4658_s30 }
0x1708   :  { %2335 = vrot.lane.b32.xlu1 %v2333_v42, %s4660_s13 }
0x176d   :  { %v2616_v29 = vpop.permute.xlu0 %2615 }
0x1776   :  { %v2611_v35 = vpop.permute.xlu1 %2610 }
0x1777   :  { %v2613_v53 = vadd.f32 %v2611_v35, %v2602_v14  ;;  %v4664_v14 = vmov 5  }
0x1779   :  { %v2618_v25 = vsel %vm93_vm1, %v5873_v47, %v2613_v53 }
0x177a   :  { %v2336_v3 = vpop.permute.xlu1 %2335  ;;  %v2619_v33 = vsel %vm95_vm3, %v2618_v25, %v2616_v29 }
0x177b   :  { %v2338_v19 = vsel %vm227_vm5, %v2336_v3, 0.0  ;;  %4173 = vmatmul.mubr.msk.f32.vlgmr.msra.gmra.mxu0 %vm115_vm4, %v2619_v33 }
0x177c   :  { %2339 = vadd.xlane.f32.xlu1 %v2338_v19  ;;  %4203 = vmatpush3.msra.mxu0 %v5537_v23 }
0x177d   :  { %4204 = vmatprep.subr.mxu0 %v6212_v0  ;;  %4218 = vmatprep.mubr.msk.f32.mxu0 %vm4655_vm0, %v6212_v0 }
0x177e   :  { %4205 = vmatpush3.msra.mxu0 %v5543_v63 }
0x177f   :  { %4206 = vmatprep.subr.mxu0 %v6212_v0 }
0x1780   :  { %4207 = vmatpush3.msra.mxu0 %v5547_v49 }
0x1781   :  { %4208 = vmatprep.subr.mxu0 %v6212_v0 }
0x1782   :  { %4209 = vmatpush3.msra.mxu0 %v5551_v16  ;;  %v2124_v16 = vadd.f32 %v5676_v58, %v5828_v50 }
0x1783   :  { %4210 = vmatprep.subr.mxu0 %v6212_v0 }
0x1784   :  { %4211 = vmatpush3.msra.mxu0 %v5555_v51  ;;  %v2474_v51 = vmul.f32 %v2472_v8, %v5769_v28 }
0x1785   :  { %4212 = vmatprep.subr.mxu0 %v6212_v0 }
0x1786   :  { %4213 = vmatpush3.msra.mxu0 %v5560_v6 }
0x1787   :  { %4214 = vmatprep.subr.mxu0 %v6212_v0 }
0x1788   :  { %4215 = vmatpush3.msra.mxu0 %v5564_v9 }
0x1789   :  { %4216 = vmatprep.subr.mxu0 %v6212_v0 }
0x178a   :  { %4217 = vmatpush3.msra.mxu0 %v5568_v34  ;;  %v3420_v34 = vmul.f32 -1.442695, %v2124_v16 }
0x178b   :  { %4248 = vmatprep.subr.mxu0 %v6212_v0 }
0x178c   :  { %4451 = vpow2.f32 %v3420_v34  ;;  %v4547_v34 = vld [vmem:[#allocation5 + $0x20] sm:$0xff] }
0x1799   :  { %v4452_v20 = vpop.eup %4451 }
0x1805   :  { %v2340_v23 = vpop.xlane.xlu1 %2339 }
0x1806   :  { %v5900_v63 = vsel %vm2331_vm15, %v5683_v26, %v2340_v23  ;;  %v2130_v26 = vadd.f32 1.0, %v4452_v20  ;;  %v5950_v23 = vld [vmem:[#allocation5 + $0x58] sm:$0xff] }
0x1807   :  { %v2720_v49 = vsel %vm2719_vm14, %v5900_v63, -inf  ;;  %v4548_v20 = vld [vmem:[#allocation5 + $0x18] sm:$0xff] }
0x1808   :  { %2721 = vmax.xlane.f32.xlu0 %v2720_v49  ;;  %4453 = vrcp.f32 %v2130_v26  ;;  %v4542_v49 = vld [vmem:[#allocation5 + $0x48] sm:$0xff]  ;;  %v4549_v26 = vld [vmem:[#allocation5 + $0x10] sm:$0xff] }
0x1815   :  { %v4454_v11 = vpop.eup %4453 }
0x1816   :  { %v2144_v35 = vsub.f32 1.0, %v4454_v11  ;;  %v2150_v29 = vmul.f32 %v4454_v11, %v5725_v57 }
0x181e   :  { %2134 = vrot.lane.b32.xlu0 %v2124_v16, %s4658_s30 }
0x1822   :  { %2476 = vrot.lane.b32.xlu0 %v2474_v51, %s4658_s30  ;;  %v4544_v51 = vld [vmem:[#allocation5 + $0x38] sm:$0xff] }
0x183b   :  { %v2689_v6 = vpop.f32.mrf.mxu0 }
0x183c   :  { %v5915_v27 = vadd.f32 %v4539_v24, %v2689_v6  ;;  %v4545_v6 = vld [vmem:[#allocation5 + $0x30] sm:$0xff] }
0x183d   :  { %v4174_v9 = vpop.f32.mrf.mxu0 }
0x183e   :  { %v3432_v13 = vmul.f32 -1.442695, %v5915_v27  ;;  %v4546_v9 = vld [vmem:[#allocation5 + $0x28] sm:$0xff] }
0x1891   :  { %v2722_v43 = vpop.xlane.xlu0 %2721 }
0x1892   :  { %v2723_v58 = vsub.f32 %v5900_v63, %v2722_v43  ;;  %v4550_v43 = vld [vmem:[#allocation5 + $0x8] sm:$0xff] }
0x1894   :  { %v2724_v50 = vmul.f32 1.442695, %v2723_v58 }
0x1895   :  { %v2135_v4 = vpop.permute.xlu0 %2134 }
0x1896   :  { %v2137_v7 = vmul.f32 %v4454_v11, %v2135_v4  ;;  %4455 = vpow2.f32 %v2724_v50  ;;  %v4551_v11 = vld [vmem:[#allocation5] sm:$0xff] }
0x1898   :  { %2139 = vrot.lane.b32.xlu1 %v2137_v7, %s4659_s12 }
0x1899   :  { %v2477_v17 = vpop.permute.xlu0 %2476 }
0x189a   :  { %v2479_v44 = vadd.f32 %v2477_v17, %v2467_v38 }
0x18a3   :  { %v4456_v28 = vpop.eup %4455 }
0x18a4   :  { %v2726_v5 = vsel %vm2719_vm14, %v4456_v28, 0.0 }
0x18bc   :  { %2727 = vadd.xlane.f32.xlu1 %v2726_v5 }
0x18cd   :  { %2700 = vrot.lane.b32.xlu1 %v5915_v27, %s4658_s30 }
0x18d1   :  { %2481 = vrot.lane.b32.xlu1 %v2479_v44, %s4660_s13 }
0x190a   :  { %v2140_v56 = vpop.permute.xlu1 %2139 }
0x190b   :  { %v2142_v52 = vadd.f32 %v2140_v56, %v2124_v16  ;;  %v4543_v16 = vld [vmem:[#allocation5 + $0x40] sm:$0xff] }
0x190d   :  { %4457 = vtanh.f32 %v2142_v52 }
0x190e   :  { %4459 = vpow2.f32 %v3432_v13 }
0x191a   :  { %v4458_v59 = vpop.eup %4457 }
0x191b   :  { %2146 = vrot.lane.b32.xlu0 %v4458_v59, %s4660_s13  ;;  %v4460_v40 = vpop.eup %4459 }
0x191c   :  { %v2696_v15 = vadd.f32 1.0, %v4460_v40 }
0x1945   :  { %v2728_v36 = vpop.xlane.xlu1 %2727 }
0x1946   :  { %4461 = vrcp.f32 %v2728_v36 }
0x1947   :  { %4463 = vrcp.f32 %v2696_v15 }
0x1949   :  { %v2701_v8 = vpop.permute.xlu1 %2700 }
0x194d   :  { %v2482_v33 = vpop.permute.xlu1 %2481 }
0x1953   :  { %v4462_v22 = vpop.eup %4461 }
0x1954   :  { %v5924_v18 = vmul.f32 %v4462_v22, %v4456_v28  ;;  %v5932_v10 = vpop.eup %4463 }
0x1955   :  { %v2703_v42 = vmul.f32 %v5932_v10, %v2701_v8 }
0x1956   :  { %2733 = vperm.xlu0 %4317, %v5924_v18   ;;  %2739 = vperm.xlu1 %4318, %v5924_v18  }
0x195a   :  { %4319 = vset.pattern.permute.xlu0 %v6213_v12  ;;  %4320 = vset.pattern.permute.xlu1 %v6214_v37 }
0x195b   :  { %2745 = vperm.xlu0 %4319, %v5924_v18   ;;  %2751 = vperm.xlu1 %4320, %v5924_v18  }
0x195f   :  { %4321 = vset.pattern.permute.xlu1 %v4663_v61  ;;  %2705 = vrot.lane.b32.xlu0 %v2703_v42, %s4659_s12 }
0x1960   :  { %2757 = vperm.xlu1 %4321, %v5924_v18   ;;  %4323 = vset.pattern.permute.xlu0 %v6211_v62 }
0x1963   :  { %2783 = vrot.lane.b32.xlu0 %v5850_v39, %s4658_s30 }
0x1964   :  { %4322 = vset.pattern.permute.xlu1 %v4664_v14 }
0x1965   :  { %2763 = vperm.xlu1 %4322, %v5924_v18  }
0x1969   :  { %4326 = vset.pattern.permute.xlu1 %v6214_v37  ;;  %v5956_v37 = vld [vmem:[#allocation5 + $0x50] sm:$0xff] }
0x198d   :  { %v2147_v53 = vpop.permute.xlu0 %2146 }
0x198e   :  { %v2149_v25 = vmul.f32 %v2147_v53, %v2144_v35 }
0x1990   :  { %v5945_v3 = vadd.f32 %v2150_v29, %v2149_v25 }
0x1992   :  { %v2484_v19 = vsel %vm93_vm1, %v2482_v33, %v5945_v3 }
0x1993   :  { %4146 = vmatmul.mubr.msk.f32.vlgmr.msra.gmra.mxu1 %vm95_vm3, %v2484_v19  ;;  %v2710_v19 = vsub.f32 1.0, %v5932_v10 }
0x1994   :  { %4176 = vmatpush3.msra.mxu1 %v5950_v23  ;;  %4199 = vmatprep.mubr.msk.f32.mxu1 %vm4655_vm0, %v6212_v0 }
0x1995   :  { %4177 = vmatprep.subr.mxu1 %v6212_v0 }
0x1996   :  { %4178 = vmatpush3.msra.mxu1 %v5956_v37 }
0x1997   :  { %4179 = vmatprep.subr.mxu1 %v6212_v0 }
0x1998   :  { %4180 = vmatpush3.msra.mxu1 %v4542_v49 }
0x1999   :  { %4181 = vmatprep.subr.mxu1 %v6212_v0 }
0x199a   :  { %4182 = vmatpush3.msra.mxu1 %v4543_v16 }
0x199b   :  { %4183 = vmatprep.subr.mxu1 %v6212_v0 }
0x199c   :  { %4184 = vmatpush3.msra.mxu1 %v4544_v51 }
0x199d   :  { %4185 = vmatprep.subr.mxu1 %v6212_v0 }
0x199e   :  { %4186 = vmatpush3.msra.mxu1 %v4545_v6 }
0x199f   :  { %4187 = vmatprep.subr.mxu1 %v6212_v0 }
0x19a0   :  { %4188 = vmatpush3.msra.mxu1 %v4546_v9 }
0x19a1   :  { %4189 = vmatprep.subr.mxu1 %v6212_v0 }
0x19a2   :  { %4190 = vmatpush3.msra.mxu1 %v4547_v34 }
0x19a3   :  { %4191 = vmatprep.subr.mxu1 %v6212_v0 }
0x19a4   :  { %4192 = vmatpush3.msra.mxu1 %v4548_v20 }
0x19a5   :  { %4193 = vmatprep.subr.mxu1 %v6212_v0 }
0x19a6   :  { %4194 = vmatpush3.msra.mxu1 %v4549_v26 }
0x19a7   :  { %4195 = vmatprep.subr.mxu1 %v6212_v0 }
0x19a8   :  { %4196 = vmatpush3.msra.mxu1 %v4550_v43 }
0x19a9   :  { %4197 = vmatprep.subr.mxu1 %v6212_v0 }
0x19aa   :  { %4198 = vmatpush3.msra.mxu1 %v4551_v11 }
0x19ab   :  { %4221 = vmatprep.subr.mxu1 %v6212_v0 }
0x19d1   :  { %v2734_v4 = vpop.permute.xlu0 %2733  ;;  %v2740_v7 = vpop.permute.xlu1 %2739 }
0x19d2   :  { %v2736_v58 = vmul.f32 %v2734_v4, %v4929_v55  ;;  %v2742_v50 = vmul.f32 %v2740_v7, %v5088_v45 }
0x19d4   :  { %v2743_v24 = vadd.f32 %v2742_v50, %v2736_v58 }
0x19d6   :  { %v2746_v28 = vpop.permute.xlu0 %2745  ;;  %v2752_v5 = vpop.permute.xlu1 %2751 }
0x19d7   :  { %v2748_v17 = vmul.f32 %v2746_v28, %v5256_v32  ;;  %v2754_v56 = vmul.f32 %v2752_v5, %v5481_v46 }
0x19d9   :  { %v2749_v38 = vadd.f32 %v2748_v17, %v2743_v24  ;;  %v2885_v24 = vrot.slane %v5837_v48, 6 }
0x19da   :  { %v2706_v44 = vpop.permute.xlu0 %2705 }
0x19db   :  { %v2708_v52 = vadd.f32 %v2706_v44, %v5915_v27  ;;  %v2758_v59 = vpop.permute.xlu1 %2757  ;;  %v2755_v13 = vadd.f32 %v2754_v56, %v2749_v38 }
0x19dc   :  { %v2760_v36 = vmul.f32 %v2758_v59, %v5662_v2 }
0x19dd   :  { %4465 = vtanh.f32 %v2708_v52 }
0x19de   :  { %v2761_v15 = vadd.f32 %v2760_v36, %v2755_v13  ;;  %v2784_v53 = vpop.permute.xlu0 %2783 }
0x19e0   :  { %v2764_v40 = vpop.permute.xlu1 %2763 }
0x19e1   :  { %v2766_v22 = vmul.f32 %v2764_v40, %v5855_v30 }
0x19e3   :  { %v2767_v8 = vadd.f32 %v2766_v22, %v2761_v15 }
0x19e5   :  { %v2778_v42 = vsel %vm93_vm1, %v5873_v47, %v2767_v8 }
0x19e6   :  { %v2780_v35 = vrot.slane %v2778_v42, 6 }
0x19e8   :  { %v2782_v29 = vsel %vm235_vm2, %v2778_v42, %v2780_v35 }
0x19e9   :  { %v2786_v25 = vsel %vm95_vm3, %v2782_v29, %v2784_v53 }
0x19ea   :  { %v4466_v27 = vpop.eup %4465  ;;  %4200 = vmatmul.mubr.msk.f32.vlgmr.msra.gmra.mxu1 %vm115_vm4, %v2786_v25 }
0x19eb   :  { %2712 = vrot.lane.b32.xlu1 %v4466_v27, %s4660_s13  ;;  %4222 = vmatpush3.msra.mxu1 %v5950_v23 }
0x19ec   :  { %4223 = vmatprep.subr.mxu1 %v6212_v0  ;;  %4245 = vmatprep.mubr.msk.f32.mxu1 %vm4655_vm0, %v6212_v0 }
0x19ed   :  { %4224 = vmatpush3.msra.mxu1 %v5956_v37  ;;  %v2716_v37 = vmul.f32 %v5932_v10, %v5855_v30 }
0x19ee   :  { %4225 = vmatprep.subr.mxu1 %v6212_v0 }
0x19ef   :  { %4226 = vmatpush3.msra.mxu1 %v4542_v49 }
0x19f0   :  { %4227 = vmatprep.subr.mxu1 %v6212_v0 }
0x19f1   :  { %4228 = vmatpush3.msra.mxu1 %v4543_v16 }
0x19f2   :  { %4229 = vmatprep.subr.mxu1 %v6212_v0 }
0x19f3   :  { %4230 = vmatpush3.msra.mxu1 %v4544_v51 }
0x19f4   :  { %4231 = vmatprep.subr.mxu1 %v6212_v0 }
0x19f5   :  { %4232 = vmatpush3.msra.mxu1 %v4545_v6 }
0x19f6   :  { %4233 = vmatprep.subr.mxu1 %v6212_v0 }
0x19f7   :  { %4234 = vmatpush3.msra.mxu1 %v4546_v9  ;;  %v6011_v9 = vld [vmem:[%s6181_s5] ss:$0 sm:$0xff] }
0x19f8   :  { %4235 = vmatprep.subr.mxu1 %v6212_v0 }
0x19f9   :  { %4236 = vmatpush3.msra.mxu1 %v4547_v34 }
0x19fa   :  { %4237 = vmatprep.subr.mxu1 %v6212_v0 }
0x19fb   :  { %4238 = vmatpush3.msra.mxu1 %v4548_v20 }
0x19fc   :  { %4239 = vmatprep.subr.mxu1 %v6212_v0 }
0x19fd   :  { %4240 = vmatpush3.msra.mxu1 %v4549_v26 }
0x19fe   :  { %4241 = vmatprep.subr.mxu1 %v6212_v0 }
0x19ff   :  { %4242 = vmatpush3.msra.mxu1 %v4550_v43 }
0x1a00   :  { %4243 = vmatprep.subr.mxu1 %v6212_v0 }
0x1a01   :  { %4244 = vmatpush3.msra.mxu1 %v4551_v11 }
0x1a53   :  { %v5998_v47 = vpop.f32.mrf.mxu1 }
0x1a55   :  { %v4147_v33 = vpop.f32.mrf.mxu1 }
0x1a5d   :  { %v2713_v23 = vpop.permute.xlu1 %2712 }
0x1a5e   :  { %v2715_v49 = vmul.f32 %v2713_v23, %v2710_v19  ;;  %v4665_v23 = vmov 6  }
0x1a60   :  { %v6003_v16 = vadd.f32 %v2716_v37, %v2715_v49 }
0x1a62   :  { %v2770_v51 = vmul.f32 %v6003_v16, %v4927_v54 }
0x1a64   :  { %2772 = vrot.lane.b32.xlu0 %v2770_v51, %s4660_s13 }
0x1aaa   :  { %v2856_v6 = vpop.f32.mrf.mxu1 }
0x1aab   :  { %v2857_v34 = vadd.f32 %v6011_v9, %v2856_v6 }
0x1aac   :  { %v4201_v20 = vpop.f32.mrf.mxu1 }
0x1aad   :  { %2867 = vrot.lane.b32.xlu0 %v2857_v34, %s4658_s30  ;;  %v3434_v43 = vmul.f32 -1.442695, %v2857_v34 }
0x1aaf   :  { %4467 = vpow2.f32 %v3434_v43 }
0x1abc   :  { %v4468_v54 = vpop.eup %4467 }
0x1abd   :  { %v2863_v11 = vadd.f32 1.0, %v4468_v54 }
0x1abf   :  { %4469 = vrcp.f32 %v2863_v11 }
0x1acc   :  { %v4470_v4 = vpop.eup %4469 }
0x1acd   :  { %v2877_v53 = vsub.f32 1.0, %v4470_v4 }
0x1ad6   :  { %v2773_v10 = vpop.permute.xlu0 %2772 }
0x1ad7   :  { %v2775_v26 = vsel %vm227_vm5, %v2773_v10, 0.0 }
0x1ad8   :  { %2776 = vadd.xlane.f32.xlu1 %v2775_v26 }
0x1b1f   :  { %v2868_v7 = vpop.permute.xlu0 %2867 }
0x1b20   :  { %v2870_v58 = vmul.f32 %v4470_v4, %v2868_v7 }
0x1b22   :  { %2872 = vrot.lane.b32.xlu1 %v2870_v58, %s4659_s12 }
0x1b61   :  { %v2777_v50 = vpop.xlane.xlu1 %2776 }
0x1b62   :  { %v3034_v28 = vsel %vm2768_vm8, %v5900_v63, %v2777_v50 }
0x1b63   :  { %v3036_v5 = vsel %vm3035_vm6, %v3034_v28, -inf }
0x1b64   :  { %3037 = vmax.xlane.f32.xlu0 %v3036_v5 }
0x1b7a   :  { %2886 = vrot.lane.b32.xlu0 %v2885_v24, %s4657_s27 }
0x1b94   :  { %v2873_v17 = vpop.permute.xlu1 %2872 }
0x1b95   :  { %v2875_v38 = vadd.f32 %v2873_v17, %v2857_v34 }
0x1b97   :  { %4471 = vtanh.f32 %v2875_v38 }
0x1ba4   :  { %v4472_v63 = vpop.eup %4471 }
0x1bed   :  { %v3038_v44 = vpop.xlane.xlu0 %3037 }
0x1bee   :  { %v3039_v56 = vsub.f32 %v3034_v28, %v3038_v44 }
0x1bf0   :  { %v3040_v52 = vmul.f32 1.442695, %v3039_v56 }
0x1bf1   :  { %v2887_v59 = vpop.permute.xlu0 %2886 }
0x1bf2   :  { %4473 = vpow2.f32 %v3040_v52  ;;  %v2889_v13 = vsel %vm235_vm2, %v5837_v48, %v2887_v59  ;;  %v2883_v48 = vmul.f32 %v4470_v4, %v5850_v39 }
0x1bf3   :  { %v2890_v36 = vsub.f32 1.0, %v2889_v13 }
0x1bf5   :  { %2893 = vperm.xlu0 %4323, %v2890_v36  }
0x1bf9   :  { %2899 = vperm.xlu0 %4323, %v2889_v13  }
0x1bfd   :  { %2879 = vrot.lane.b32.xlu0 %v4472_v63, %s4660_s13 }
0x1bff   :  { %v4474_v40 = vpop.eup %4473 }
0x1c00   :  { %v3042_v15 = vsel %vm3035_vm6, %v4474_v40, 0.0 }
0x1c01   :  { %3043 = vadd.xlane.f32.xlu1 %v3042_v15 }
0x1c70   :  { %v2894_v22 = vpop.permute.xlu0 %2893 }
0x1c71   :  { %v2896_v37 = vmul.f32 %v2894_v22, %v5850_v39 }
0x1c74   :  { %v2900_v42 = vpop.permute.xlu0 %2899 }
0x1c78   :  { %v2880_v35 = vpop.permute.xlu0 %2879 }
0x1c79   :  { %v2882_v29 = vmul.f32 %v2880_v35, %v2877_v53  ;;  %v3438_v53 = vld [vmem:[%s6177_s1 + $0xe] sm:$0x3]  ;;  %s4666_s1 = smov [#allocation8]  }
0x1c7b   :  { %v2884_v33 = vadd.f32 %v2883_v48, %v2882_v29 }
0x1c7d   :  { %v2902_v19 = vmul.f32 %v2900_v42, %v2884_v33 }
0x1c7f   :  { %v6035_v49 = vadd.f32 %v2902_v19, %v2896_v37 }
0x1c81   :  { %v2907_v51 = vrot.slane %v6035_v49, 2 }
0x1c8a   :  { %v3044_v8 = vpop.xlane.xlu1 %3043 }
0x1c8b   :  { %4475 = vrcp.f32 %v3044_v8 }
0x1c98   :  { %v4476_v25 = vpop.eup %4475 }
0x1c99   :  { %v6027_v27 = vmul.f32 %v4476_v25, %v4474_v40 }
0x1c9b   :  { %3067 = vperm.xlu1 %4326, %v6027_v27   ;;  %3049 = vperm.xlu0 %4323, %v6027_v27  }
0x1c9f   :  { %4329 = vset.pattern.permute.xlu1 %v4665_v23  ;;  %4324 = vset.pattern.permute.xlu0 %v6210_v60 }
0x1ca0   :  { %3085 = vperm.xlu1 %4329, %v6027_v27   ;;  %3055 = vperm.xlu0 %4324, %v6027_v27  }
0x1ca4   :  { %4325 = vset.pattern.permute.xlu0 %v6213_v12  ;;  %3097 = vrot.lane.b32.xlu1 %v6035_v49, %s4658_s30  ;;  %v6051_v12 = vld [vmem:[%s6183_s7] ss:$0 sm:$0xff] }
0x1ca5   :  { %3061 = vperm.xlu0 %4325, %v6027_v27   ;;  %4330 = vset.pattern.permute.xlu1 %v6211_v62  ;;  %v2555_v39 = vadd.f32 %v6051_v12, %v5998_v47 }
0x1ca7   :  { %v3428_v6 = vmul.f32 -1.442695, %v2555_v39 }
0x1ca8   :  { %2908 = vrot.lane.b32.xlu1 %v2907_v51, %s4660_s13 }
0x1ca9   :  { %4327 = vset.pattern.permute.xlu0 %v4663_v61  ;;  %4477 = vpow2.f32 %v3428_v6  ;;  %v4555_v6 = vld [vmem:[#allocation7 + $0x30] sm:$0xff] }
0x1caa   :  { %3073 = vperm.xlu0 %4327, %v6027_v27  }
0x1cae   :  { %4328 = vset.pattern.permute.xlu0 %v4664_v14 }
0x1caf   :  { %3079 = vperm.xlu0 %4328, %v6027_v27  }
0x1cb3   :  { %2565 = vrot.lane.b32.xlu0 %v2555_v39, %s4658_s30 }
0x1cb4   :  { %4331 = vset.pattern.permute.xlu0 %v6211_v62 }
0x1cb6   :  { %v4478_v20 = vpop.eup %4477 }
0x1cb7   :  { %v2561_v26 = vadd.f32 1.0, %v4478_v20  ;;  %v4558_v20 = vld [vmem:[#allocation7 + $0x18] sm:$0xff] }
0x1cb9   :  { %4479 = vrcp.f32 %v2561_v26  ;;  %v4561_v26 = vld [vmem:[#allocation7] sm:$0xff] }
0x1d16   :  { %v3068_v61 = vpop.permute.xlu1 %3067  ;;  %v3050_v34 = vpop.permute.xlu0 %3049 }
0x1d17   :  { %v3052_v54 = vmul.f32 %v3050_v34, %v4929_v55  ;;  %v3070_v5 = vmul.f32 %v3068_v61, %v5481_v46  ;;  %v4556_v61 = vld [vmem:[#allocation7 + $0x28] sm:$0xff]  ;;  %v4557_v34 = vld [vmem:[#allocation7 + $0x20] sm:$0xff] }
0x1d1b   :  { %v3086_v14 = vpop.permute.xlu1 %3085  ;;  %v3056_v10 = vpop.permute.xlu0 %3055 }
0x1d1c   :  { %v3058_v43 = vmul.f32 %v3056_v10, %v5088_v45  ;;  %v3088_v56 = vmul.f32 %v3086_v14, %v6003_v16  ;;  %v2904_v16 = vmul.f32 %v6035_v49, %v5866_v41  ;;  %v3200_v41 = vrot.slane %v3438_v53, 6  ;;  %v4559_v14 = vld [vmem:[#allocation7 + $0x10] sm:$0xff]  ;;  %v4560_v10 = vld [vmem:[#allocation7 + $0x8] sm:$0xff] }
0x1d1e   :  { %v3059_v47 = vadd.f32 %v3058_v43, %v3052_v54 }
0x1d1f   :  { %v3098_v11 = vpop.permute.xlu1 %3097 }
0x1d20   :  { %v3062_v4 = vpop.permute.xlu0 %3061 }
0x1d21   :  { %v3064_v7 = vmul.f32 %v3062_v4, %v5256_v32  ;;  %v4480_v32 = vpop.eup %4479 }
0x1d22   :  { %v2575_v48 = vsub.f32 1.0, %v4480_v32  ;;  %v2581_v19 = vmul.f32 %v4480_v32, %v5945_v3 }
0x1d23   :  { %v3065_v58 = vadd.f32 %v3064_v7, %v3059_v47  ;;  %v2909_v50 = vpop.permute.xlu1 %2908 }
0x1d24   :  { %v2911_v28 = vmul.f32 %v2909_v50, %v5859_v21  ;;  %v3437_v21 = vld [vmem:[%s6176_s0 + $0xe] sm:$0x3] }
0x1d25   :  { %v3074_v24 = vpop.permute.xlu0 %3073  ;;  %v3071_v17 = vadd.f32 %v3070_v5, %v3065_v58 }
0x1d26   :  { %2913 = vrot.lane.b32.xlu1 %v2911_v28, %s4658_s30  ;;  %v3076_v45 = vmul.f32 %v3074_v24, %v5662_v2 }
0x1d28   :  { %v3077_v55 = vadd.f32 %v3076_v45, %v3071_v17 }
0x1d2a   :  { %v3080_v38 = vpop.permute.xlu0 %3079 }
0x1d2b   :  { %v3082_v44 = vmul.f32 %v3080_v38, %v5855_v30 }
0x1d2d   :  { %v3083_v52 = vadd.f32 %v3082_v44, %v3077_v55 }
0x1d2e   :  { %v2566_v59 = vpop.permute.xlu0 %2565 }
0x1d2f   :  { %v3089_v46 = vadd.f32 %v3088_v56, %v3083_v52  ;;  %v2568_v13 = vmul.f32 %v4480_v32, %v2566_v59 }
0x1d31   :  { %v3092_v36 = vsel %vm93_vm1, %v3437_v21, %v3089_v46  ;;  %2570 = vrot.lane.b32.xlu0 %v2568_v13, %s4659_s12 }
0x1d32   :  { %v3094_v2 = vrot.slane %v3092_v36, 6 }
0x1d34   :  { %v3096_v63 = vsel %vm235_vm2, %v3092_v36, %v3094_v2 }
0x1d35   :  { %v3100_v30 = vsel %vm95_vm3, %v3096_v63, %v3098_v11 }
0x1d36   :  { %4246 = vmatmul.mubr.msk.f32.vlgmr.msra.gmra.mxu1 %vm115_vm4, %v3100_v30 }
0x1d98   :  { %v2914_v40 = vpop.permute.xlu1 %2913 }
0x1d99   :  { %v2916_v15 = vadd.f32 %v2914_v40, %v2904_v16 }
0x1d9b   :  { %2918 = vrot.lane.b32.xlu1 %v2916_v15, %s4660_s13 }
0x1da3   :  { %v2571_v22 = vpop.permute.xlu0 %2570 }
0x1da4   :  { %v2573_v8 = vadd.f32 %v2571_v22, %v2555_v39 }
0x1da6   :  { %4481 = vtanh.f32 %v2573_v8 }
0x1db3   :  { %v4482_v42 = vpop.eup %4481 }
0x1db4   :  { %2577 = vrot.lane.b32.xlu0 %v4482_v42, %s4660_s13 }
0x1df6   :  { %v3170_v35 = vpop.f32.mrf.mxu1 }
0x1df7   :  { %v3171_v29 = vadd.f32 %v6011_v9, %v3170_v35  ;;  %v4554_v9 = vld [vmem:[#allocation7 + $0x38] sm:$0xff] }
0x1df8   :  { %v4247_v25 = vpop.f32.mrf.mxu1 }
0x1df9   :  { %3181 = vrot.lane.b32.xlu0 %v3171_v29, %s4658_s30  ;;  %v3440_v43 = vmul.f32 -1.442695, %v3171_v29 }
0x1dfb   :  { %4483 = vpow2.f32 %v3440_v43 }
0x1dfd   :  { %3201 = vrot.lane.b32.xlu0 %v3200_v41, %s4657_s27  ;;  %s3366_s27 = sshll.u32 %s4666_s1, 4  ;;  %s3367_s27 = int_to_ptr.vmem [resolvable:$true] %s3366_s27 }
0x1dfe   :  { %p4627_p2 = scmp.lt.s32.totalorder %s3367_s27, %s3367_s27 }
0x1e08   :  { %v4484_v54 = vpop.eup %4483 }
0x1e09   :  { %v3177_v11 = vadd.f32 1.0, %v4484_v54 }
0x1e0b   :  { %4485 = vrcp.f32 %v3177_v11  ;;  %v6216_v11 = vld [vmem:[#allocation13_spill] sm:$0xff] }
0x1e0d   :  { %v2919_v51 = vpop.permute.xlu1 %2918 }
0x1e18   :  { %v4486_v4 = vpop.eup %4485 }
0x1e19   :  { %v3191_v52 = vsub.f32 1.0, %v4486_v4  ;;  %v3197_v32 = vmul.f32 %v4486_v4, %v6035_v49 }
0x1e26   :  { %v2578_v33 = vpop.permute.xlu0 %2577 }
0x1e27   :  { %v2580_v23 = vmul.f32 %v2578_v33, %v2575_v48 }
0x1e29   :  { %v6085_v37 = vadd.f32 %v2581_v19, %v2580_v23 }
0x1e2b   :  { %v2921_v39 = vsel %vm93_vm1, %v2919_v51, %v6085_v37 }
0x1e2c   :  { %4219 = vmatmul.mubr.msk.f32.vlgmr.msra.gmra.mxu0 %vm95_vm3, %v2921_v39 }
0x1e2d   :  { %4249 = vmatpush3.msra.mxu0 %v4554_v9  ;;  %4264 = vmatprep.mubr.msk.f32.mxu0 %vm4655_vm0, %v6212_v0  ;;  %vm3090_vm0 = vcmask 56320  }
0x1e2e   :  { %4250 = vmatprep.subr.mxu0 %v6212_v0 }
0x1e2f   :  { %4251 = vmatpush3.msra.mxu0 %v4555_v6 }
0x1e30   :  { %4252 = vmatprep.subr.mxu0 %v6212_v0 }
0x1e31   :  { %4253 = vmatpush3.msra.mxu0 %v4556_v61 }
0x1e32   :  { %4254 = vmatprep.subr.mxu0 %v6212_v0 }
0x1e33   :  { %4255 = vmatpush3.msra.mxu0 %v4557_v34 }
0x1e34   :  { %4256 = vmatprep.subr.mxu0 %v6212_v0 }
0x1e35   :  { %4257 = vmatpush3.msra.mxu0 %v4558_v20 }
0x1e36   :  { %4258 = vmatprep.subr.mxu0 %v6212_v0 }
0x1e37   :  { %4259 = vmatpush3.msra.mxu0 %v4559_v14 }
0x1e38   :  { %4260 = vmatprep.subr.mxu0 %v6212_v0 }
0x1e39   :  { %4261 = vmatpush3.msra.mxu0 %v4560_v10 }
0x1e3a   :  { %4262 = vmatprep.subr.mxu0 %v6212_v0 }
0x1e3b   :  { %4263 = vmatpush3.msra.mxu0 %v4561_v26 }
0x1e6b   :  { %v3182_v47 = vpop.permute.xlu0 %3181 }
0x1e6c   :  { %v3184_v7 = vmul.f32 %v4486_v4, %v3182_v47  ;;  %v6217_v4 = vld [vmem:[#allocation12_spill] sm:$0xff] }
0x1e6d   :  { %v644_v47 = vsel %vm643_vm7, %v6217_v4, 0.0 }
0x1e6e   :  { %3186 = vrot.lane.b32.xlu1 %v3184_v7, %s4659_s12 }
0x1e6f   :  { %v3202_v58 = vpop.permute.xlu0 %3201 }
0x1e70   :  { %v3204_v50 = vsel %vm235_vm2, %v3438_v53, %v3202_v58  ;;  %v6219_v58 = vld [vmem:[#allocation15_spill] sm:$0xff]  ;;  %vm508_vm2 = vcmask 326656  }
0x1e71   :  { %v3205_v28 = vsub.f32 1.0, %v3204_v50  ;;  %3214 = vperm.xlu0 %4331, %v3204_v50   ;;  %v1476_v50 = vsel %vm1475_vm11, %v6219_v58, 0.0 }
0x1e73   :  { %3208 = vperm.xlu1 %4330, %v3205_v28   ;;  %v6220_v28 = vld [vmem:[#allocation18_spill] sm:$0xff] }
0x1e75   :  { %4332 = vset.pattern.permute.xlu0 %v6210_v60 }
0x1e76   :  { %3226 = vperm.xlu0 %4332, %v3438_v53  }
0x1e7a   :  { %4333 = vset.pattern.permute.xlu0 %v6211_v62 }
0x1e7b   :  { %3220 = vperm.xlu0 %4333, %v3438_v53  }
0x1e7f   :  { %4334 = vset.pattern.permute.xlu0 %v6210_v60 }
0x1ee0   :  { %v3187_v0 = vpop.permute.xlu1 %3186 }
0x1ee1   :  { %v3189_v5 = vadd.f32 %v3187_v0, %v3171_v29  ;;  %v1901_v0 = vsel %vm1900_vm13, %v6220_v28, 0.0 }
0x1ee3   :  { %4487 = vtanh.f32 %v3189_v5  ;;  %v2332_v5 = vsel %vm2331_vm15, %v5708_v31, 0.0 }
0x1eec   :  { %v2991_v24 = vpop.f32.mrf.mxu0  ;;  %v3215_v46 = vpop.permute.xlu0 %3214 }
0x1eed   :  { %v2992_v38 = vadd.f32 %v6051_v12, %v2991_v24  ;;  %v2769_v24 = vsel %vm2768_vm8, %v5924_v18, 0.0  ;;  %v6221_v18 = vld [vmem:[#allocation16_spill] sm:$0xff] }
0x1eee   :  { %v4220_v17 = vpop.f32.mrf.mxu0  ;;  %v3209_v62 = vpop.permute.xlu1 %3208 }
0x1eef   :  { %v3436_v55 = vmul.f32 -1.442695, %v2992_v38  ;;  %v3211_v13 = vmul.f32 %v3209_v62, %v6035_v49  ;;  %v3091_v17 = vsel %vm3090_vm0, %v6027_v27, 0.0 }
0x1ef0   :  { %v4488_v45 = vpop.eup %4487 }
0x1ef1   :  { %3193 = vrot.lane.b32.xlu1 %v4488_v45, %s4660_s13  ;;  %4489 = vpow2.f32 %v3436_v55  ;;  %v3227_v15 = vpop.permute.xlu0 %3226 }
0x1ef5   :  { %3002 = vrot.lane.b32.xlu1 %v2992_v38, %s4658_s30 }
0x1ef6   :  { %v3221_v49 = vpop.permute.xlu0 %3220 }
0x1efe   :  { %v4490_v44 = vpop.eup %4489 }
0x1eff   :  { %v2998_v56 = vadd.f32 1.0, %v4490_v44 }
0x1f01   :  { %4491 = vrcp.f32 %v2998_v56 }
0x1f0e   :  { %v4492_v16 = vpop.eup %4491 }
0x1f0f   :  { %v3012_v33 = vsub.f32 1.0, %v4492_v16  ;;  %v3018_v23 = vmul.f32 %v4492_v16, %v6085_v37 }
0x1f63   :  { %v3194_v60 = vpop.permute.xlu1 %3193 }
0x1f64   :  { %v3196_v21 = vmul.f32 %v3194_v60, %v3191_v52 }
0x1f66   :  { %v3198_v59 = vadd.f32 %v3197_v32, %v3196_v21 }
0x1f67   :  { %v3003_v30 = vpop.permute.xlu1 %3002 }
0x1f68   :  { %v3217_v36 = vmul.f32 %v3215_v46, %v3198_v59  ;;  %v3005_v40 = vmul.f32 %v4492_v16, %v3003_v30 }
0x1f6a   :  { %v3218_v2 = vadd.f32 %v3217_v36, %v3211_v13 }
0x1f6c   :  { %v3230_v63 = vrot.slane %v3218_v2, 2  ;;  %v3223_v29 = vmul.f32 %v3221_v49, %v3218_v2 }
0x1f6e   :  { %3231 = vrot.lane.b32.xlu1 %v3230_v63, %s4660_s13 }
0x1f72   :  { %3007 = vrot.lane.b32.xlu1 %v3005_v40, %s4659_s12 }
0x1fe0   :  { %v3232_v22 = vpop.permute.xlu1 %3231 }
0x1fe1   :  { %v3234_v8 = vmul.f32 %v3232_v22, %v3227_v15 }
0x1fe3   :  { %3236 = vrot.lane.b32.xlu1 %v3234_v8, %s4658_s30 }
0x1fe4   :  { %v3008_v42 = vpop.permute.xlu1 %3007 }
0x1fe5   :  { %v3010_v35 = vadd.f32 %v3008_v42, %v2992_v38 }
0x1fe7   :  { %4493 = vtanh.f32 %v3010_v35 }
0x1ff4   :  { %v4494_v53 = vpop.eup %4493 }
0x1ff5   :  { %3014 = vrot.lane.b32.xlu1 %v4494_v53, %s4660_s13 }
0x2055   :  { %v3237_v25 = vpop.permute.xlu1 %3236 }
0x2056   :  { %v3239_v41 = vadd.f32 %v3237_v25, %v3223_v29 }
0x2058   :  { %3241 = vrot.lane.b32.xlu0 %v3239_v41, %s4660_s13 }
0x2067   :  { %v3015_v48 = vpop.permute.xlu1 %3014 }
0x2068   :  { %v3017_v19 = vmul.f32 %v3015_v48, %v3012_v33 }
0x206a   :  { %v3019_v51 = vadd.f32 %v3018_v23, %v3017_v19 }
0x20ca   :  { %v3242_v39 = vpop.permute.xlu0 %3241 }
0x20cb   :  { %v3244_v9 = vsel %vm93_vm1, %v3242_v39, %v3019_v51 }
0x20cc   :  { %4265 = vmatmul.mubr.msk.f32.vlgmr.msra.gmra.mxu0 %vm95_vm3, %v3244_v9 }
0x218c   :  { %v3314_v6 = vpop.f32.mrf.mxu0 }
0x218d   :  { %v3315_v61 = vadd.f32 %v6051_v12, %v3314_v6  ;;  %v6218_v12 = vld [vmem:[#allocation14_spill] sm:$0xff] }
0x218e   :  { %v4266_v34 = vpop.f32.mrf.mxu0  ;;  %v1057_v7 = vsel %vm1056_vm9, %v6218_v12, 0.0 }
0x218f   :  { %3325 = vrot.lane.b32.xlu1 %v3315_v61, %s4658_s30  ;;  %v3442_v20 = vmul.f32 -1.442695, %v3315_v61 }
0x2191   :  { %4495 = vpow2.f32 %v3442_v20 }
0x219e   :  { %v4496_v14 = vpop.eup %4495 }
0x219f   :  { %v3321_v10 = vadd.f32 1.0, %v4496_v14 }
0x21a1   :  { %4497 = vrcp.f32 %v3321_v10 }
0x21ae   :  { %v4498_v26 = vpop.eup %4497 }
0x21af   :  { %v3335_v62 = vsub.f32 1.0, %v4498_v26  ;;  %v3341_v32 = vmul.f32 %v4498_v26, %v3019_v51 }
0x2201   :  { %v3326_v43 = vpop.permute.xlu1 %3325 }
0x2202   :  { %v3328_v54 = vmul.f32 %v4498_v26, %v3326_v43 }
0x2204   :  { %3330 = vrot.lane.b32.xlu0 %v3328_v54, %s4659_s12  ;;  %s4622_s12 = scalar_lea.vmem %s3367_s27, 256 }
0x2205   :  { %p4623_p1 = scmp.ne.s32.totalorder %s3367_s27, %s4622_s12  ;;  %p4628_p3 = scmp.lt.s32.totalorder %s4622_s12, %s4622_s12 }
0x2207   :  { %p4629_p4 = por %p4628_p3, %p4627_p2 }
0x2208   :  { %504 = vrot.lane.b32.xlu0 %v6216_v11, %s4660_s13 }
0x2209   :  { %p4630_p5 = pnand %p4629_p4, %p4623_p1 }
0x220c   :  { %900 = vrot.lane.b32.xlu0 %v644_v47, %s4658_s30 }
0x2210   :  { %1313 = vrot.lane.b32.xlu0 %v1057_v7, %s4658_s30 }
0x2214   :  { %1732 = vrot.lane.b32.xlu0 %v1476_v50, %s4658_s30 }
0x2218   :  { %2157 = vrot.lane.b32.xlu0 %v1901_v0, %s4658_s30 }
0x221c   :  { %2588 = vrot.lane.b32.xlu0 %v2332_v5, %s4658_s30 }
0x2220   :  { %3025 = vrot.lane.b32.xlu0 %v2769_v24, %s4658_s30 }
0x2224   :  { %3348 = vrot.lane.b32.xlu0 %v3091_v17, %s4658_s30 }
0x2276   :  { %v3331_v45 = vpop.permute.xlu0 %3330 }
0x2277   :  { %v3333_v38 = vadd.f32 %v3331_v45, %v3315_v61 }
0x2279   :  { %4499 = vtanh.f32 %v3333_v38 }
0x227a   :  { %v505_v55 = vpop.permute.xlu0 %504 }
0x227b   :  { %v507_v44 = vsel %vm93_vm1, %v505_v55, 0.0 }
0x227c   :  { %v509_v31 = vsel %vm508_vm2, %v507_v44, 0.0 }
0x227d   :  { %3353 = vst [vmem:[#allocation8] sm:$0x3] %v509_v31 }
0x227e   :  { %v901_v27 = vpop.permute.xlu0 %900 }
0x2282   :  { %v1314_v52 = vpop.permute.xlu0 %1313 }
0x2286   :  { %v4500_v56 = vpop.eup %4499 }
0x2287   :  { %3337 = vrot.lane.b32.xlu1 %v4500_v56, %s4660_s13 }
0x228b   :  { %896 = vrot.lane.b32.xlu1 %v6221_v18, %s4660_s13 }
0x228f   :  { %1309 = vrot.lane.b32.xlu1 %v5577_v1, %s4660_s13 }
0x2293   :  { %1728 = vrot.lane.b32.xlu1 %v5725_v57, %s4660_s13  ;;  %v1733_v57 = vpop.permute.xlu0 %1732 }
0x2297   :  { %2153 = vrot.lane.b32.xlu1 %v5945_v3, %s4660_s13  ;;  %v2158_v2 = vpop.permute.xlu0 %2157 }
0x229b   :  { %2584 = vrot.lane.b32.xlu1 %v6085_v37, %s4660_s13  ;;  %v2589_v22 = vpop.permute.xlu0 %2588 }
0x229f   :  { %3021 = vrot.lane.b32.xlu1 %v3019_v51, %s4660_s13  ;;  %v3026_v49 = vpop.permute.xlu0 %3025 }
0x22a3   :  { %v3349_v48 = vpop.permute.xlu0 %3348 }
0x22f9   :  { %v3338_v60 = vpop.permute.xlu1 %3337 }
0x22fa   :  { %v3340_v21 = vmul.f32 %v3338_v60, %v3335_v62 }
0x22fc   :  { %v3342_v59 = vadd.f32 %v3341_v32, %v3340_v21 }
0x22fd   :  { %v897_v46 = vpop.permute.xlu1 %896 }
0x22fe   :  { %v903_v1 = vsel %vm93_vm1, %v897_v46, %v901_v27  ;;  %3344 = vrot.lane.b32.xlu1 %v3342_v59, %s4660_s13 }
0x22ff   :  { %v904_v3 = vsel %vm508_vm2, %v903_v1, 0.0 }
0x2300   :  { %3354 = vst [vmem:[#allocation8 + $0x2] sm:$0x3] %v904_v3 }
0x2301   :  { %v1310_v13 = vpop.permute.xlu1 %1309 }
0x2302   :  { %v1316_v37 = vsel %vm93_vm1, %v1310_v13, %v1314_v52 }
0x2303   :  { %v1317_v36 = vsel %vm508_vm2, %v1316_v37, 0.0 }
0x2304   :  { %3355 = vst [vmem:[#allocation8 + $0x4] sm:$0x3] %v1317_v36 }
0x2305   :  { %v1729_v63 = vpop.permute.xlu1 %1728 }
0x2306   :  { %v1735_v30 = vsel %vm93_vm1, %v1729_v63, %v1733_v57 }
0x2307   :  { %v1736_v16 = vsel %vm508_vm2, %v1735_v30, 0.0 }
0x2308   :  { %3356 = vst [vmem:[#allocation8 + $0x6] sm:$0x3] %v1736_v16 }
0x2309   :  { %v2154_v40 = vpop.permute.xlu1 %2153 }
0x230a   :  { %v2160_v15 = vsel %vm93_vm1, %v2154_v40, %v2158_v2 }
0x230b   :  { %v2161_v8 = vsel %vm508_vm2, %v2160_v15, 0.0 }
0x230c   :  { %3357 = vst [vmem:[#allocation8 + $0x8] sm:$0x3] %v2161_v8 }
0x230d   :  { %v2585_v42 = vpop.permute.xlu1 %2584 }
0x230e   :  { %v2591_v35 = vsel %vm93_vm1, %v2585_v42, %v2589_v22 }
0x230f   :  { %v2592_v53 = vsel %vm508_vm2, %v2591_v35, 0.0 }
0x2310   :  { %3358 = vst [vmem:[#allocation8 + $0xa] sm:$0x3] %v2592_v53 }
0x2311   :  { %v3022_v29 = vpop.permute.xlu1 %3021 }
0x2312   :  { %v3028_v25 = vsel %vm93_vm1, %v3022_v29, %v3026_v49 }
0x2313   :  { %v3029_v41 = vsel %vm508_vm2, %v3028_v25, 0.0 }
0x2314   :  { %3359 = vst [vmem:[#allocation8 + $0xc] sm:$0x3] %v3029_v41 }
0x2370   :  { %v3345_v33 = vpop.permute.xlu1 %3344 }
0x2371   :  { %v3351_v19 = vsel %vm93_vm1, %v3345_v33, %v3349_v48 }
0x2372   :  { %v3352_v23 = vsel %vm508_vm2, %v3351_v19, 0.0 }
0x2373   :  { %3360 = vst [vmem:[#allocation8 + $0xe] sm:$0x3] %v3352_v23 }
0x2374   :  { %4633 = shalt.err (!%p4630_p5)
}
0x2375   :  { %s4667_s13 = smov 2  }
0x2376   :  { %3372 = dma.vmem_to_hbm [thread:$0]  %s3367_s27, 256, %s6185_s9, [#allocation4], %s4658_s30, %s4658_s30, %s4667_s13  }
0x2377   :  { %4646 = dma.done.wait [#allocation4], 256  }
0x2378   :  { %4647 = vsyncadd [#allocation4], 4294967040 }
0x2379   :  { %3376 = vsyncpa [#allocation3], 1 }
0x237a   :  { %3377 = vsyncpa [#allocation6], 1 }
0x237b   :  { %3378 = vsyncpa [#allocation4], 1 }

</bundles_post_ra>
